<compile_context>
chip_gen: v7x
topology: tpu7x:2x2x1
jax: 0.10.0
libtpu: 0.0.40
codegen_flags: <defaults>
</compile_context>

<pallas_src>
import jax
import jax.numpy as jnp
import numpy as np
from jax import lax
from jax.experimental import pallas as pl
from jax.experimental.pallas import tpu as pltpu


def aspp_kernel(lhs_ref, wbig_ref, wproj_ref, shift_p_ref, out_ref):
    # lhs_ref   : (TILE, Kpad)    bf16  im2col chunk; column K is the 1.0 bias lane
    # wbig_ref  : (Kpad, 4*Cout)  bf16  block-diag weights, branch-BN scale folded
    #                                    into columns, branch-BN shift in row K
    # wproj_ref : (4*Cout, Cout)  bf16  projection weights, proj-BN scale folded in
    # shift_p   : (1, Cout)       f32   proj-BN shift + per-batch pooled-branch fold
    h = jnp.maximum(
        jnp.dot(lhs_ref[...], wbig_ref[...], preferred_element_type=jnp.float32),
        0.0)
    y = jnp.dot(h.astype(jnp.bfloat16), wproj_ref[...],
                preferred_element_type=jnp.float32)
    out_ref[...] = jnp.maximum(y + shift_p_ref[...], 0.0).astype(out_ref.dtype)


def _pick_tile(hw, n_batch, max_tile=1024):
    # Prefer the largest tile (fewest grid steps / full MXU rows), but:
    #  * cap the f32 intermediate (TILE, 4*Cout) against v7x's 64 MiB VMEM
    #    (max_tile=1024 -> 4 MiB),
    #  * keep the sublane dim a multiple of 8 (or the full extent),
    #  * keep >= 2 parallel grid points for dual-TensorCore chips.
    cand = [t for t in range(1, hw + 1)
            if hw % t == 0 and t <= max_tile and (t % 8 == 0 or t == hw)]
    if not cand:
        cand = [hw]
    best = max(cand)
    if n_batch * (hw // best) < 2:
        split = [t for t in cand if hw // t >= 2]
        if split:
            best = max(split)
    return best


def aspp_forward(x_nhwc, params, rates):
    N, H, W, Cin = x_nhwc.shape
    Cout = params["w0"].shape[1]
    HW = H * W
    scales, shifts = params["scales"], params["shifts"]

    # ---- wrapper-side im2col: lane-dense LHS (N, H*W, Kpad) with a bias lane ----
    dmax = max(rates)
    xp = jnp.pad(x_nhwc, ((0, 0), (dmax, dmax), (dmax, dmax), (0, 0)))
    pieces = [x_nhwc]                                   # 1x1 branch (raw pixels)
    for d in rates:
        for ky in range(3):
            for kx in range(3):
                r0 = dmax + (ky - 1) * d
                c0 = dmax + (kx - 1) * d
                pieces.append(xp[:, r0:r0 + H, c0:c0 + W, :])
    K = (1 + 3 * 9) * Cin                               # 112 for Cin=4
    pieces.append(jnp.ones((N, H, W, 1), x_nhwc.dtype))  # bias lane (column K)
    Kb = K + 1
    Kpad = ((Kb + 127) // 128) * 128
    lhs = jnp.concatenate(pieces, axis=-1).reshape(N, HW, Kb)
    lhs = jnp.pad(lhs, ((0, 0), (0, 0), (0, Kpad - Kb))).astype(jnp.bfloat16)

    # ---- block-diagonal weight: one matmul covers branches 0..3.
    #      BN scale folded into columns (f32, pre-cast); BN shift in bias row K.
    wbig = jnp.zeros((Kpad, 4 * Cout), jnp.float32)
    wbig = wbig.at[0:Cin, 0:Cout].set(params["w0"] * scales[0][None, :])
    off = Cin
    for i in (1, 2, 3):
        wd = params[f"wd{i}_raw"].reshape(9 * Cin, Cout) * scales[i][None, :]
        wbig = wbig.at[off:off + 9 * Cin, i * Cout:(i + 1) * Cout].set(wd)
        off += 9 * Cin
    shift_b = jnp.concatenate([shifts[i] for i in range(4)])            # (4*Cout,)
    wbig = wbig.at[K, :].set(shift_b)                    # bias lane row
    wbig = wbig.astype(jnp.bfloat16)

    # projection weights for branch rows 0..3, proj-BN scale folded into columns
    wproj4 = (params["wproj"][:4 * Cout, :] * scales[5][None, :]).astype(jnp.bfloat16)

    # ---- global-pool branch: tiny, compute in XLA and fold into projection shift ----
    xm = jnp.mean(x_nhwc, axis=(1, 2))                                  # (N, Cin)
    pb = jnp.maximum(xm @ params["wpool"] * scales[4] + shifts[4], 0.0)  # (N, Cout)
    pool_contrib = pb @ params["wproj"][4 * Cout:5 * Cout, :]            # (N, Cout)
    shift_p = (shifts[5][None, :] + pool_contrib * scales[5][None, :]
               ).reshape(N, 1, Cout).astype(jnp.float32)

    # ---- spatial tiling: big tiles (few steps, full MXU rows), batch x tiles grid ----
    TILE = _pick_tile(HW, N)
    n_tiles = HW // TILE

    out = pl.pallas_call(
        aspp_kernel,
        out_shape=jax.ShapeDtypeStruct((N, HW, Cout), jnp.bfloat16),
        grid=(N, n_tiles),
        in_specs=[
            pl.BlockSpec((None, TILE, Kpad), lambda n, t: (n, t, 0)),
            pl.BlockSpec((Kpad, 4 * Cout), lambda n, t: (0, 0)),
            pl.BlockSpec((4 * Cout, Cout), lambda n, t: (0, 0)),
            pl.BlockSpec((None, 1, Cout), lambda n, t: (n, 0, 0)),
        ],
        out_specs=pl.BlockSpec((None, TILE, Cout), lambda n, t: (n, t, 0)),
        compiler_params=pltpu.CompilerParams(
            dimension_semantics=("parallel", "parallel")),
    )(lhs, wbig, wproj4, shift_p)
    return out.reshape(N, H, W, Cout)


def bn_fold(gamma, beta, mean, var, eps=1e-5):
    scale = gamma / jnp.sqrt(var + eps)
    shift = beta - mean * scale
    return scale, shift


def init_params(key, Cin, Cout, rates):
    ks = jax.random.split(key, 10)

    def nrm(k, shape, scale):
        return (scale * jax.random.normal(k, shape)).astype(jnp.float32)

    p = {}
    p["w0"] = nrm(ks[0], (Cin, Cout), 1.0 / np.sqrt(Cin))
    p["wd1_raw"] = nrm(ks[1], (3, 3, Cin, Cout), 1.0 / np.sqrt(9 * Cin))
    p["wd2_raw"] = nrm(ks[2], (3, 3, Cin, Cout), 1.0 / np.sqrt(9 * Cin))
    p["wd3_raw"] = nrm(ks[3], (3, 3, Cin, Cout), 1.0 / np.sqrt(9 * Cin))
    p["wpool"] = nrm(ks[4], (Cin, Cout), 1.0 / np.sqrt(Cin))
    p["wproj"] = nrm(ks[5], (5 * Cout, Cout), 1.0 / np.sqrt(5 * Cout))
    # 6 BatchNorms: branch0..branch4 + projection (eval-mode running stats)
    gamma = 1.0 + 0.1 * jax.random.uniform(ks[6], (6, Cout))
    beta = 0.05 * jax.random.normal(ks[7], (6, Cout))
    mean = 0.02 * jax.random.normal(ks[8], (6, Cout))
    var = 1.0 + 0.1 * jax.random.uniform(ks[9], (6, Cout))
    scales, shifts = bn_fold(gamma, beta, mean, var)
    p["scales"] = scales.astype(jnp.float32)
    p["shifts"] = shifts.astype(jnp.float32)
    return p


def aspp_ref_nchw(x, p, rates):
    """Pure-JAX reference matching PyTorch ASPP (eval mode) semantics, NCHW."""
    N, Cin, H, W = x.shape
    Cout = p["w0"].shape[1]
    dn = ("NCHW", "HWIO", "NCHW")

    def bn_relu(y, i):
        s = p["scales"][i].reshape(1, Cout, 1, 1)
        b = p["shifts"][i].reshape(1, Cout, 1, 1)
        return jnp.maximum(y * s + b, 0.0)

    def conv(inp, w, pad, dil):
        return lax.conv_general_dilated(inp, w, (1, 1), pad,
                                        rhs_dilation=dil, dimension_numbers=dn)

    branches = [bn_relu(conv(x, p["w0"].reshape(1, 1, Cin, Cout),
                             [(0, 0), (0, 0)], (1, 1)), 0)]
    for i, d in enumerate(rates, start=1):
        branches.append(bn_relu(conv(x, p[f"wd{i}_raw"], [(d, d), (d, d)], (d, d)), i))
    xm = jnp.mean(x, axis=(2, 3), keepdims=True)
    pool = bn_relu(conv(xm, p["wpool"].reshape(1, 1, Cin, Cout),
                        [(0, 0), (0, 0)], (1, 1)), 4)
    branches.append(jnp.broadcast_to(pool, (N, Cout, H, W)))
    cat = jnp.concatenate(branches, axis=1)
    y = conv(cat, p["wproj"].reshape(1, 1, 5 * Cout, Cout), [(0, 0), (0, 0)], (1, 1))
    return bn_relu(y, 5)


if __name__ == "__main__":
    N, Cin, H, W = 2, 4, 16, 16
    Cout = 256                 # hardcoded in the PyTorch module
    rates = (2, 4, 6)          # atrous_rates

    key = jax.random.PRNGKey(0)
    kx, kp = jax.random.split(key)
    x_nchw = jax.random.normal(kx, (N, Cin, H, W), jnp.float32)
    params = init_params(kp, Cin, Cout, rates)

    # kernel path (NHWC inside, NCHW at the boundary to match PyTorch)
    x_nhwc = jnp.transpose(x_nchw, (0, 2, 3, 1))
    out_nhwc = aspp_forward(x_nhwc, params, rates)      # bf16
    out_nchw = jnp.transpose(out_nhwc, (0, 3, 1, 2))    # transpose stays bf16
    jax.block_until_ready(out_nchw)

    # correctness check against pure-JAX f32 reference (kernel matmuls/output are bf16)
    ref = aspp_ref_nchw(x_nchw, params, rates)
    np.testing.assert_allclose(np.asarray(out_nchw).astype(np.float32),
                               np.asarray(ref), rtol=5e-2, atol=5e-2)

    print("KERNEL_OK")
</pallas_src>

<mosaic_0001>
module attributes {stable_mosaic.version = 11 : i64} {
  func.func @aspp_kernel(%arg0: i32, %arg1: i32, %arg2: memref<1x256x128xbf16, #tpu.memory_space<vmem>>, %arg3: memref<128x1024xbf16, #tpu.memory_space<vmem>>, %arg4: memref<1024x256xbf16, #tpu.memory_space<vmem>>, %arg5: memref<1x1x256xf32, #tpu.memory_space<vmem>>, %arg6: memref<1x256x256xbf16, #tpu.memory_space<vmem>>) attributes {dimension_semantics = [#tpu.dimension_semantics<parallel>, #tpu.dimension_semantics<parallel>], iteration_bounds = array<i64: 2, 1>, scalar_prefetch = 0 : i64, scratch_operands = 0 : i64, tpu.core_type = #tpu.core_type<tc>, window_params = [{transform_indices = @transform_0, window_bounds = array<i64: 1, 256, 128>}, {pipeline_mode = #tpu.pipeline_mode<synchronous>, transform_indices = @transform_1, window_bounds = array<i64: 128, 1024>}, {pipeline_mode = #tpu.pipeline_mode<synchronous>, transform_indices = @transform_2, window_bounds = array<i64: 1024, 256>}, {transform_indices = @transform_3, window_bounds = array<i64: 1, 1, 256>}, {transform_indices = @transform_4, window_bounds = array<i64: 1, 256, 256>}]} {
    %c0 = arith.constant 0 : index
    %c0_0 = arith.constant 0 : index
    %c0_1 = arith.constant 0 : index
    %0 = vector.load %arg2[%c0, %c0_0, %c0_1] : memref<1x256x128xbf16, #tpu.memory_space<vmem>>, vector<1x256x128xbf16>
    %1 = vector.shape_cast %0 : vector<1x256x128xbf16> to vector<256x128xbf16>
    %c0_2 = arith.constant 0 : index
    %c0_3 = arith.constant 0 : index
    %2 = vector.load %arg3[%c0_2, %c0_3] : memref<128x1024xbf16, #tpu.memory_space<vmem>>, vector<128x1024xbf16>
    %cst = arith.constant dense<0.000000e+00> : vector<256x1024xf32>
    %3 = tpu.matmul %1, %2, %cst {dimension_numbers = #tpu.dot_dimension_numbers<[1], [0], [0], [1], [0, 0, 1, 1], [], []>} : vector<256x128xbf16>, vector<128x1024xbf16>, vector<256x1024xf32> -> vector<256x1024xf32>
    %cst_4 = arith.constant 0.000000e+00 : f32
    %4 = vector.broadcast %cst_4 : f32 to vector<256x1024xf32>
    %5 = arith.maximumf %3, %4 : vector<256x1024xf32>
    %6 = arith.truncf %5 : vector<256x1024xf32> to vector<256x1024xbf16>
    %c0_5 = arith.constant 0 : index
    %c0_6 = arith.constant 0 : index
    %7 = vector.load %arg4[%c0_5, %c0_6] : memref<1024x256xbf16, #tpu.memory_space<vmem>>, vector<1024x256xbf16>
    %cst_7 = arith.constant dense<0.000000e+00> : vector<256x256xf32>
    %8 = tpu.matmul %6, %7, %cst_7 {dimension_numbers = #tpu.dot_dimension_numbers<[1], [0], [0], [1], [0, 0, 1, 1], [], []>} : vector<256x1024xbf16>, vector<1024x256xbf16>, vector<256x256xf32> -> vector<256x256xf32>
    %c0_8 = arith.constant 0 : index
    %c0_9 = arith.constant 0 : index
    %c0_10 = arith.constant 0 : index
    %9 = vector.load %arg5[%c0_8, %c0_9, %c0_10] : memref<1x1x256xf32, #tpu.memory_space<vmem>>, vector<1x1x256xf32>
    %10 = vector.shape_cast %9 : vector<1x1x256xf32> to vector<1x256xf32>
    %11 = vector.broadcast %10 : vector<1x256xf32> to vector<256x256xf32>
    %12 = arith.addf %8, %11 : vector<256x256xf32>
    %cst_11 = arith.constant 0.000000e+00 : f32
    %13 = vector.broadcast %cst_11 : f32 to vector<256x256xf32>
    %14 = arith.maximumf %12, %13 : vector<256x256xf32>
    %15 = arith.truncf %14 : vector<256x256xf32> to vector<256x256xbf16>
    %c0_12 = arith.constant 0 : index
    %c0_13 = arith.constant 0 : index
    %c0_14 = arith.constant 0 : index
    %16 = vector.load %arg6[%c0_12, %c0_13, %c0_14] : memref<1x256x256xbf16, #tpu.memory_space<vmem>>, vector<1x256x256xbf16>
    %17 = vector.shape_cast %16 : vector<1x256x256xbf16> to vector<256x256xbf16>
    %18 = vector.shape_cast %15 : vector<256x256xbf16> to vector<1x256x256xbf16>
    tpu.vector_store %arg6[%c0_12, %c0_13, %c0_14], %18 {strides = array<i32>} : memref<1x256x256xbf16, #tpu.memory_space<vmem>>, vector<1x256x256xbf16>,
    return
  }
  func.func @transform_0(%arg0: i32, %arg1: i32) -> (i32, i32, i32) {
    %c0_i32 = arith.constant 0 : i32
    %c0_i32_0 = arith.constant 0 : i32
    return %arg0, %arg1, %c0_i32 : i32, i32, i32
  }
  func.func @transform_1(%arg0: i32, %arg1: i32) -> (i32, i32) {
    %c0_i32 = arith.constant 0 : i32
    %c0_i32_0 = arith.constant 0 : i32
    %c0_i32_1 = arith.constant 0 : i32
    return %c0_i32, %c0_i32_0 : i32, i32
  }
  func.func @transform_2(%arg0: i32, %arg1: i32) -> (i32, i32) {
    %c0_i32 = arith.constant 0 : i32
    %c0_i32_0 = arith.constant 0 : i32
    %c0_i32_1 = arith.constant 0 : i32
    return %c0_i32, %c0_i32_0 : i32, i32
  }
  func.func @transform_3(%arg0: i32, %arg1: i32) -> (i32, i32, i32) {
    %c0_i32 = arith.constant 0 : i32
    %c0_i32_0 = arith.constant 0 : i32
    %c0_i32_1 = arith.constant 0 : i32
    return %arg0, %c0_i32, %c0_i32_0 : i32, i32, i32
  }
  func.func @transform_4(%arg0: i32, %arg1: i32) -> (i32, i32, i32) {
    %c0_i32 = arith.constant 0 : i32
    %c0_i32_0 = arith.constant 0 : i32
    return %arg0, %arg1, %c0_i32 : i32, i32, i32
  }
}

</mosaic_0001>

<bundles_post_ra>
// kernel: tpu_custom_call.1
= control target key start
LH: loop header
LB: loop body
LE: loop exit
PB: predicated region body
PF: predicated region fallthrough
CT: control target
= control target key end

     0   :  { %9 = vsyncpa [#allocation3], 0  ;;  %s6014_s0 = inlined_call_operand.hbm [shape: bf16[2,256,128], index: 0, kind: input, shape index: {}]   ;;  %s6015_s1 = inlined_call_operand.hbm [shape: bf16[128,1024], index: 1, kind: input, shape index: {}]   ;;  %s6016_s2 = inlined_call_operand.hbm [shape: bf16[1024,256], index: 2, kind: input, shape index: {}]   ;;  %s6017_s3 = inlined_call_operand.vmem [shape: f32[2,1,256], index: 3, kind: input, shape index: {}]   ;;  %s6018_s4 = inlined_call_operand.hbm [shape: bf16[2,256,256], index: 4, kind: output, shape index: {}]  }
   0x1   :  { %11 = vsyncpa [#allocation3 + $0x1], 0 }
   0x2   :  { %12 = vsyncpa [#allocation6], 0 }
   0x3   :  { %13 = vsyncpa [#allocation4], 0 }
   0x4   :  { %15 = vsyncpa [#allocation4 + $0x1], 0  ;;  %s4992_s15 = smov 0   ;;  %s4994_s16 = smov 0  }
   0x5   :  { %s4996_s17 = smov 0   ;;  %s4998_s18 = smov 0  }
   0x6   :  { %s5000_s19 = smov 0   ;;  %s5002_s20 = smov 0  }
   0x7 LB: > { %s3926_s21 = sadd.s32 4294967295, %s4952_s20   ;;  %s3927_s22 = sadd.s32 4294967294, %s4952_s20   ;;  %s4952_s20 = sphi %s5002_s20, %s21_s20   ;;  %s4948_s19 = sphi %s5000_s19, %s6095_s19   ;;  %s4944_s18 = sphi %s4998_s18, %s6094_s18   ;;  %s4940_s17 = sphi %s4996_s17, %s6093_s17   ;;  %s4936_s16 = sphi %s4994_s16, %s6092_s16   ;;  %s4932_s15 = sphi %s4992_s15, %s6091_s15  }
   0x8   : > { %p55_p0 = scmp.ne.s32.totalorder %s4936_s16, %s4932_s15  ;;  %p5026_p1 = scmp.eq.s32.totalorder %s3926_s21, 0 }
   0x9   : > { %p5030_p2 = scmp.eq.s32.totalorder %s3926_s21, 1  ;;  %p155_p3 = scmp.eq.s32.totalorder %s3927_s22, 1 }
   0xa   : > { %s6025_s23 = scalar_select %p5026_p1, 1, 0 }
   0xb   : > { %p5036_p4 = por %p5026_p1, %p55_p0  ;;  %p3928_p5 = scmp.ge.s32.totalorder %s4952_s20, 1 }
   0xc   : > { %p5041_p6 = por %p155_p3, %p55_p0  ;;  %p162_p7 = scmp.lt.s32.totalorder %s4952_s20, 3 }
   0xd   : > { %s6027_s25 = scalar_select %p5036_p4, 1, 0 }
   0xe   : > { %s6028_s26 = scalar_select %p5041_p6, 1, 0 }
   0xf   : > { %p5046_p8 = pnand %p3928_p5, %p162_p7  ;;  %s4954_s28 = smov [#allocation5]  }
  0x10   : > { %s174_s29 = sshll.u32 %s4954_s28, 4  ;;  %s4955_s5 = smov [#allocation7]   ;;  %s5050_s29 = int_to_ptr.vmem [resolvable:$true] %s174_s29 }
  0x11   : > { %p4488_p9 = pneg %p5046_p8  ;;  %s187_s6 = sshll.u32 %s4955_s5, 4  ;;  %s5061_s6 = int_to_ptr.vmem [resolvable:$true] %s187_s6 }
  0x12   : > { %s4780_s9 = scalar_lea.hbm %s6015_s1, 8192 }
  0x13   : > { %p5057_p11 = pnand %p4488_p9, %p5026_p1  ;;  %p4781_p12 = scmp.ne.s32.totalorder %s6015_s1, %s4780_s9 }
  0x14   : > { %p4787_p5 = scmp.lt.u32.totalorder %s4780_s9, %s6015_s1 }
  0x15   : > { %p4782_p13 = pneg %p5057_p11 }
  0x17   : > { %p4783_p0 = pnand %p4782_p13, %p4781_p12 }
  0x19   : > { %p4784_p3 = pneg %p4783_p0 }
  0x1b   : > { %p4789_p7 = pnand %p4787_p5, %p4784_p3 }
  0x1d   : > { %4792 = shalt.err (!%p4789_p7)
}
  0x1e   : > { %s4793_s14 = scalar_lea.vmem %s5050_s29, 8192  ;;  %p4801_p1 = scmp.lt.s32.totalorder %s5050_s29, %s5050_s29 }
  0x1f   : > { %p4794_p9 = scmp.ne.s32.totalorder %s5050_s29, %s4793_s14  ;;  %p4802_p12 = scmp.lt.s32.totalorder %s4793_s14, %s4793_s14 }
  0x21   : > { %p4796_p10 = pnand %p4794_p9, %p4782_p13  ;;  %p4803_p0 = por %p4802_p12, %p4801_p1 }
  0x23   : > { %p4797_p6 = pneg %p4796_p10 }
  0x25   : > { %p4804_p4 = pnand %p4803_p0, %p4797_p6 }
  0x27   : > { %4807 = shalt.err (!%p4804_p4)
}
  0x28   : > { %s4956_s21 = smov 512   ;;  %s4957_s22 = smov 32  }
  0x29   : > { %4491 = dma.hbm_to_vmem [thread:$0]  (!%p5057_p11), %s6015_s1, 8192, %s5050_s29, [#allocation6], %s4956_s21, %s4956_s21, %s4957_s22  }
  0x2a   : > { %s4808_s9 = scalar_lea.hbm %s6016_s2, 16384 }
  0x2b   : > { %p4809_p1 = scmp.ne.s32.totalorder %s6016_s2, %s4808_s9  ;;  %p4815_p10 = scmp.lt.u32.totalorder %s4808_s9, %s6016_s2 }
  0x2d   : > { %p4811_p4 = pnand %p4809_p1, %p4782_p13 }
  0x2f   : > { %p4812_p6 = pneg %p4811_p4 }
  0x31   : > { %p4817_p3 = pnand %p4815_p10, %p4812_p6 }
  0x33   : > { %4820 = shalt.err (!%p4817_p3)
}
  0x34   : > { %s4821_s29 = scalar_lea.vmem %s5061_s6, 16384  ;;  %p4829_p12 = scmp.lt.s32.totalorder %s5061_s6, %s5061_s6 }
  0x35   : > { %p4822_p5 = scmp.ne.s32.totalorder %s5061_s6, %s4821_s29  ;;  %p4830_p0 = scmp.lt.s32.totalorder %s4821_s29, %s4821_s29 }
  0x37   : > { %p4824_p7 = pnand %p4822_p5, %p4782_p13  ;;  %p4831_p1 = por %p4830_p0, %p4829_p12 }
  0x39   : > { %p4825_p9 = pneg %p4824_p7 }
  0x3b   : > { %p4832_p4 = pnand %p4831_p1, %p4825_p9 }
  0x3d   : > { %4835 = shalt.err (!%p4832_p4)
}
  0x3e   : > { %s4958_s14 = smov 128   ;;  %s4959_s21 = smov 8  }
  0x3f   : > { %4494 = dma.hbm_to_vmem [thread:$0]  (!%p5057_p11), %s6016_s2, 16384, %s5061_s6, [#allocation6], %s4958_s14, %s4958_s14, %s4959_s21  }
  0x40   : > { %s33_s5 = sadd.s32 1, %s4948_s19  ;;  %s42_s7 = sadd.s32 1, %s4940_s17 }
  0x41   : > { %p35_p13 = scmp.ge.s32.totalorder %s33_s5, 2  ;;  %p49_p6 = scmp.ne.s32.totalorder %s4940_s17, %s4936_s16 }
  0x42   : > { %p50_p10 = scmp.eq.s32.totalorder %s4952_s20, 0  ;;  %p4505_p3 = scmp.lt.s32.totalorder %s4952_s20, 2 }
  0x43   : > { %s6097_s5 = smov (%p35_p13, %s33_s5), 0  ;;  %p5125_p7 = por %p5030_p2, %p49_p6 }
  0x44   : > { %p51_p5 = por %p50_p10, %p49_p6  ;;  %s37_s30 = ssub.s32 %s4948_s19, %s6097_s5 }
  0x45   : > { %s6031_s8 = scalar_select %p5125_p7, 1, 0 }
  0x46   : > { %s201_s9 = sand.u32 1, %s4940_s17   ;;  %p40_p9 = scmp.eq.s32.totalorder %s37_s30, 0 }
  0x47   : > { %s3932_s6 = sshll.u32 %s201_s9, 7  ;;  %s4186_s10 = sshll.u32 %s4948_s19, 11 }
  0x48   : > { %s5134_s11 = scalar_select %p40_p9, %s4940_s17, %s42_s7  }
  0x49   : > { %s5139_s29 = scalar_lea.hbm %s6014_s0, %s4186_s10  ;;  %s205_s24 = scalar_lea.vmem [#allocation2], %s3932_s6 }
  0x4a   : > { %s214_s14 = sshll.u32 %s205_s24, 4  ;;  %p5143_p2 = pnand %p4505_p3, %p51_p5  ;;  %s5147_s14 = int_to_ptr.vmem [resolvable:$true] %s214_s14 }
  0x4b   : > { %s5149_s22 = scalar_lea.sflag [#allocation3], %s201_s9  ;;  %s4836_s28 = scalar_lea.hbm %s5139_s29, 2048 }
  0x4c   : > { %p4837_p11 = scmp.ne.s32.totalorder %s5139_s29, %s4836_s28  ;;  %p4838_p12 = pneg %p5143_p2 }
  0x4d   : > { %s4841_s6 = scalar_lea.hbm %s6014_s0, 4096  ;;  %p4842_p4 = scmp.lt.u32.totalorder %s5139_s29, %s6014_s0 }
  0x4e   : > { %p4839_p0 = pnand %p4838_p12, %p4837_p11  ;;  %p4843_p13 = scmp.lt.u32.totalorder %s4841_s6, %s4836_s28 }
  0x4f   : > { %p4845_p10 = scmp.lt.u32.totalorder %s4836_s28, %s5139_s29 }
  0x50   : > { %p4840_p1 = pneg %p4839_p0  ;;  %p4844_p6 = por %p4843_p13, %p4842_p4 }
  0x52   : > { %p4846_p3 = por %p4845_p10, %p4844_p6 }
  0x54   : > { %p4847_p5 = pnand %p4846_p3, %p4840_p1 }
  0x56   : > { %4850 = shalt.err (!%p4847_p5)
}
  0x57   : > { %s4851_s9 = scalar_lea.vmem %s5147_s14, 2048  ;;  %s4960_s13 = smov [#allocation2]  }
  0x58   : > { %p4852_p9 = scmp.ne.s32.totalorder %s5147_s14, %s4851_s9  ;;  %s4856_s24 = sshll.u32 %s4960_s13, 4  ;;  %s4857_s24 = int_to_ptr.vmem [resolvable:$false] %s4856_s24 }
  0x59   : > { %s4858_s7 = scalar_lea.vmem %s4857_s24, 4096  ;;  %p4859_p7 = scmp.lt.s32.totalorder %s5147_s14, %s4857_s24 }
  0x5a   : > { %p4854_p11 = pnand %p4852_p9, %p4838_p12  ;;  %p4860_p4 = scmp.lt.s32.totalorder %s4858_s7, %s4851_s9 }
  0x5c   : > { %p4855_p0 = pneg %p4854_p11  ;;  %p4861_p13 = por %p4860_p4, %p4859_p7 }
  0x5e   : > { %p4862_p6 = pnand %p4861_p13, %p4855_p0 }
  0x60   : > { %4865 = shalt.err (!%p4862_p6)
}
  0x61   : > { %s4961_s28 = smov 64   ;;  %s4962_s30 = smov 4  }
  0x62   : > { %4498 = dma.hbm_to_vmem [thread:$0]  (!%p5143_p2), %s5139_s29, 2048, %s5147_s14, %s5149_s22, %s4961_s28, %s4961_s28, %s4962_s30  }
  0x63   : > { %233 = sbr.rel (%p5046_p8) target bundleno = 1109 (0x455), region = 36 }
  0x6a   : > { %s5180_s6 = sand.u32 1, %s4936_s16   ;;  %p6033_p7 = scmp.ne.s32.totalorder %s6027_s25, 0 }
  0x6b   : > { %s3936_s10 = sshll.u32 %s5180_s6, 7  ;;  %s236_s12 = scalar_lea.sflag [#allocation3], %s5180_s6 }
  0x6c   : > { %s5184_s9 = scalar_lea.vmem [#allocation2], %s3936_s10 }
  0x6d   : > { %4919 = dma.done.wait (%p6033_p7), %s236_s12, 2048  }
  0x6e   : > { %4921 = vsyncadd (%p6033_p7), %s236_s12, 4294965248  ;;  %p6034_p2 = scmp.ne.s32.totalorder %s6025_s23, 0 }
  0x70   : > { %4923 = dma.done.wait (%p6034_p2), [#allocation6], 24576  }
  0x71   : > { %4925 = vsyncadd (%p6034_p2), [#allocation6], 4294942720  ;;  %v6023_v0 = vmov 0   ;;  %v315_v1 = vld [vmem:[#allocation5] sm:$0xff]  ;;  %v316_v32 = vld [vmem:[#allocation5 + $0x8] sm:$0xff]  ;;  %p277_p8 = scmp.lt.s32.totalorder %s4944_s18, 1 }
  0x72   : > { %827 = vmatprep.mubr.bf16.mxu1 %v6023_v0  ;;  %1213 = vmatprep.mubr.bf16.mxu0 %v6023_v0  ;;  %v319_v2 = vld [vmem:[#allocation5 + $0x20] sm:$0xff]  ;;  %v320_v33 = vld [vmem:[#allocation5 + $0x28] sm:$0xff]  ;;  %v5207_v55 = vld [vmem:[%s5184_s9 + $0x10] sm:$0xff]   ;;  %s3939_s21 = sshll.u32 %s5180_s6, 8  ;;  %s4219_s13 = sshll.u32 %s4944_s18, 12 }
  0x73   : > { %v323_v3 = vld [vmem:[#allocation5 + $0x40] sm:$0xff]  ;;  %v3958_v4 = vcombine.high %v315_v1, %v319_v2  ;;  %v3957_v5 = vcombine.low %v315_v1, %v319_v2  ;;  %v324_v35 = vld [vmem:[#allocation5 + $0x48] sm:$0xff]  ;;  %v3960_v38 = vcombine.high %v316_v32, %v320_v33  ;;  %v3959_v39 = vcombine.low %v316_v32, %v320_v33  ;;  %v5212_v1 = vld [vmem:[%s5184_s9 + $0x18] sm:$0xff]   ;;  %s278_s23 = scalar_select %p277_p8, %s4944_s18, 1 }
  0x74   : > { %v327_v6 = vld [vmem:[#allocation5 + $0x60] sm:$0xff]  ;;  %v328_v36 = vld [vmem:[#allocation5 + $0x68] sm:$0xff]  ;;  %v357_v32 = vld [vmem:[#allocation5 + $0x150] sm:$0xff]  ;;  %s5808_s22 = scalar_lea.vmem [#allocation8], %s3939_s21  ;;  %s5961_s30 = scalar_lea.hbm %s6018_s4, %s4219_s13 }
  0x75   : > { %v3966_v7 = vcombine.high %v323_v3, %v327_v6  ;;  %v331_v8 = vld [vmem:[#allocation5 + $0x80] sm:$0xff]  ;;  %795 = vmatprep.subr.bf16.mxu1 %v3958_v4  ;;  %v3965_v10 = vcombine.low %v323_v3, %v327_v6  ;;  %v332_v40 = vld [vmem:[#allocation5 + $0x88] sm:$0xff]  ;;  %v3968_v42 = vcombine.high %v324_v35, %v328_v36  ;;  %v3967_v43 = vcombine.low %v324_v35, %v328_v36  ;;  %v361_v33 = vld [vmem:[#allocation5 + $0x170] sm:$0xff]  ;;  %s3940_s25 = sshll.u32 %s278_s23, 1  ;;  %s3808_s24 = sshll.u32 %s5808_s22, 4  ;;  %s5963_s24 = int_to_ptr.vmem [resolvable:$true] %s3808_s24 }
  0x76   : > { %v335_v9 = vld [vmem:[#allocation5 + $0xa0] sm:$0xff]  ;;  %796 = vmatpush1.bf16.msra.mxu1 %v3957_v5  ;;  %v336_v41 = vld [vmem:[#allocation5 + $0xa8] sm:$0xff]  ;;  %v4001_v35 = vcombine.low %v357_v32, %v361_v33  ;;  %v5247_v36 = vld [vmem:[%s5184_s9 + $0x50] sm:$0xff]   ;;  %s280_s14 = scalar_lea.vmem %s6017_s3, %s3940_s25  ;;  %s3792_s10 = scalar_lea.sflag [#allocation4], %s5180_s6 }
  0x77   : > { %797 = vmatprep.subr.bf16.mxu1 %v3966_v7  ;;  %v3974_v11 = vcombine.high %v331_v8, %v335_v9  ;;  %v339_v12 = vld [vmem:[#allocation5 + $0xc0] sm:$0xff]  ;;  %v3973_v14 = vcombine.low %v331_v8, %v335_v9  ;;  %v340_v44 = vld [vmem:[#allocation5 + $0xc8] sm:$0xff]  ;;  %v3976_v47 = vcombine.high %v332_v40, %v336_v41  ;;  %v3975_v48 = vcombine.low %v332_v40, %v336_v41  ;;  %v5227_v8 = vld [vmem:[%s5184_s9 + $0x30] sm:$0xff]   ;;  %s4866_s12 = scalar_lea.vmem %s5963_s24, 4096  ;;  %p6088_p1 = scmp.ne.s32.totalorder %s6031_s8, 0 }
  0x78   : > { %v343_v13 = vld [vmem:[#allocation5 + $0xe0] sm:$0xff]  ;;  %v344_v45 = vld [vmem:[#allocation5 + $0xe8] sm:$0xff]  ;;  %v5232_v9 = vld [vmem:[%s5184_s9 + $0x38] sm:$0xff]   ;;  %p4867_p12 = scmp.ne.s32.totalorder %s5963_s24, %s4866_s12  ;;  %s4964_s18 = smov [#allocation8]  }
  0x79   : > { %v3982_v15 = vcombine.high %v339_v12, %v343_v13  ;;  %v347_v16 = vld [vmem:[#allocation5 + $0x100] sm:$0xff]  ;;  %v3981_v18 = vcombine.low %v339_v12, %v343_v13  ;;  %v5202_v46 = vld [vmem:[%s5184_s9 + $0x8] sm:$0xff]   ;;  %v3984_v51 = vcombine.high %v340_v44, %v344_v45  ;;  %v3983_v52 = vcombine.low %v340_v44, %v344_v45  ;;  %v5252_v45 = vld [vmem:[%s5184_s9 + $0x58] sm:$0xff]  }
  0x7a   : > { %798 = vmatpush1.bf16.msra.mxu1 %v3965_v10  ;;  %v351_v17 = vld [vmem:[#allocation5 + $0x120] sm:$0xff]  ;;  %v348_v49 = vld [vmem:[#allocation5 + $0x108] sm:$0xff]  ;;  %v317_v10 = vld [vmem:[#allocation5 + $0x10] sm:$0xff]  ;;  %p4868_p10 = pnand %p4867_p12, %p6088_p1 }
  0x7b   : > { %799 = vmatprep.subr.bf16.mxu1 %v3974_v11  ;;  %v3990_v19 = vcombine.high %v347_v16, %v351_v17  ;;  %v355_v20 = vld [vmem:[#allocation5 + $0x140] sm:$0xff]  ;;  %v3989_v22 = vcombine.low %v347_v16, %v351_v17  ;;  %v352_v50 = vld [vmem:[#allocation5 + $0x128] sm:$0xff]  ;;  %v321_v11 = vld [vmem:[#allocation5 + $0x30] sm:$0xff] }
  0x7c   : > { %v359_v21 = vld [vmem:[#allocation5 + $0x160] sm:$0xff]  ;;  %v356_v53 = vld [vmem:[#allocation5 + $0x148] sm:$0xff]  ;;  %v3992_v56 = vcombine.high %v348_v49, %v352_v50  ;;  %v3991_v57 = vcombine.low %v348_v49, %v352_v50  ;;  %v3962_v12 = vcombine.high %v317_v10, %v321_v11  ;;  %v3961_v13 = vcombine.low %v317_v10, %v321_v11  ;;  %p4869_p3 = pneg %p4868_p10 }
  0x7d   : > { %v3998_v23 = vcombine.high %v355_v20, %v359_v21  ;;  %v363_v24 = vld [vmem:[#allocation5 + $0x180] sm:$0xff]  ;;  %v3997_v26 = vcombine.low %v355_v20, %v359_v21  ;;  %v360_v54 = vld [vmem:[#allocation5 + $0x168] sm:$0xff]  ;;  %v337_v20 = vld [vmem:[#allocation5 + $0xb0] sm:$0xff] }
  0x7e   : > { %800 = vmatpush1.bf16.msra.mxu1 %v3973_v14  ;;  %v367_v25 = vld [vmem:[#allocation5 + $0x1a0] sm:$0xff]  ;;  %v364_v58 = vld [vmem:[#allocation5 + $0x188] sm:$0xff]  ;;  %v4000_v60 = vcombine.high %v356_v53, %v360_v54  ;;  %v3999_v61 = vcombine.low %v356_v53, %v360_v54  ;;  %v325_v14 = vld [vmem:[#allocation5 + $0x50] sm:$0xff]  ;;  %1181 = vmatprep.subr.bf16.mxu0 %v3962_v12 }
  0x7f   : > { %801 = vmatprep.subr.bf16.mxu1 %v3982_v15  ;;  %v4006_v27 = vcombine.high %v363_v24, %v367_v25  ;;  %v371_v28 = vld [vmem:[#allocation5 + $0x1c0] sm:$0xff]  ;;  %v4005_v30 = vcombine.low %v363_v24, %v367_v25  ;;  %v368_v59 = vld [vmem:[#allocation5 + $0x1a8] sm:$0xff]  ;;  %v329_v15 = vld [vmem:[#allocation5 + $0x70] sm:$0xff]  ;;  %1182 = vmatpush1.bf16.msra.mxu0 %v3961_v13 }
  0x80   : > { %v375_v29 = vld [vmem:[#allocation5 + $0x1e0] sm:$0xff]  ;;  %v372_v62 = vld [vmem:[#allocation5 + $0x1c8] sm:$0xff]  ;;  %v4008_v2 = vcombine.high %v364_v58, %v368_v59  ;;  %v4007_v3 = vcombine.low %v364_v58, %v368_v59  ;;  %v3970_v16 = vcombine.high %v325_v14, %v329_v15  ;;  %v3969_v17 = vcombine.low %v325_v14, %v329_v15  ;;  %v345_v24 = vld [vmem:[#allocation5 + $0xf0] sm:$0xff] }
  0x81   : > { %v4014_v31 = vcombine.high %v371_v28, %v375_v29  ;;  %v4013_v34 = vcombine.low %v371_v28, %v375_v29  ;;  %v5197_v37 = vld [vmem:[%s5184_s9] sm:$0xff]   ;;  %v376_v63 = vld [vmem:[#allocation5 + $0x1e8] sm:$0xff]  ;;  %v349_v28 = vld [vmem:[#allocation5 + $0x110] sm:$0xff] }
  0x82   : > { %802 = vmatpush1.bf16.msra.mxu1 %v3981_v18  ;;  %v4016_v4 = vcombine.high %v372_v62, %v376_v63  ;;  %v4015_v5 = vcombine.low %v372_v62, %v376_v63  ;;  %v5217_v6 = vld [vmem:[%s5184_s9 + $0x20] sm:$0xff]   ;;  %v5222_v7 = vld [vmem:[%s5184_s9 + $0x28] sm:$0xff]   ;;  %1183 = vmatprep.subr.bf16.mxu0 %v3970_v16  ;;  %v353_v29 = vld [vmem:[#allocation5 + $0x130] sm:$0xff] }
  0x83   : > { %803 = vmatprep.subr.bf16.mxu1 %v3990_v19  ;;  %v5237_v18 = vld [vmem:[%s5184_s9 + $0x40] sm:$0xff]   ;;  %1184 = vmatpush1.bf16.msra.mxu0 %v3969_v17  ;;  %v333_v19 = vld [vmem:[#allocation5 + $0x90] sm:$0xff]  ;;  %v5266_v54 = vld [vmem:[%s5184_s9 + $0x68] sm:$0xff]  }
  0x84   : > { %v3978_v21 = vcombine.high %v333_v19, %v337_v20  ;;  %v4584_v49 = vld [vmem:[#allocation7 + $0x100] ss:$8 sps:$4 sm:$0xff]   ;;  %v4586_v50 = vld [vmem:[#allocation7 + $0x104] ss:$8 sps:$4 sm:$0xff]   ;;  %v5273_v58 = vld [vmem:[%s5184_s9 + $0x70] sm:$0xff]  }
  0x85   : > { %v4590_v59 = vld [vmem:[#allocation7 + $0x120] ss:$8 sps:$4 sm:$0xff]   ;;  %v4593_v62 = vld [vmem:[#allocation7 + $0x130] ss:$8 sps:$4 sm:$0xff]   ;;  %v4595_v63 = vld [vmem:[#allocation7 + $0x134] ss:$8 sps:$4 sm:$0xff]  }
  0x86   : > { %804 = vmatpush1.bf16.msra.mxu1 %v3989_v22  ;;  %v3977_v22 = vcombine.low %v333_v19, %v337_v20  ;;  %1185 = vmatprep.subr.bf16.mxu0 %v3978_v21  ;;  %v4598_v10 = vld [vmem:[#allocation7 + $0x144] ss:$8 sps:$4 sm:$0xff]   ;;  %v334_v12 = vld [vmem:[#allocation5 + $0x98] sm:$0xff] }
  0x87   : > { %805 = vmatprep.subr.bf16.mxu1 %v3998_v23  ;;  %v341_v23 = vld [vmem:[#allocation5 + $0xd0] sm:$0xff]  ;;  %v338_v13 = vld [vmem:[#allocation5 + $0xb8] sm:$0xff] }
  0x88   : > { %v3986_v25 = vcombine.high %v341_v23, %v345_v24  ;;  %1186 = vmatpush1.bf16.msra.mxu0 %v3977_v22  ;;  %v3980_v15 = vcombine.high %v334_v12, %v338_v13  ;;  %v342_v16 = vld [vmem:[#allocation5 + $0xd8] sm:$0xff]  ;;  %v3979_v19 = vcombine.low %v334_v12, %v338_v13 }
  0x89   : > { %v346_v17 = vld [vmem:[#allocation5 + $0xf8] sm:$0xff] }
  0x8a   : > { %806 = vmatpush1.bf16.msra.mxu1 %v3997_v26  ;;  %v3985_v26 = vcombine.low %v341_v23, %v345_v24  ;;  %1187 = vmatprep.subr.bf16.mxu0 %v3986_v25  ;;  %v4599_v20 = vld [vmem:[#allocation7 + $0x150] ss:$8 sps:$4 sm:$0xff]   ;;  %v4601_v21 = vld [vmem:[#allocation7 + $0x154] ss:$8 sps:$4 sm:$0xff]   ;;  %v3988_v22 = vcombine.high %v342_v16, %v346_v17  ;;  %v3987_v25 = vcombine.low %v342_v16, %v346_v17 }
  0x8b   : > { %807 = vmatprep.subr.bf16.mxu1 %v4006_v27  ;;  %v5242_v27 = vld [vmem:[%s5184_s9 + $0x48] sm:$0xff]   ;;  %v350_v23 = vld [vmem:[#allocation5 + $0x118] sm:$0xff] }
  0x8c   : > { %1188 = vmatpush1.bf16.msra.mxu0 %v3985_v26  ;;  %v354_v24 = vld [vmem:[#allocation5 + $0x138] sm:$0xff] }
  0x8d   : > { %v3996_v26 = vcombine.high %v350_v23, %v354_v24 }
  0x8e   : > { %808 = vmatpush1.bf16.msra.mxu1 %v4005_v30  ;;  %v3994_v30 = vcombine.high %v349_v28, %v353_v29 }
  0x8f   : > { %809 = vmatprep.subr.bf16.mxu1 %v4014_v31  ;;  %v3993_v31 = vcombine.low %v349_v28, %v353_v29  ;;  %v358_v28 = vld [vmem:[#allocation5 + $0x158] sm:$0xff] }
  0x90   : > { %1189 = vmatprep.subr.bf16.mxu0 %v3994_v30  ;;  %v362_v29 = vld [vmem:[#allocation5 + $0x178] sm:$0xff]  ;;  %v3995_v30 = vcombine.low %v350_v23, %v354_v24 }
  0x91   : > { %1190 = vmatpush1.bf16.msra.mxu0 %v3993_v31  ;;  %v4602_v31 = vld [vmem:[#allocation7 + $0x160] ss:$8 sps:$4 sm:$0xff]  }
  0x92   : > { %810 = vmatpush1.bf16.msra.mxu1 %v4013_v34  ;;  %v4002_v34 = vcombine.high %v357_v32, %v361_v33  ;;  %v4604_v32 = vld [vmem:[#allocation7 + $0x164] ss:$8 sps:$4 sm:$0xff]   ;;  %v4004_v33 = vcombine.high %v358_v28, %v362_v29 }
  0x93   : > { %988 = vmatprep.subr.bf16.mxu1 %v3960_v38  ;;  %v365_v38 = vld [vmem:[#allocation5 + $0x190] sm:$0xff] }
  0x94   : > { %1191 = vmatprep.subr.bf16.mxu0 %v4002_v34  ;;  %v366_v34 = vld [vmem:[#allocation5 + $0x198] sm:$0xff] }
  0x95   : > { %828 = vmatmul.mubr.bf16.vlgmr.msra.gmra.mrb[0].mxu1 %v5197_v37  ;;  %1192 = vmatpush1.bf16.msra.mxu0 %v4001_v35  ;;  %v370_v35 = vld [vmem:[#allocation5 + $0x1b8] sm:$0xff] }
  0x96   : > { %989 = vmatpush1.bf16.msra.mxu1 %v3959_v39  ;;  %837 = vmatprep.mubr.bf16.mxu1 %v6023_v0  ;;  %v369_v39 = vld [vmem:[#allocation5 + $0x1b0] sm:$0xff] }
  0x97   : > { %990 = vmatprep.subr.bf16.mxu1 %v3968_v42  ;;  %v4010_v40 = vcombine.high %v365_v38, %v369_v39  ;;  %v4009_v41 = vcombine.low %v365_v38, %v369_v39  ;;  %v373_v42 = vld [vmem:[#allocation5 + $0x1d0] sm:$0xff]  ;;  %v4003_v38 = vcombine.low %v358_v28, %v362_v29  ;;  %v4012_v39 = vcombine.high %v366_v34, %v370_v35  ;;  %v4658_v28 = vld [vmem:[#allocation7 + $0x204] ss:$8 sps:$4 sm:$0xff]  }
  0x99   : > { %1193 = vmatprep.subr.bf16.mxu0 %v4010_v40  ;;  %v374_v40 = vld [vmem:[#allocation5 + $0x1d8] sm:$0xff] }
  0x9a   : > { %991 = vmatpush1.bf16.msra.mxu1 %v3967_v43  ;;  %1194 = vmatpush1.bf16.msra.mxu0 %v4009_v41  ;;  %v377_v43 = vld [vmem:[#allocation5 + $0x1f0] sm:$0xff]  ;;  %v378_v41 = vld [vmem:[#allocation5 + $0x1f8] sm:$0xff] }
  0x9b   : > { %992 = vmatprep.subr.bf16.mxu1 %v3976_v47  ;;  %v4018_v44 = vcombine.high %v373_v42, %v377_v43  ;;  %v4017_v47 = vcombine.low %v373_v42, %v377_v43  ;;  %v4011_v42 = vcombine.low %v366_v34, %v370_v35  ;;  %v4605_v43 = vld [vmem:[#allocation7 + $0x170] ss:$8 sps:$4 sm:$0xff]  }
  0x9d   : > { %838 = vmatmul.mubr.bf16.gmra.mrb[4].mxu1 %v5202_v46  ;;  %1195 = vmatprep.subr.bf16.mxu0 %v4018_v44  ;;  %v4607_v44 = vld [vmem:[#allocation7 + $0x174] ss:$8 sps:$4 sm:$0xff]  }
  0x9e   : > { %847 = vmatprep.mubr.bf16.mxu1 %v6023_v0  ;;  %993 = vmatpush1.bf16.msra.mxu1 %v3975_v48  ;;  %v5259_v48 = vld [vmem:[%s5184_s9 + $0x60] sm:$0xff]  }
  0x9f   : > { %994 = vmatprep.subr.bf16.mxu1 %v3984_v51  ;;  %1196 = vmatpush1.bf16.msra.mxu0 %v4017_v47  ;;  %v318_v51 = vld [vmem:[#allocation5 + $0x18] sm:$0xff]  ;;  %v4020_v47 = vcombine.high %v374_v40, %v378_v41 }
  0xa0   : > { %2924 = vmatprep.subr.bf16.mxu0 %v4586_v50  ;;  %v4608_v50 = vld [vmem:[#allocation7 + $0x180] ss:$8 sps:$4 sm:$0xff]  }
  0xa2   : > { %995 = vmatpush1.bf16.msra.mxu1 %v3983_v52  ;;  %1214 = vmatmul.mubr.bf16.vlgmr.msra.gmra.mrb[0].mxu0 %v5197_v37  ;;  %v322_v52 = vld [vmem:[#allocation5 + $0x38] sm:$0xff] }
  0xa3   : > { %996 = vmatprep.subr.bf16.mxu1 %v3992_v56  ;;  %1223 = vmatprep.mubr.bf16.mxu0 %v6023_v0  ;;  %v3964_v53 = vcombine.high %v318_v51, %v322_v52  ;;  %v4587_v56 = vld [vmem:[#allocation7 + $0x110] ss:$8 sps:$4 sm:$0xff]  }
  0xa4   : > { %2925 = vmatpush1.bf16.msra.mxu0 %v4584_v49  ;;  %v4019_v49 = vcombine.low %v374_v40, %v378_v41 }
  0xa5   : > { %848 = vmatmul.mubr.bf16.gmra.mrb[8].mxu1 %v5207_v55 }
  0xa6   : > { %857 = vmatprep.mubr.bf16.mxu1 %v6023_v0  ;;  %997 = vmatpush1.bf16.msra.mxu1 %v3991_v57  ;;  %v4589_v57 = vld [vmem:[#allocation7 + $0x114] ss:$8 sps:$4 sm:$0xff]  }
  0xa7   : > { %998 = vmatprep.subr.bf16.mxu1 %v4000_v60  ;;  %2926 = vmatprep.subr.bf16.mxu0 %v4589_v57  ;;  %v4592_v60 = vld [vmem:[#allocation7 + $0x124] ss:$8 sps:$4 sm:$0xff]  }
  0xa8   : > { %2927 = vmatpush1.bf16.msra.mxu0 %v4587_v56  ;;  %v4614_v56 = vld [vmem:[#allocation7 + $0x1a0] ss:$8 sps:$4 sm:$0xff]   ;;  %v4616_v57 = vld [vmem:[#allocation7 + $0x1a4] ss:$8 sps:$4 sm:$0xff]  }
  0xa9   : > { %2928 = vmatprep.subr.bf16.mxu0 %v4592_v60  ;;  %v4619_v60 = vld [vmem:[#allocation7 + $0x1b4] ss:$8 sps:$4 sm:$0xff]  }
  0xaa   : > { %999 = vmatpush1.bf16.msra.mxu1 %v3999_v61  ;;  %1224 = vmatmul.mubr.bf16.gmra.mrb[4].mxu0 %v5202_v46  ;;  %v5280_v61 = vld [vmem:[%s5184_s9 + $0x78] sm:$0xff]  }
  0xab   : > { %1000 = vmatprep.subr.bf16.mxu1 %v4008_v2  ;;  %1233 = vmatprep.mubr.bf16.mxu0 %v6023_v0  ;;  %v326_v2 = vld [vmem:[#allocation5 + $0x58] sm:$0xff] }
  0xac   : > { %2929 = vmatpush1.bf16.msra.mxu0 %v4590_v59  ;;  %v4617_v59 = vld [vmem:[#allocation7 + $0x1b0] ss:$8 sps:$4 sm:$0xff]  }
  0xad   : > { %858 = vmatmul.mubr.bf16.gmra.mrb[12].mxu1 %v5212_v1  ;;  %2930 = vmatprep.subr.bf16.mxu0 %v4595_v63  ;;  %v4622_v63 = vld [vmem:[#allocation7 + $0x1c4] ss:$8 sps:$4 sm:$0xff]  }
  0xae   : > { %867 = vmatprep.mubr.bf16.mxu1 %v6023_v0  ;;  %1001 = vmatpush1.bf16.msra.mxu1 %v4007_v3  ;;  %v330_v3 = vld [vmem:[#allocation5 + $0x78] sm:$0xff] }
  0xaf   : > { %1002 = vmatprep.subr.bf16.mxu1 %v4016_v4  ;;  %v3963_v4 = vcombine.low %v318_v51, %v322_v52  ;;  %v3972_v11 = vcombine.high %v326_v2, %v330_v3  ;;  %v3971_v14 = vcombine.low %v326_v2, %v330_v3  ;;  %v4610_v51 = vld [vmem:[#allocation7 + $0x184] ss:$8 sps:$4 sm:$0xff]   ;;  %v4611_v52 = vld [vmem:[#allocation7 + $0x190] ss:$8 sps:$4 sm:$0xff]  }
  0xb0   : > { %2931 = vmatpush1.bf16.msra.mxu0 %v4593_v62  ;;  %v4620_v62 = vld [vmem:[#allocation7 + $0x1c0] ss:$8 sps:$4 sm:$0xff]   ;;  %v4625_v2 = vld [vmem:[#allocation7 + $0x4] ss:$8 sps:$4 sm:$0xff]   ;;  %v4629_v3 = vld [vmem:[#allocation7 + $0x1d0] ss:$8 sps:$4 sm:$0xff]  }
  0xb1   : > { %2932 = vmatprep.subr.bf16.mxu0 %v4598_v10  ;;  %v4640_v10 = vld [vmem:[#allocation7 + $0x1e4] ss:$8 sps:$4 sm:$0xff]  }
  0xb2   : > { %1003 = vmatpush1.bf16.msra.mxu1 %v4015_v5  ;;  %1234 = vmatmul.mubr.bf16.gmra.mrb[8].mxu0 %v5207_v55  ;;  %v4596_v5 = vld [vmem:[#allocation7 + $0x140] ss:$8 sps:$4 sm:$0xff]  }
  0xb3   : > { %1374 = vmatprep.subr.bf16.mxu1 %v3964_v53  ;;  %1243 = vmatprep.mubr.bf16.mxu0 %v6023_v0  ;;  %v4613_v53 = vld [vmem:[#allocation7 + $0x194] ss:$8 sps:$4 sm:$0xff]  }
  0xb4   : > { %2933 = vmatpush1.bf16.msra.mxu0 %v4596_v5  ;;  %v4638_v5 = vld [vmem:[#allocation7 + $0x1e0] ss:$8 sps:$4 sm:$0xff]  }
  0xb5   : > { %868 = vmatmul.mubr.bf16.gmra.mrb[16].mxu1 %v5217_v6  ;;  %2934 = vmatprep.subr.bf16.mxu0 %v4601_v21 }
  0xb6   : > { %877 = vmatprep.mubr.bf16.mxu1 %v6023_v0 }
  0xb8   : > { %2935 = vmatpush1.bf16.msra.mxu0 %v4599_v20 }
  0xb9   : > { %2936 = vmatprep.subr.bf16.mxu0 %v4604_v32 }
  0xba   : > { %1244 = vmatmul.mubr.bf16.gmra.mrb[12].mxu0 %v5212_v1 }
  0xbb   : > { %1253 = vmatprep.mubr.bf16.mxu0 %v6023_v0 }
  0xbc   : > { %2937 = vmatpush1.bf16.msra.mxu0 %v4602_v31 }
  0xbd   : > { %878 = vmatmul.mubr.bf16.gmra.mrb[20].mxu1 %v5222_v7  ;;  %2938 = vmatprep.subr.bf16.mxu0 %v4607_v44 }
  0xbe   : > { %887 = vmatprep.mubr.bf16.mxu1 %v6023_v0 }
  0xc0   : > { %2939 = vmatpush1.bf16.msra.mxu0 %v4605_v43 }
  0xc1   : > { %2940 = vmatprep.subr.bf16.mxu0 %v4610_v51 }
  0xc2   : > { %1254 = vmatmul.mubr.bf16.gmra.mrb[16].mxu0 %v5217_v6 }
  0xc3   : > { %1263 = vmatprep.mubr.bf16.mxu0 %v6023_v0 }
  0xc4   : > { %2941 = vmatpush1.bf16.msra.mxu0 %v4608_v50 }
  0xc5   : > { %888 = vmatmul.mubr.bf16.gmra.mrb[24].mxu1 %v5227_v8  ;;  %2942 = vmatprep.subr.bf16.mxu0 %v4613_v53 }
  0xc6   : > { %897 = vmatprep.mubr.bf16.mxu1 %v6023_v0 }
  0xc8   : > { %2943 = vmatpush1.bf16.msra.mxu0 %v4611_v52 }
  0xc9   : > { %2944 = vmatprep.subr.bf16.mxu0 %v4616_v57 }
  0xca   : > { %1264 = vmatmul.mubr.bf16.gmra.mrb[20].mxu0 %v5222_v7 }
  0xcb   : > { %1273 = vmatprep.mubr.bf16.mxu0 %v6023_v0 }
  0xcc   : > { %2945 = vmatpush1.bf16.msra.mxu0 %v4614_v56 }
  0xcd   : > { %898 = vmatmul.mubr.bf16.gmra.mrb[28].mxu1 %v5232_v9  ;;  %2946 = vmatprep.subr.bf16.mxu0 %v4619_v60 }
  0xce   : > { %907 = vmatprep.mubr.bf16.mxu1 %v6023_v0 }
  0xd0   : > { %2947 = vmatpush1.bf16.msra.mxu0 %v4617_v59 }
  0xd1   : > { %2948 = vmatprep.subr.bf16.mxu0 %v4622_v63 }
  0xd2   : > { %1274 = vmatmul.mubr.bf16.gmra.mrb[24].mxu0 %v5227_v8 }
  0xd3   : > { %1283 = vmatprep.mubr.bf16.mxu0 %v6023_v0 }
  0xd4   : > { %2949 = vmatpush1.bf16.msra.mxu0 %v4620_v62 }
  0xd5   : > { %908 = vmatmul.mubr.bf16.gmra.mrb[32].mxu1 %v5237_v18 }
  0xd6   : > { %917 = vmatprep.mubr.bf16.mxu1 %v6023_v0 }
  0xda   : > { %1284 = vmatmul.mubr.bf16.gmra.mrb[28].mxu0 %v5232_v9 }
  0xdb   : > { %1293 = vmatprep.mubr.bf16.mxu0 %v6023_v0 }
  0xdd   : > { %918 = vmatmul.mubr.bf16.gmra.mrb[36].mxu1 %v5242_v27 }
  0xde   : > { %927 = vmatprep.mubr.bf16.mxu1 %v6023_v0 }
  0xe2   : > { %1294 = vmatmul.mubr.bf16.gmra.mrb[32].mxu0 %v5237_v18 }
  0xe3   : > { %1303 = vmatprep.mubr.bf16.mxu0 %v6023_v0 }
  0xe5   : > { %928 = vmatmul.mubr.bf16.gmra.mrb[40].mxu1 %v5247_v36 }
  0xe6   : > { %937 = vmatprep.mubr.bf16.mxu1 %v6023_v0 }
  0xea   : > { %1304 = vmatmul.mubr.bf16.gmra.mrb[36].mxu0 %v5242_v27 }
  0xeb   : > { %1313 = vmatprep.mubr.bf16.mxu0 %v6023_v0 }
  0xed   : > { %938 = vmatmul.mubr.bf16.gmra.mrb[44].mxu1 %v5252_v45 }
  0xee   : > { %947 = vmatprep.mubr.bf16.mxu1 %v6023_v0 }
  0xf2   : > { %1314 = vmatmul.mubr.bf16.gmra.mrb[40].mxu0 %v5247_v36 }
  0xf3   : > { %1323 = vmatprep.mubr.bf16.mxu0 %v6023_v0 }
  0xf5   : > { %948 = vmatmul.mubr.bf16.gmra.mrb[48].mxu1 %v5259_v48 }
  0xf6   : > { %957 = vmatprep.mubr.bf16.mxu1 %v6023_v0 }
  0xfa   : > { %1324 = vmatmul.mubr.bf16.gmra.mrb[44].mxu0 %v5252_v45 }
  0xfb   : > { %1333 = vmatprep.mubr.bf16.mxu0 %v6023_v0 }
  0xfd   : > { %958 = vmatmul.mubr.bf16.gmra.mrb[52].mxu1 %v5266_v54 }
  0xfe   : > { %967 = vmatprep.mubr.bf16.mxu1 %v6023_v0 }
 0x102   : > { %1334 = vmatmul.mubr.bf16.gmra.mrb[48].mxu0 %v5259_v48 }
 0x103   : > { %1343 = vmatprep.mubr.bf16.mxu0 %v6023_v0 }
 0x105   : > { %968 = vmatmul.mubr.bf16.gmra.mrb[56].mxu1 %v5273_v58 }
 0x106   : > { %977 = vmatprep.mubr.bf16.mxu1 %v6023_v0 }
 0x10a   : > { %1344 = vmatmul.mubr.bf16.gmra.mrb[52].mxu0 %v5266_v54 }
 0x10b   : > { %1353 = vmatprep.mubr.bf16.mxu0 %v6023_v0 }
 0x10d   : > { %978 = vmatmul.mubr.bf16.gmra.mrb[60].mxu1 %v5280_v61 }
 0x10e   : > { %1020 = vmatprep.mubr.bf16.mxu1 %v6023_v0 }
 0x112   : > { %1354 = vmatmul.mubr.bf16.gmra.mrb[56].mxu0 %v5273_v58 }
 0x113   : > { %1363 = vmatprep.mubr.bf16.mxu0 %v6023_v0 }
 0x115   : > { %1021 = vmatmul.mubr.bf16.vlgmr.msra.gmra.mrb[64].mxu1 %v5197_v37 }
 0x116   : > { %1030 = vmatprep.mubr.bf16.mxu1 %v6023_v0  ;;  %1375 = vmatpush1.bf16.msra.mxu1 %v3963_v4  ;;  %v4631_v4 = vld [vmem:[#allocation7 + $0x1d4] ss:$8 sps:$4 sm:$0xff]  }
 0x117   : > { %1376 = vmatprep.subr.bf16.mxu1 %v3972_v11  ;;  %2950 = vmatprep.subr.bf16.mxu0 %v4631_v4 }
 0x118   : > { %2951 = vmatpush1.bf16.msra.mxu0 %v4629_v3 }
 0x119   : > { %2952 = vmatprep.subr.bf16.mxu0 %v4640_v10 }
 0x11a   : > { %1377 = vmatpush1.bf16.msra.mxu1 %v3971_v14  ;;  %1364 = vmatmul.mubr.bf16.gmra.mrb[60].mxu0 %v5280_v61  ;;  %v4647_v14 = vld [vmem:[#allocation7 + $0x1f0] ss:$8 sps:$4 sm:$0xff]  }
 0x11b   : > { %1378 = vmatprep.subr.bf16.mxu1 %v3980_v15  ;;  %v4649_v15 = vld [vmem:[#allocation7 + $0x1f4] ss:$8 sps:$4 sm:$0xff]  }
 0x11c   : > { %2953 = vmatpush1.bf16.msra.mxu0 %v4638_v5 }
 0x11d   : > { %1031 = vmatmul.mubr.bf16.gmra.mrb[68].mxu1 %v5202_v46  ;;  %2954 = vmatprep.subr.bf16.mxu0 %v4649_v15 }
 0x11e   : > { %1040 = vmatprep.mubr.bf16.mxu1 %v6023_v0  ;;  %1379 = vmatpush1.bf16.msra.mxu1 %v3979_v19 }
 0x11f   : > { %1380 = vmatprep.subr.bf16.mxu1 %v3988_v22 }
 0x120   : > { %2955 = vmatpush1.bf16.msra.mxu0 %v4647_v14 }
 0x121   : > { %3117 = vmatprep.subr.bf16.mxu0 %v4658_v28 }
 0x122   : > { %1381 = vmatpush1.bf16.msra.mxu1 %v3987_v25 }
 0x123   : > { %1382 = vmatprep.subr.bf16.mxu1 %v3996_v26 }
 0x125   : > { %1041 = vmatmul.mubr.bf16.gmra.mrb[72].mxu1 %v5207_v55 }
 0x126   : > { %1050 = vmatprep.mubr.bf16.mxu1 %v6023_v0  ;;  %1383 = vmatpush1.bf16.msra.mxu1 %v3995_v30 }
 0x127   : > { %1384 = vmatprep.subr.bf16.mxu1 %v4004_v33 }
 0x12a   : > { %1385 = vmatpush1.bf16.msra.mxu1 %v4003_v38 }
 0x12b   : > { %1386 = vmatprep.subr.bf16.mxu1 %v4012_v39 }
 0x12d   : > { %1051 = vmatmul.mubr.bf16.gmra.mrb[76].mxu1 %v5212_v1 }
 0x12e   : > { %1060 = vmatprep.mubr.bf16.mxu1 %v6023_v0  ;;  %1387 = vmatpush1.bf16.msra.mxu1 %v4011_v42 }
 0x12f   : > { %1388 = vmatprep.subr.bf16.mxu1 %v4020_v47 }
 0x132   : > { %1389 = vmatpush1.bf16.msra.mxu1 %v4019_v49 }
 0x133   : > { %2731 = vmatprep.subr.bf16.mxu1 %v4625_v2 }
 0x135   : > { %1061 = vmatmul.mubr.bf16.gmra.mrb[80].mxu1 %v5217_v6 }
 0x136   : > { %1070 = vmatprep.mubr.bf16.mxu1 %v6023_v0 }
 0x13d   : > { %1071 = vmatmul.mubr.bf16.gmra.mrb[84].mxu1 %v5222_v7 }
 0x13e   : > { %1080 = vmatprep.mubr.bf16.mxu1 %v6023_v0 }
 0x145   : > { %1081 = vmatmul.mubr.bf16.gmra.mrb[88].mxu1 %v5227_v8 }
 0x146   : > { %1090 = vmatprep.mubr.bf16.mxu1 %v6023_v0 }
 0x14d   : > { %1091 = vmatmul.mubr.bf16.gmra.mrb[92].mxu1 %v5232_v9 }
 0x14e   : > { %1100 = vmatprep.mubr.bf16.mxu1 %v6023_v0 }
 0x155   : > { %1101 = vmatmul.mubr.bf16.gmra.mrb[96].mxu1 %v5237_v18 }
 0x156   : > { %1110 = vmatprep.mubr.bf16.mxu1 %v6023_v0 }
 0x15d   : > { %1111 = vmatmul.mubr.bf16.gmra.mrb[100].mxu1 %v5242_v27 }
 0x15e   : > { %1120 = vmatprep.mubr.bf16.mxu1 %v6023_v0 }
 0x165   : > { %1121 = vmatmul.mubr.bf16.gmra.mrb[104].mxu1 %v5247_v36 }
 0x166   : > { %1130 = vmatprep.mubr.bf16.mxu1 %v6023_v0 }
 0x168   : > { %v829_v11 = vpop.f32.mrb[0].mxu1 }
 0x169   : > { %v831_v12 = vpop.f32.mrb[1].mxu1  ;;  %v1567_v16 = vmax.f32 %v829_v11, 0.0 }
 0x16a   : > { %v833_v13 = vpop.f32.mrb[2].mxu1  ;;  %v1568_v20 = vmax.f32 %v831_v12, 0.0 }
 0x16b   : > { %v1575_v17 = vmax.f32 %v833_v13, 0.0  ;;  %v835_v19 = vpop.f32.mrb[3].mxu1 }
 0x16c   : > { %v1576_v21 = vmax.f32 %v835_v19, 0.0 }
 0x16d   : > { %v5329_v22 = vpack.c.bf16 %v1575_v17, %v1567_v16  ;;  %1131 = vmatmul.mubr.bf16.gmra.mrb[108].mxu1 %v5252_v45  ;;  %v4623_v17 = vld [vmem:[#allocation7] ss:$8 sps:$4 sm:$0xff]  }
 0x16e   : > { %v5332_v23 = vpack.c.bf16 %v1576_v21, %v1568_v20  ;;  %1140 = vmatprep.mubr.bf16.mxu1 %v6023_v0 }
 0x170   : > { %v839_v24 = vpop.f32.mrb[4].mxu1 }
 0x171   : > { %v841_v25 = vpop.f32.mrb[5].mxu1  ;;  %v1583_v29 = vmax.f32 %v839_v24, 0.0  ;;  %v4628_v24 = vld [vmem:[#allocation7 + $0x14] ss:$8 sps:$4 sm:$0xff]  }
 0x172   : > { %v843_v26 = vpop.f32.mrb[6].mxu1  ;;  %v1584_v32 = vmax.f32 %v841_v25, 0.0 }
 0x173   : > { %v1591_v30 = vmax.f32 %v843_v26, 0.0  ;;  %v845_v31 = vpop.f32.mrb[7].mxu1 }
 0x174   : > { %v1592_v33 = vmax.f32 %v845_v31, 0.0 }
 0x175   : > { %v5335_v34 = vpack.c.bf16 %v1591_v30, %v1583_v29  ;;  %1141 = vmatmul.mubr.bf16.gmra.mrb[112].mxu1 %v5259_v48  ;;  %v4634_v30 = vld [vmem:[#allocation7 + $0x24] ss:$8 sps:$4 sm:$0xff]  }
 0x176   : > { %v5338_v35 = vpack.c.bf16 %v1592_v33, %v1584_v32  ;;  %1150 = vmatprep.mubr.bf16.mxu1 %v6023_v0 }
 0x178   : > { %v849_v38 = vpop.f32.mrb[8].mxu1 }
 0x179   : > { %v851_v39 = vpop.f32.mrb[9].mxu1  ;;  %v1599_v41 = vmax.f32 %v849_v38, 0.0  ;;  %v4632_v38 = vld [vmem:[#allocation7 + $0x20] ss:$8 sps:$4 sm:$0xff]  }
 0x17a   : > { %v853_v40 = vpop.f32.mrb[10].mxu1  ;;  %v1600_v44 = vmax.f32 %v851_v39, 0.0 }
 0x17b   : > { %v1607_v42 = vmax.f32 %v853_v40, 0.0  ;;  %v855_v43 = vpop.f32.mrb[11].mxu1 }
 0x17c   : > { %v1608_v47 = vmax.f32 %v855_v43, 0.0 }
 0x17d   : > { %v5341_v49 = vpack.c.bf16 %v1607_v42, %v1599_v41  ;;  %1151 = vmatmul.mubr.bf16.gmra.mrb[116].mxu1 %v5266_v54  ;;  %v4637_v42 = vld [vmem:[#allocation7 + $0x34] ss:$8 sps:$4 sm:$0xff]  }
 0x17e   : > { %v5344_v50 = vpack.c.bf16 %v1608_v47, %v1600_v44  ;;  %1160 = vmatprep.mubr.bf16.mxu1 %v6023_v0 }
 0x180   : > { %v859_v48 = vpop.f32.mrb[12].mxu1 }
 0x181   : > { %v861_v51 = vpop.f32.mrb[13].mxu1  ;;  %v1615_v53 = vmax.f32 %v859_v48, 0.0  ;;  %v4635_v48 = vld [vmem:[#allocation7 + $0x30] ss:$8 sps:$4 sm:$0xff]  }
 0x182   : > { %v863_v52 = vpop.f32.mrb[14].mxu1  ;;  %v1616_v59 = vmax.f32 %v861_v51, 0.0  ;;  %v4643_v51 = vld [vmem:[#allocation7 + $0x44] ss:$8 sps:$4 sm:$0xff]  }
 0x183   : > { %v1623_v56 = vmax.f32 %v863_v52, 0.0  ;;  %v865_v57 = vpop.f32.mrb[15].mxu1 }
 0x184   : > { %v1624_v60 = vmax.f32 %v865_v57, 0.0  ;;  %v4641_v57 = vld [vmem:[#allocation7 + $0x40] ss:$8 sps:$4 sm:$0xff]  }
 0x185   : > { %v5347_v62 = vpack.c.bf16 %v1623_v56, %v1615_v53  ;;  %1161 = vmatmul.mubr.bf16.gmra.mrb[120].mxu1 %v5273_v58 }
 0x186   : > { %v5350_v63 = vpack.c.bf16 %v1624_v60, %v1616_v59  ;;  %1170 = vmatprep.mubr.bf16.mxu1 %v6023_v0 }
 0x188   : > { %v869_v54 = vpop.f32.mrb[16].mxu1 }
 0x189   : > { %v871_v2 = vpop.f32.mrb[17].mxu1  ;;  %v1631_v4 = vmax.f32 %v869_v54, 0.0 }
 0x18a   : > { %v873_v3 = vpop.f32.mrb[18].mxu1  ;;  %v1632_v11 = vmax.f32 %v871_v2, 0.0  ;;  %v4646_v2 = vld [vmem:[#allocation7 + $0x54] ss:$8 sps:$4 sm:$0xff]  }
 0x18b   : > { %v1639_v5 = vmax.f32 %v873_v3, 0.0  ;;  %v875_v10 = vpop.f32.mrb[19].mxu1 }
 0x18c   : > { %v1640_v12 = vmax.f32 %v875_v10, 0.0  ;;  %v4644_v10 = vld [vmem:[#allocation7 + $0x50] ss:$8 sps:$4 sm:$0xff]  }
 0x18d   : > { %v5353_v13 = vpack.c.bf16 %v1639_v5, %v1631_v4  ;;  %1171 = vmatmul.mubr.bf16.gmra.mrb[124].mxu1 %v5280_v61  ;;  %v4626_v61 = vld [vmem:[#allocation7 + $0x10] ss:$8 sps:$4 sm:$0xff]  }
 0x18e   : > { %v5356_v14 = vpack.c.bf16 %v1640_v12, %v1632_v11  ;;  %1406 = vmatprep.mubr.bf16.mxu1 %v6023_v0  ;;  %v4652_v11 = vld [vmem:[#allocation7 + $0x64] ss:$8 sps:$4 sm:$0xff]  }
 0x190   : > { %v879_v58 = vpop.f32.mrb[20].mxu1 }
 0x191   : > { %v881_v15 = vpop.f32.mrb[21].mxu1  ;;  %v1647_v19 = vmax.f32 %v879_v58, 0.0 }
 0x192   : > { %v883_v16 = vpop.f32.mrb[22].mxu1  ;;  %v1648_v25 = vmax.f32 %v881_v15, 0.0 }
 0x193   : > { %v1655_v20 = vmax.f32 %v883_v16, 0.0  ;;  %v885_v21 = vpop.f32.mrb[23].mxu1  ;;  %v4650_v16 = vld [vmem:[#allocation7 + $0x60] ss:$8 sps:$4 sm:$0xff]  }
 0x194   : > { %v1656_v26 = vmax.f32 %v885_v21, 0.0  ;;  %v4655_v21 = vld [vmem:[#allocation7 + $0x74] ss:$8 sps:$4 sm:$0xff]  }
 0x195   : > { %v5359_v28 = vpack.c.bf16 %v1655_v20, %v1647_v19  ;;  %1407 = vmatmul.mubr.bf16.vlgmr.msra.gmra.mrb[128].mxu1 %v5197_v37 }
 0x196   : > { %v5362_v29 = vpack.c.bf16 %v1656_v26, %v1648_v25  ;;  %1416 = vmatprep.mubr.bf16.mxu1 %v6023_v0  ;;  %2732 = vmatpush1.bf16.msra.mxu1 %v4623_v17 }
 0x197   : > { %2733 = vmatprep.subr.bf16.mxu1 %v4628_v24 }
 0x198   : > { %v889_v31 = vpop.f32.mrb[24].mxu1 }
 0x199   : > { %v891_v32 = vpop.f32.mrb[25].mxu1  ;;  %v1663_v39 = vmax.f32 %v889_v31, 0.0 }
 0x19a   : > { %v893_v33 = vpop.f32.mrb[26].mxu1  ;;  %2734 = vmatpush1.bf16.msra.mxu1 %v4626_v61  ;;  %v1664_v43 = vmax.f32 %v891_v32, 0.0  ;;  %v4653_v61 = vld [vmem:[#allocation7 + $0x70] ss:$8 sps:$4 sm:$0xff]  }
 0x19b   : > { %v1671_v40 = vmax.f32 %v893_v33, 0.0  ;;  %v895_v41 = vpop.f32.mrb[27].mxu1  ;;  %2735 = vmatprep.subr.bf16.mxu1 %v4634_v30  ;;  %v4661_v30 = vld [vmem:[#allocation7 + $0x84] ss:$8 sps:$4 sm:$0xff]  }
 0x19c   : > { %v1672_v37 = vmax.f32 %v895_v41, 0.0 }
 0x19d   : > { %v5365_v44 = vpack.c.bf16 %v1671_v40, %v1663_v39  ;;  %1417 = vmatmul.mubr.bf16.gmra.mrb[132].mxu1 %v5202_v46 }
 0x19e   : > { %v5368_v47 = vpack.c.bf16 %v1672_v37, %v1664_v43  ;;  %1426 = vmatprep.mubr.bf16.mxu1 %v6023_v0  ;;  %2736 = vmatpush1.bf16.msra.mxu1 %v4632_v38  ;;  %v4659_v38 = vld [vmem:[#allocation7 + $0x80] ss:$8 sps:$4 sm:$0xff]  }
 0x19f   : > { %2737 = vmatprep.subr.bf16.mxu1 %v4637_v42  ;;  %v4664_v42 = vld [vmem:[#allocation7 + $0x94] ss:$8 sps:$4 sm:$0xff]  }
 0x1a0   : > { %v899_v52 = vpop.f32.mrb[28].mxu1 }
 0x1a1   : > { %v901_v53 = vpop.f32.mrb[29].mxu1  ;;  %v1679_v59 = vmax.f32 %v899_v52, 0.0  ;;  %v4670_v52 = vld [vmem:[#allocation7 + $0xa4] ss:$8 sps:$4 sm:$0xff]  }
 0x1a2   : > { %v903_v56 = vpop.f32.mrb[30].mxu1  ;;  %2738 = vmatpush1.bf16.msra.mxu1 %v4635_v48  ;;  %v1680_v3 = vmax.f32 %v901_v53, 0.0 }
 0x1a3   : > { %v1687_v60 = vmax.f32 %v903_v56, 0.0  ;;  %v905_v54 = vpop.f32.mrb[31].mxu1  ;;  %2739 = vmatprep.subr.bf16.mxu1 %v4643_v51  ;;  %v4662_v51 = vld [vmem:[#allocation7 + $0x90] ss:$8 sps:$4 sm:$0xff]  }
 0x1a4   : > { %v1688_v46 = vmax.f32 %v905_v54, 0.0 }
 0x1a5   : > { %v5371_v4 = vpack.c.bf16 %v1687_v60, %v1679_v59  ;;  %1427 = vmatmul.mubr.bf16.gmra.mrb[136].mxu1 %v5207_v55  ;;  %v4668_v59 = vld [vmem:[#allocation7 + $0xa0] ss:$8 sps:$4 sm:$0xff]  }
 0x1a6   : > { %v5374_v5 = vpack.c.bf16 %v1688_v46, %v1680_v3  ;;  %1436 = vmatprep.mubr.bf16.mxu1 %v6023_v0  ;;  %2740 = vmatpush1.bf16.msra.mxu1 %v4641_v57  ;;  %v4673_v3 = vld [vmem:[#allocation7 + $0xb4] ss:$8 sps:$4 sm:$0xff]  }
 0x1a7   : > { %2741 = vmatprep.subr.bf16.mxu1 %v4646_v2 }
 0x1a8   : > { %v909_v12 = vpop.f32.mrb[32].mxu1 }
 0x1a9   : > { %v911_v58 = vpop.f32.mrb[33].mxu1  ;;  %v1695_v17 = vmax.f32 %v909_v12, 0.0  ;;  %v4671_v12 = vld [vmem:[#allocation7 + $0xb0] ss:$8 sps:$4 sm:$0xff]  }
 0x1aa   : > { %v913_v15 = vpop.f32.mrb[34].mxu1  ;;  %2742 = vmatpush1.bf16.msra.mxu1 %v4644_v10  ;;  %v1696_v24 = vmax.f32 %v911_v58, 0.0  ;;  %v4679_v58 = vld [vmem:[#allocation7 + $0xc4] ss:$8 sps:$4 sm:$0xff]  }
 0x1ab   : > { %v1703_v19 = vmax.f32 %v913_v15, 0.0  ;;  %v915_v20 = vpop.f32.mrb[35].mxu1  ;;  %2743 = vmatprep.subr.bf16.mxu1 %v4652_v11 }
 0x1ac   : > { %v1704_v55 = vmax.f32 %v915_v20, 0.0  ;;  %v4677_v20 = vld [vmem:[#allocation7 + $0xc0] ss:$8 sps:$4 sm:$0xff]  }
 0x1ad   : > { %v5377_v25 = vpack.c.bf16 %v1703_v19, %v1695_v17  ;;  %1437 = vmatmul.mubr.bf16.gmra.mrb[140].mxu1 %v5212_v1  ;;  %v1215_v17 = vpop.f32.mrb[0].mxu0 }
 0x1ae   : > { %v5380_v26 = vpack.c.bf16 %v1704_v55, %v1696_v24  ;;  %1446 = vmatprep.mubr.bf16.mxu1 %v6023_v0  ;;  %2744 = vmatpush1.bf16.msra.mxu1 %v4650_v16 }
 0x1af   : > { %2745 = vmatprep.subr.bf16.mxu1 %v4655_v21 }
 0x1b0   : > { %v919_v31 = vpop.f32.mrb[36].mxu1 }
 0x1b1   : > { %v921_v32 = vpop.f32.mrb[37].mxu1  ;;  %v1711_v39 = vmax.f32 %v919_v31, 0.0 }
 0x1b2   : > { %v923_v33 = vpop.f32.mrb[38].mxu1  ;;  %2746 = vmatpush1.bf16.msra.mxu1 %v4653_v61  ;;  %v1712_v43 = vmax.f32 %v921_v32, 0.0  ;;  %v4682_v61 = vld [vmem:[#allocation7 + $0xd4] ss:$8 sps:$4 sm:$0xff]  }
 0x1b3   : > { %v1719_v40 = vmax.f32 %v923_v33, 0.0  ;;  %v925_v41 = vpop.f32.mrb[39].mxu1  ;;  %2747 = vmatprep.subr.bf16.mxu1 %v4661_v30 }
 0x1b4   : > { %v1720_v1 = vmax.f32 %v925_v41, 0.0 }
 0x1b5   : > { %v5383_v37 = vpack.c.bf16 %v1719_v40, %v1711_v39  ;;  %1447 = vmatmul.mubr.bf16.gmra.mrb[144].mxu1 %v5217_v6 }
 0x1b6   : > { %v5386_v48 = vpack.c.bf16 %v1720_v1, %v1712_v43  ;;  %1456 = vmatprep.mubr.bf16.mxu1 %v6023_v0  ;;  %2748 = vmatpush1.bf16.msra.mxu1 %v4659_v38  ;;  %v1571_v38 = vmax.f32 %v1215_v17, 0.0  ;;  %v4680_v43 = vld [vmem:[#allocation7 + $0xd0] ss:$8 sps:$4 sm:$0xff]  }
 0x1b7   : > { %2749 = vmatprep.subr.bf16.mxu1 %v4664_v42 }
 0x1b8   : > { %v929_v53 = vpop.f32.mrb[40].mxu1 }
 0x1b9   : > { %v931_v56 = vpop.f32.mrb[41].mxu1  ;;  %v1727_v60 = vmax.f32 %v929_v53, 0.0 }
 0x1ba   : > { %v933_v57 = vpop.f32.mrb[42].mxu1  ;;  %2750 = vmatpush1.bf16.msra.mxu1 %v4662_v51  ;;  %v1728_v46 = vmax.f32 %v931_v56, 0.0  ;;  %v4688_v51 = vld [vmem:[#allocation7 + $0xe4] ss:$8 sps:$4 sm:$0xff]  }
 0x1bb   : > { %v1735_v54 = vmax.f32 %v933_v57, 0.0  ;;  %v935_v2 = vpop.f32.mrb[43].mxu1  ;;  %2751 = vmatprep.subr.bf16.mxu1 %v4670_v52 }
 0x1bc   : > { %v1736_v6 = vmax.f32 %v935_v2, 0.0 }
 0x1bd   : > { %v5389_v10 = vpack.c.bf16 %v1735_v54, %v1727_v60  ;;  %1457 = vmatmul.mubr.bf16.gmra.mrb[148].mxu1 %v5222_v7  ;;  %v1217_v7 = vpop.f32.mrb[1].mxu0 }
 0x1be   : > { %v5392_v11 = vpack.c.bf16 %v1736_v6, %v1728_v46  ;;  %1466 = vmatprep.mubr.bf16.mxu1 %v6023_v0  ;;  %2752 = vmatpush1.bf16.msra.mxu1 %v4668_v59  ;;  %v1219_v32 = vpop.f32.mrb[2].mxu0  ;;  %v1572_v39 = vmax.f32 %v1217_v7, 0.0  ;;  %v4686_v59 = vld [vmem:[#allocation7 + $0xe0] ss:$8 sps:$4 sm:$0xff]  }
 0x1bf   : > { %2753 = vmatprep.subr.bf16.mxu1 %v4673_v3  ;;  %v1579_v40 = vmax.f32 %v1219_v32, 0.0  ;;  %v1221_v41 = vpop.f32.mrb[3].mxu0  ;;  %v4691_v3 = vld [vmem:[#allocation7 + $0xf4] ss:$8 sps:$4 sm:$0xff]  }
 0x1c0   : > { %v939_v15 = vpop.f32.mrb[44].mxu1  ;;  %v1580_v1 = vmax.f32 %v1221_v41, 0.0  ;;  %v1225_v46 = vpop.f32.mrb[4].mxu0 }
 0x1c1   : > { %v941_v16 = vpop.f32.mrb[45].mxu1  ;;  %v1743_v21 = vmax.f32 %v939_v15, 0.0  ;;  %v5401_v52 = vpack.c.bf16 %v1579_v40, %v1571_v38 }
 0x1c2   : > { %v943_v19 = vpop.f32.mrb[46].mxu1  ;;  %2754 = vmatpush1.bf16.msra.mxu1 %v4671_v12  ;;  %v1744_v30 = vmax.f32 %v941_v16, 0.0  ;;  %v5403_v56 = vpack.c.bf16 %v1580_v1, %v1572_v39  ;;  %v1587_v16 = vmax.f32 %v1225_v46, 0.0 }
 0x1c3   : > { %v1751_v24 = vmax.f32 %v943_v19, 0.0  ;;  %v945_v55 = vpop.f32.mrb[47].mxu1  ;;  %2755 = vmatprep.subr.bf16.mxu1 %v4679_v58  ;;  %v1227_v58 = vpop.f32.mrb[5].mxu0 }
 0x1c4   : > { %v1752_v31 = vmax.f32 %v945_v55, 0.0  ;;  %v1588_v17 = vmax.f32 %v1227_v58, 0.0  ;;  %v1229_v19 = vpop.f32.mrb[6].mxu0 }
 0x1c5   : > { %v5395_v33 = vpack.c.bf16 %v1751_v24, %v1743_v21  ;;  %1467 = vmatmul.mubr.bf16.gmra.mrb[152].mxu1 %v5227_v8  ;;  %v4689_v21 = vld [vmem:[#allocation7 + $0xf0] ss:$8 sps:$4 sm:$0xff]   ;;  %v1595_v24 = vmax.f32 %v1229_v19, 0.0  ;;  %v1231_v55 = vpop.f32.mrb[7].mxu0 }
 0x1c6   : > { %v5398_v42 = vpack.c.bf16 %v1752_v31, %v1744_v30  ;;  %1476 = vmatprep.mubr.bf16.mxu1 %v6023_v0  ;;  %2756 = vmatpush1.bf16.msra.mxu1 %v4677_v20  ;;  %v1235_v41 = vpop.f32.mrb[8].mxu0 }
 0x1c7   : > { %2757 = vmatprep.subr.bf16.mxu1 %v4682_v61  ;;  %v1596_v61 = vmax.f32 %v1231_v55, 0.0  ;;  %v5411_v30 = vpack.c.bf16 %v1595_v24, %v1587_v16 }
 0x1c8   : > { %v949_v53 = vpop.f32.mrb[48].mxu1 }
 0x1c9   : > { %v951_v57 = vpop.f32.mrb[49].mxu1  ;;  %v1759_v60 = vmax.f32 %v949_v53, 0.0  ;;  %v5413_v32 = vpack.c.bf16 %v1596_v61, %v1588_v17 }
 0x1ca   : > { %v953_v8 = vpop.f32.mrb[50].mxu1  ;;  %2758 = vmatpush1.bf16.msra.mxu1 %v4680_v43  ;;  %v1760_v6 = vmax.f32 %v951_v57, 0.0  ;;  %v1603_v57 = vmax.f32 %v1235_v41, 0.0 }
 0x1cb   : > { %v1767_v54 = vmax.f32 %v953_v8, 0.0  ;;  %v955_v2 = vpop.f32.mrb[51].mxu1  ;;  %2759 = vmatprep.subr.bf16.mxu1 %v4688_v51  ;;  %v1237_v51 = vpop.f32.mrb[9].mxu0 }
 0x1cc   : > { %v1768_v12 = vmax.f32 %v955_v2, 0.0  ;;  %v1604_v8 = vmax.f32 %v1237_v51, 0.0 }
 0x1cd   : > { %v5405_v15 = vpack.c.bf16 %v1767_v54, %v1759_v60  ;;  %1477 = vmatmul.mubr.bf16.gmra.mrb[156].mxu1 %v5232_v9 }
 0x1ce   : > { %v5408_v20 = vpack.c.bf16 %v1768_v12, %v1760_v6  ;;  %1486 = vmatprep.mubr.bf16.mxu1 %v6023_v0  ;;  %2760 = vmatpush1.bf16.msra.mxu1 %v4686_v59  ;;  %v1239_v59 = vpop.f32.mrb[10].mxu0 }
 0x1cf   : > { %2761 = vmatprep.subr.bf16.mxu1 %v4691_v3  ;;  %v1611_v54 = vmax.f32 %v1239_v59, 0.0  ;;  %v1241_v2 = vpop.f32.mrb[11].mxu0 }
 0x1d0   : > { %v959_v7 = vpop.f32.mrb[52].mxu1  ;;  %v1612_v3 = vmax.f32 %v1241_v2, 0.0 }
 0x1d1   : > { %v961_v31 = vpop.f32.mrb[53].mxu1  ;;  %v1775_v38 = vmax.f32 %v959_v7, 0.0  ;;  %v5421_v6 = vpack.c.bf16 %v1611_v54, %v1603_v57 }
 0x1d2   : > { %v963_v9 = vpop.f32.mrb[54].mxu1  ;;  %2762 = vmatpush1.bf16.msra.mxu1 %v4689_v21  ;;  %v1776_v43 = vmax.f32 %v961_v31, 0.0  ;;  %v5423_v58 = vpack.c.bf16 %v1612_v3, %v1604_v8  ;;  %v1245_v21 = vpop.f32.mrb[12].mxu0 }
 0x1d3   : > { %v1783_v39 = vmax.f32 %v963_v9, 0.0  ;;  %v965_v40 = vpop.f32.mrb[55].mxu1  ;;  %v1247_v61 = vpop.f32.mrb[13].mxu0  ;;  %v1619_v31 = vmax.f32 %v1245_v21, 0.0 }
 0x1d4   : > { %v1784_v1 = vmax.f32 %v965_v40, 0.0  ;;  %v1620_v9 = vmax.f32 %v1247_v61, 0.0 }
 0x1d5   : > { %v5415_v53 = vpack.c.bf16 %v1783_v39, %v1775_v38  ;;  %1487 = vmatmul.mubr.bf16.gmra.mrb[160].mxu1 %v5237_v18  ;;  %v1249_v38 = vpop.f32.mrb[14].mxu0 }
 0x1d6   : > { %v5418_v60 = vpack.c.bf16 %v1784_v1, %v1776_v43  ;;  %1496 = vmatprep.mubr.bf16.mxu1 %v6023_v0  ;;  %v1627_v40 = vmax.f32 %v1249_v38, 0.0  ;;  %v1251_v41 = vpop.f32.mrb[15].mxu0 }
 0x1d7   : > { %v1628_v43 = vmax.f32 %v1251_v41, 0.0  ;;  %v1255_v3 = vpop.f32.mrb[16].mxu0 }
 0x1d8   : > { %v969_v46 = vpop.f32.mrb[56].mxu1  ;;  %v5431_v51 = vpack.c.bf16 %v1627_v40, %v1619_v31 }
 0x1d9   : > { %v971_v12 = vpop.f32.mrb[57].mxu1  ;;  %v1791_v17 = vmax.f32 %v969_v46, 0.0  ;;  %v5433_v8 = vpack.c.bf16 %v1628_v43, %v1620_v9 }
 0x1da   : > { %v973_v16 = vpop.f32.mrb[58].mxu1  ;;  %v1792_v24 = vmax.f32 %v971_v12, 0.0 }
 0x1db   : > { %v1799_v19 = vmax.f32 %v973_v16, 0.0  ;;  %v975_v18 = vpop.f32.mrb[59].mxu1  ;;  %v1257_v16 = vpop.f32.mrb[17].mxu0 }
 0x1dc   : > { %v1800_v55 = vmax.f32 %v975_v18, 0.0  ;;  %v1636_v18 = vmax.f32 %v1257_v16, 0.0  ;;  %v1259_v21 = vpop.f32.mrb[18].mxu0 }
 0x1dd   : > { %v5425_v7 = vpack.c.bf16 %v1799_v19, %v1791_v17  ;;  %1497 = vmatmul.mubr.bf16.gmra.mrb[164].mxu1 %v5242_v27  ;;  %v1635_v19 = vmax.f32 %v1255_v3, 0.0  ;;  %v1261_v61 = vpop.f32.mrb[19].mxu0 }
 0x1de   : > { %v5428_v39 = vpack.c.bf16 %v1800_v55, %v1792_v24  ;;  %1506 = vmatprep.mubr.bf16.mxu1 %v6023_v0  ;;  %v1643_v55 = vmax.f32 %v1259_v21, 0.0  ;;  %v1644_v31 = vmax.f32 %v1261_v61, 0.0  ;;  %v4656_v61 = vld [vmem:[#allocation7 + $0x200] ss:$8 sps:$4 sm:$0xff]  }
 0x1e0   : > { %v979_v1 = vpop.f32.mrb[60].mxu1  ;;  %v5441_v38 = vpack.c.bf16 %v1643_v55, %v1635_v19  ;;  %v5443_v41 = vpack.c.bf16 %v1644_v31, %v1636_v18  ;;  %v4667_v31 = vld [vmem:[#allocation7 + $0x214] ss:$8 sps:$4 sm:$0xff]  }
 0x1e1   : > { %v981_v57 = vpop.f32.mrb[61].mxu1  ;;  %v1807_v54 = vmax.f32 %v979_v1, 0.0  ;;  %v1265_v1 = vpop.f32.mrb[20].mxu0 }
 0x1e2   : > { %v983_v59 = vpop.f32.mrb[62].mxu1  ;;  %v1808_v46 = vmax.f32 %v981_v57, 0.0  ;;  %6035 = vst [vmem:[#allocation12_spill] sm:$0xff] %v5441_v38  ;;  %v4674_v38 = vld [vmem:[#allocation7 + $0x220] ss:$8 sps:$4 sm:$0xff]  }
 0x1e3   : > { %v1815_v2 = vmax.f32 %v983_v59, 0.0  ;;  %v985_v27 = vpop.f32.mrb[63].mxu1 }
 0x1e4   : > { %v1816_v12 = vmax.f32 %v985_v27, 0.0 }
 0x1e5   : > { %v5435_v17 = vpack.c.bf16 %v1815_v2, %v1807_v54  ;;  %1507 = vmatmul.mubr.bf16.gmra.mrb[168].mxu1 %v5247_v36  ;;  %v1651_v54 = vmax.f32 %v1265_v1, 0.0  ;;  %v1267_v2 = vpop.f32.mrb[21].mxu0 }
 0x1e6   : > { %v5438_v24 = vpack.c.bf16 %v1816_v12, %v1808_v46  ;;  %1516 = vmatprep.mubr.bf16.mxu1 %v6023_v0  ;;  %v1652_v46 = vmax.f32 %v1267_v2, 0.0  ;;  %v1269_v12 = vpop.f32.mrb[22].mxu0 }
 0x1e7   : > { %v1659_v21 = vmax.f32 %v1269_v12, 0.0  ;;  %v1271_v19 = vpop.f32.mrb[23].mxu0 }
 0x1e8   : > { %v1022_v9 = vpop.f32.mrb[64].mxu1  ;;  %v1660_v18 = vmax.f32 %v1271_v19, 0.0 }
 0x1e9   : > { %v1024_v40 = vpop.f32.mrb[65].mxu1  ;;  %v1569_v57 = vmax.f32 %v1022_v9, 0.0  ;;  %v5447_v9 = vpack.c.bf16 %v1659_v21, %v1651_v54 }
 0x1ea   : > { %v1026_v43 = vpop.f32.mrb[66].mxu1  ;;  %v1570_v27 = vmax.f32 %v1024_v40, 0.0  ;;  %v5449_v1 = vpack.c.bf16 %v1660_v18, %v1652_v46  ;;  %v4776_v18 = vld [vmem:[%s5184_s9 + $0x60] sm:$0xff]  }
 0x1eb   : > { %v1577_v36 = vmax.f32 %v1026_v43, 0.0  ;;  %v1028_v59 = vpop.f32.mrb[67].mxu1  ;;  %6036 = vst [vmem:[#allocation13_spill] sm:$0xff] %v5447_v9 }
 0x1ec   : > { %v1578_v3 = vmax.f32 %v1028_v59, 0.0  ;;  %6037 = vst [vmem:[#allocation14_spill] sm:$0xff] %v5449_v1 }
 0x1ed   : > { %v1825_v16 = vpack.c.bf16 %v1577_v36, %v1569_v57  ;;  %1517 = vmatmul.mubr.bf16.gmra.mrb[172].mxu1 %v5252_v45  ;;  %v4665_v45 = vld [vmem:[#allocation7 + $0x210] ss:$8 sps:$4 sm:$0xff]   ;;  %v4676_v57 = vld [vmem:[#allocation7 + $0x224] ss:$8 sps:$4 sm:$0xff]   ;;  %v1275_v36 = vpop.f32.mrb[24].mxu0 }
 0x1ee   : > { %v1826_v55 = vpack.c.bf16 %v1578_v3, %v1570_v27  ;;  %1526 = vmatprep.mubr.bf16.mxu1 %v6023_v0  ;;  %v1667_v12 = vmax.f32 %v1275_v36, 0.0  ;;  %v1277_v19 = vpop.f32.mrb[25].mxu0 }
 0x1ef   : > { %v1668_v0 = vmax.f32 %v1277_v19, 0.0  ;;  %v4694_v19 = vld [vmem:[#allocation7 + $0x244] ss:$8 sps:$4 sm:$0xff]  }
 0x1f0   : > { %v1032_v43 = vpop.f32.mrb[68].mxu1  ;;  %2956 = vmatprep.mubr.bf16.mxu0 %v1826_v55  ;;  %v1279_v55 = vpop.f32.mrb[26].mxu0 }
 0x1f1   : > { %v1034_v40 = vpop.f32.mrb[69].mxu1  ;;  %2957 = vmatmul.mubr.bf16.vlgmr.msra.gmra.mrb[64].mxu0 %v1825_v16  ;;  %v1585_v2 = vmax.f32 %v1032_v43, 0.0  ;;  %v1675_v16 = vmax.f32 %v1279_v55, 0.0  ;;  %v1281_v9 = vpop.f32.mrb[27].mxu0 }
 0x1f2   : > { %v1036_v59 = vpop.f32.mrb[70].mxu1  ;;  %3118 = vmatpush1.bf16.msra.mxu0 %v4656_v61  ;;  %v1586_v54 = vmax.f32 %v1034_v40, 0.0  ;;  %v6038_v61 = vmov 0   ;;  %v1676_v43 = vmax.f32 %v1281_v9, 0.0 }
 0x1f3   : > { %v1593_v27 = vmax.f32 %v1036_v59, 0.0  ;;  %v1038_v3 = vpop.f32.mrb[71].mxu1  ;;  %3119 = vmatprep.subr.bf16.mxu0 %v4667_v31  ;;  %v4685_v59 = vld [vmem:[#allocation7 + $0x234] ss:$8 sps:$4 sm:$0xff]   ;;  %v5453_v31 = vpack.c.bf16 %v1675_v16, %v1667_v12 }
 0x1f4   : > { %v1594_v21 = vmax.f32 %v1038_v3, 0.0  ;;  %v5455_v40 = vpack.c.bf16 %v1676_v43, %v1668_v0  ;;  %v4777_v43 = vld [vmem:[%s5184_s9 + $0x68] sm:$0xff]  }
 0x1f5   : > { %v1833_v46 = vpack.c.bf16 %v1593_v27, %v1585_v2  ;;  %1527 = vmatmul.mubr.bf16.gmra.mrb[176].mxu1 %v4776_v18  ;;  %6039 = vst [vmem:[#allocation15_spill] sm:$0xff] %v5453_v31  ;;  %v4683_v27 = vld [vmem:[#allocation7 + $0x230] ss:$8 sps:$4 sm:$0xff]  }
 0x1f6   : > { %v1834_v1 = vpack.c.bf16 %v1594_v21, %v1586_v54  ;;  %3120 = vmatpush1.bf16.msra.mxu0 %v4665_v45  ;;  %1536 = vmatprep.mubr.bf16.mxu1 %v6038_v61  ;;  %6040 = vst [vmem:[#allocation16_spill] sm:$0xff] %v5455_v40  ;;  %v1285_v45 = vpop.f32.mrb[28].mxu0 }
 0x1f7   : > { %3121 = vmatprep.subr.bf16.mxu0 %v4676_v57  ;;  %v1683_v9 = vmax.f32 %v1285_v45, 0.0  ;;  %v1287_v57 = vpop.f32.mrb[29].mxu0 }
 0x1f8   : > { %v1042_v36 = vpop.f32.mrb[72].mxu1  ;;  %2966 = vmatprep.mubr.bf16.mxu0 %v1834_v1  ;;  %v1684_v16 = vmax.f32 %v1287_v57, 0.0  ;;  %v1289_v1 = vpop.f32.mrb[30].mxu0  ;;  %v4700_v57 = vld [vmem:[#allocation7 + $0x264] ss:$8 sps:$4 sm:$0xff]  }
 0x1f9   : > { %v1044_v3 = vpop.f32.mrb[73].mxu1  ;;  %2967 = vmatmul.mubr.bf16.gmra.mrb[68].mxu0 %v1833_v46  ;;  %v1601_v54 = vmax.f32 %v1042_v36, 0.0  ;;  %v1691_v46 = vmax.f32 %v1289_v1, 0.0  ;;  %v1291_v31 = vpop.f32.mrb[31].mxu0 }
 0x1fa   : > { %v1046_v2 = vpop.f32.mrb[74].mxu1  ;;  %3122 = vmatpush1.bf16.msra.mxu0 %v4674_v38  ;;  %v1602_v12 = vmax.f32 %v1044_v3, 0.0  ;;  %v4692_v38 = vld [vmem:[#allocation7 + $0x240] ss:$8 sps:$4 sm:$0xff]   ;;  %v1692_v36 = vmax.f32 %v1291_v31, 0.0 }
 0x1fb   : > { %v1609_v21 = vmax.f32 %v1046_v2, 0.0  ;;  %v1048_v55 = vpop.f32.mrb[75].mxu1  ;;  %3123 = vmatprep.subr.bf16.mxu0 %v4685_v59  ;;  %v4697_v2 = vld [vmem:[#allocation7 + $0x254] ss:$8 sps:$4 sm:$0xff]   ;;  %v5459_v59 = vpack.c.bf16 %v1691_v46, %v1683_v9 }
 0x1fc   : > { %v1610_v18 = vmax.f32 %v1048_v55, 0.0  ;;  %v5461_v3 = vpack.c.bf16 %v1692_v36, %v1684_v16  ;;  %v4778_v36 = vld [vmem:[%s5184_s9 + $0x70] sm:$0xff]  }
 0x1fd   : > { %v1841_v0 = vpack.c.bf16 %v1609_v21, %v1601_v54  ;;  %1537 = vmatmul.mubr.bf16.gmra.mrb[180].mxu1 %v4777_v43  ;;  %6041 = vst [vmem:[#allocation17_spill] sm:$0xff] %v5459_v59  ;;  %v4695_v21 = vld [vmem:[#allocation7 + $0x250] ss:$8 sps:$4 sm:$0xff]  }
 0x1fe   : > { %v1842_v40 = vpack.c.bf16 %v1610_v18, %v1602_v12  ;;  %1546 = vmatprep.mubr.bf16.mxu1 %v6038_v61  ;;  %3124 = vmatpush1.bf16.msra.mxu0 %v4683_v27  ;;  %6042 = vst [vmem:[#allocation18_spill] sm:$0xff] %v5461_v3  ;;  %v1295_v12 = vpop.f32.mrb[32].mxu0 }
 0x1ff   : > { %3125 = vmatprep.subr.bf16.mxu0 %v4694_v19  ;;  %v1699_v31 = vmax.f32 %v1295_v12, 0.0  ;;  %v1297_v19 = vpop.f32.mrb[33].mxu0 }
 0x200   : > { %v1052_v45 = vpop.f32.mrb[76].mxu1  ;;  %2976 = vmatprep.mubr.bf16.mxu0 %v1842_v40  ;;  %v1700_v46 = vmax.f32 %v1297_v19, 0.0  ;;  %v1299_v40 = vpop.f32.mrb[34].mxu0  ;;  %v4706_v19 = vld [vmem:[#allocation7 + $0x284] ss:$8 sps:$4 sm:$0xff]  }
 0x201   : > { %v1054_v55 = vpop.f32.mrb[77].mxu1  ;;  %2977 = vmatmul.mubr.bf16.gmra.mrb[72].mxu0 %v1841_v0  ;;  %v1617_v18 = vmax.f32 %v1052_v45, 0.0  ;;  %v1707_v0 = vmax.f32 %v1299_v40, 0.0  ;;  %v1301_v59 = vpop.f32.mrb[35].mxu0 }
 0x202   : > { %v1056_v54 = vpop.f32.mrb[78].mxu1  ;;  %3126 = vmatpush1.bf16.msra.mxu0 %v4692_v38  ;;  %v1618_v9 = vmax.f32 %v1054_v55, 0.0  ;;  %v4698_v38 = vld [vmem:[#allocation7 + $0x260] ss:$8 sps:$4 sm:$0xff]   ;;  %v1708_v45 = vmax.f32 %v1301_v59, 0.0 }
 0x203   : > { %v1625_v27 = vmax.f32 %v1056_v54, 0.0  ;;  %v1058_v1 = vpop.f32.mrb[79].mxu1  ;;  %3127 = vmatprep.subr.bf16.mxu0 %v4697_v2  ;;  %v4703_v54 = vld [vmem:[#allocation7 + $0x274] ss:$8 sps:$4 sm:$0xff]   ;;  %v5465_v2 = vpack.c.bf16 %v1707_v0, %v1699_v31 }
 0x204   : > { %v1626_v43 = vmax.f32 %v1058_v1, 0.0  ;;  %v5467_v55 = vpack.c.bf16 %v1708_v45, %v1700_v46  ;;  %v4779_v0 = vld [vmem:[%s5184_s9 + $0x78] sm:$0xff]   ;;  %s4870_s9 = sshll.u32 %s4964_s18, 4  ;;  %s4871_s9 = int_to_ptr.vmem [resolvable:$false] %s4870_s9 }
 0x205   : > { %v1849_v16 = vpack.c.bf16 %v1625_v27, %v1617_v18  ;;  %1547 = vmatmul.mubr.bf16.gmra.mrb[184].mxu1 %v4778_v36  ;;  %6043 = vst [vmem:[#allocation19_spill] sm:$0xff] %v5465_v2  ;;  %v4701_v27 = vld [vmem:[#allocation7 + $0x270] ss:$8 sps:$4 sm:$0xff]   ;;  %s4872_s23 = scalar_lea.vmem %s4871_s9, 8192  ;;  %p4873_p5 = scmp.lt.s32.totalorder %s5963_s24, %s4871_s9 }
 0x206   : > { %v1850_v3 = vpack.c.bf16 %v1626_v43, %v1618_v9  ;;  %1556 = vmatprep.mubr.bf16.mxu1 %v6038_v61  ;;  %3128 = vmatpush1.bf16.msra.mxu0 %v4695_v21  ;;  %v1305_v9 = vpop.f32.mrb[36].mxu0  ;;  %p4874_p9 = scmp.lt.s32.totalorder %s4872_s23, %s4866_s12 }
 0x207   : > { %3129 = vmatprep.subr.bf16.mxu0 %v4700_v57  ;;  %v1715_v59 = vmax.f32 %v1305_v9, 0.0  ;;  %v1307_v57 = vpop.f32.mrb[37].mxu0 }
 0x208   : > { %v1062_v12 = vpop.f32.mrb[80].mxu1  ;;  %2986 = vmatprep.mubr.bf16.mxu0 %v1850_v3  ;;  %v1716_v36 = vmax.f32 %v1307_v57, 0.0  ;;  %v1309_v3 = vpop.f32.mrb[38].mxu0  ;;  %v4712_v57 = vld [vmem:[#allocation7 + $0x2a4] ss:$8 sps:$4 sm:$0xff]   ;;  %p4875_p11 = por %p4874_p9, %p4873_p5 }
 0x209   : > { %v1064_v1 = vpop.f32.mrb[81].mxu1  ;;  %2987 = vmatmul.mubr.bf16.gmra.mrb[76].mxu0 %v1849_v16  ;;  %v1633_v61 = vmax.f32 %v1062_v12, 0.0  ;;  %v1723_v16 = vmax.f32 %v1309_v3, 0.0  ;;  %v1311_v45 = vpop.f32.mrb[39].mxu0 }
 0x20a   : > { %v1066_v18 = vpop.f32.mrb[82].mxu1  ;;  %3130 = vmatpush1.bf16.msra.mxu0 %v4698_v38  ;;  %v1634_v31 = vmax.f32 %v1064_v1, 0.0  ;;  %v4704_v38 = vld [vmem:[#allocation7 + $0x280] ss:$8 sps:$4 sm:$0xff]   ;;  %v1724_v12 = vmax.f32 %v1311_v45, 0.0  ;;  %p4876_p0 = pnand %p4875_p11, %p4869_p3 }
 0x20b   : > { %v1641_v21 = vmax.f32 %v1066_v18, 0.0  ;;  %v1068_v43 = vpop.f32.mrb[83].mxu1  ;;  %3131 = vmatprep.subr.bf16.mxu0 %v4703_v54  ;;  %v4709_v18 = vld [vmem:[#allocation7 + $0x294] ss:$8 sps:$4 sm:$0xff]   ;;  %v5471_v54 = vpack.c.bf16 %v1723_v16, %v1715_v59 }
 0x20c   : > { %v1642_v40 = vmax.f32 %v1068_v43, 0.0  ;;  %v5473_v1 = vpack.c.bf16 %v1724_v12, %v1716_v36 }
 0x20d   : > { %v1857_v46 = vpack.c.bf16 %v1641_v21, %v1633_v61  ;;  %1557 = vmatmul.mubr.bf16.gmra.mrb[188].mxu1 %v4779_v0  ;;  %v4707_v21 = vld [vmem:[#allocation7 + $0x290] ss:$8 sps:$4 sm:$0xff]  }
 0x20e   : > { %v1858_v2 = vpack.c.bf16 %v1642_v40, %v1634_v31  ;;  %2763 = vmatprep.mubr.bf16.mxu1 %v5332_v23  ;;  %3132 = vmatpush1.bf16.msra.mxu0 %v4701_v27  ;;  %v1315_v31 = vpop.f32.mrb[40].mxu0 }
 0x20f   : > { %3133 = vmatprep.subr.bf16.mxu0 %v4706_v19  ;;  %v1731_v3 = vmax.f32 %v1315_v31, 0.0  ;;  %v1317_v19 = vpop.f32.mrb[41].mxu0 }
 0x210   : > { %v1072_v9 = vpop.f32.mrb[84].mxu1  ;;  %2996 = vmatprep.mubr.bf16.mxu0 %v1858_v2  ;;  %v1732_v16 = vmax.f32 %v1317_v19, 0.0  ;;  %v1319_v45 = vpop.f32.mrb[42].mxu0 }
 0x211   : > { %v1074_v43 = vpop.f32.mrb[85].mxu1  ;;  %2997 = vmatmul.mubr.bf16.gmra.mrb[80].mxu0 %v1857_v46  ;;  %v1649_v40 = vmax.f32 %v1072_v9, 0.0  ;;  %v1739_v36 = vmax.f32 %v1319_v45, 0.0  ;;  %v1321_v46 = vpop.f32.mrb[43].mxu0 }
 0x212   : > { %v1076_v61 = vpop.f32.mrb[86].mxu1  ;;  %3134 = vmatpush1.bf16.msra.mxu0 %v4704_v38  ;;  %v1650_v0 = vmax.f32 %v1074_v43, 0.0  ;;  %v4710_v38 = vld [vmem:[#allocation7 + $0x2a0] ss:$8 sps:$4 sm:$0xff]   ;;  %v1740_v9 = vmax.f32 %v1321_v46, 0.0  ;;  %v1325_v19 = vpop.f32.mrb[44].mxu0 }
 0x213   : > { %v1657_v23 = vmax.f32 %v1076_v61, 0.0  ;;  %v1078_v27 = vpop.f32.mrb[87].mxu1  ;;  %3135 = vmatprep.subr.bf16.mxu0 %v4709_v18  ;;  %v4715_v61 = vld [vmem:[#allocation7 + $0x2b4] ss:$8 sps:$4 sm:$0xff]   ;;  %v5477_v18 = vpack.c.bf16 %v1739_v36, %v1731_v3 }
 0x214   : > { %v1658_v59 = vmax.f32 %v1078_v27, 0.0  ;;  %v5479_v43 = vpack.c.bf16 %v1740_v9, %v1732_v16 }
 0x215   : > { %v1865_v2 = vpack.c.bf16 %v1657_v23, %v1649_v40  ;;  %2764 = vmatmul.mubr.bf16.vlgmr.msra.gmra.mrb[192].mxu1 %v5329_v22  ;;  %v4713_v22 = vld [vmem:[#allocation7 + $0x2b0] ss:$8 sps:$4 sm:$0xff]   ;;  %v4718_v23 = vld [vmem:[#allocation7 + $0x2c4] ss:$8 sps:$4 sm:$0xff]  }
 0x216   : > { %v1866_v12 = vpack.c.bf16 %v1658_v59, %v1650_v0  ;;  %2773 = vmatprep.mubr.bf16.mxu1 %v5338_v35  ;;  %3136 = vmatpush1.bf16.msra.mxu0 %v4707_v21  ;;  %v1747_v59 = vmax.f32 %v1325_v19, 0.0 }
 0x217   : > { %3137 = vmatprep.subr.bf16.mxu0 %v4712_v57  ;;  %v1327_v57 = vpop.f32.mrb[45].mxu0 }
 0x218   : > { %v1082_v31 = vpop.f32.mrb[88].mxu1  ;;  %3006 = vmatprep.mubr.bf16.mxu0 %v1866_v12  ;;  %v1748_v36 = vmax.f32 %v1327_v57, 0.0  ;;  %v1329_v46 = vpop.f32.mrb[46].mxu0 }
 0x219   : > { %v1084_v27 = vpop.f32.mrb[89].mxu1  ;;  %3007 = vmatmul.mubr.bf16.gmra.mrb[84].mxu0 %v1865_v2  ;;  %v1665_v0 = vmax.f32 %v1082_v31, 0.0  ;;  %v1755_v16 = vmax.f32 %v1329_v46, 0.0  ;;  %v1331_v2 = vpop.f32.mrb[47].mxu0 }
 0x21a   : > { %v1086_v40 = vpop.f32.mrb[90].mxu1  ;;  %3138 = vmatpush1.bf16.msra.mxu0 %v4710_v38  ;;  %v1666_v45 = vmax.f32 %v1084_v27, 0.0  ;;  %v4716_v38 = vld [vmem:[#allocation7 + $0x2c0] ss:$8 sps:$4 sm:$0xff]   ;;  %v1756_v31 = vmax.f32 %v1331_v2, 0.0  ;;  %v1335_v57 = vpop.f32.mrb[48].mxu0 }
 0x21b   : > { %v1673_v35 = vmax.f32 %v1086_v40, 0.0  ;;  %v1088_v21 = vpop.f32.mrb[91].mxu1  ;;  %3139 = vmatprep.subr.bf16.mxu0 %v4715_v61  ;;  %v4721_v40 = vld [vmem:[#allocation7 + $0x2d4] ss:$8 sps:$4 sm:$0xff]   ;;  %v5483_v61 = vpack.c.bf16 %v1755_v16, %v1747_v59 }
 0x21c   : > { %v1674_v3 = vmax.f32 %v1088_v21, 0.0  ;;  %v5485_v27 = vpack.c.bf16 %v1756_v31, %v1748_v36 }
 0x21d   : > { %v1873_v12 = vpack.c.bf16 %v1673_v35, %v1665_v0  ;;  %2774 = vmatmul.mubr.bf16.gmra.mrb[196].mxu1 %v5335_v34  ;;  %v4719_v34 = vld [vmem:[#allocation7 + $0x2d0] ss:$8 sps:$4 sm:$0xff]   ;;  %v4724_v35 = vld [vmem:[#allocation7 + $0x2e4] ss:$8 sps:$4 sm:$0xff]  }
 0x21e   : > { %v1874_v9 = vpack.c.bf16 %v1674_v3, %v1666_v45  ;;  %2783 = vmatprep.mubr.bf16.mxu1 %v5344_v50  ;;  %3140 = vmatpush1.bf16.msra.mxu0 %v4713_v22  ;;  %v1763_v3 = vmax.f32 %v1335_v57, 0.0 }
 0x21f   : > { %3141 = vmatprep.subr.bf16.mxu0 %v4718_v23  ;;  %v1337_v23 = vpop.f32.mrb[49].mxu0 }
 0x220   : > { %v1092_v19 = vpop.f32.mrb[92].mxu1  ;;  %3016 = vmatprep.mubr.bf16.mxu0 %v1874_v9  ;;  %v1764_v16 = vmax.f32 %v1337_v23, 0.0  ;;  %v1339_v2 = vpop.f32.mrb[50].mxu0 }
 0x221   : > { %v1094_v21 = vpop.f32.mrb[93].mxu1  ;;  %3017 = vmatmul.mubr.bf16.gmra.mrb[88].mxu0 %v1873_v12  ;;  %v1681_v45 = vmax.f32 %v1092_v19, 0.0  ;;  %v1771_v36 = vmax.f32 %v1339_v2, 0.0  ;;  %v1341_v12 = vpop.f32.mrb[51].mxu0 }
 0x222   : > { %v1096_v0 = vpop.f32.mrb[94].mxu1  ;;  %3142 = vmatpush1.bf16.msra.mxu0 %v4716_v38  ;;  %v1682_v46 = vmax.f32 %v1094_v21, 0.0  ;;  %v4722_v38 = vld [vmem:[#allocation7 + $0x2e0] ss:$8 sps:$4 sm:$0xff]   ;;  %v1772_v19 = vmax.f32 %v1341_v12, 0.0  ;;  %v1345_v23 = vpop.f32.mrb[52].mxu0 }
 0x223   : > { %v1689_v50 = vmax.f32 %v1096_v0, 0.0  ;;  %v1098_v22 = vpop.f32.mrb[95].mxu1  ;;  %3143 = vmatprep.subr.bf16.mxu0 %v4721_v40  ;;  %v4727_v0 = vld [vmem:[#allocation7 + $0x2f4] ss:$8 sps:$4 sm:$0xff]   ;;  %v5489_v40 = vpack.c.bf16 %v1771_v36, %v1763_v3 }
 0x224   : > { %v1690_v59 = vmax.f32 %v1098_v22, 0.0  ;;  %v5491_v21 = vpack.c.bf16 %v1772_v19, %v1764_v16 }
 0x225   : > { %v1881_v9 = vpack.c.bf16 %v1689_v50, %v1681_v45  ;;  %2784 = vmatmul.mubr.bf16.gmra.mrb[200].mxu1 %v5341_v49  ;;  %v4725_v49 = vld [vmem:[#allocation7 + $0x2f0] ss:$8 sps:$4 sm:$0xff]   ;;  %v4730_v50 = vld [vmem:[#allocation7 + $0x304] ss:$8 sps:$4 sm:$0xff]  }
 0x226   : > { %v1882_v31 = vpack.c.bf16 %v1690_v59, %v1682_v46  ;;  %2793 = vmatprep.mubr.bf16.mxu1 %v5350_v63  ;;  %3144 = vmatpush1.bf16.msra.mxu0 %v4719_v34  ;;  %v1779_v59 = vmax.f32 %v1345_v23, 0.0 }
 0x227   : > { %3145 = vmatprep.subr.bf16.mxu0 %v4724_v35  ;;  %v1347_v35 = vpop.f32.mrb[53].mxu0 }
 0x228   : > { %v1102_v57 = vpop.f32.mrb[96].mxu1  ;;  %3026 = vmatprep.mubr.bf16.mxu0 %v1882_v31  ;;  %v1780_v36 = vmax.f32 %v1347_v35, 0.0  ;;  %v1349_v12 = vpop.f32.mrb[54].mxu0 }
 0x229   : > { %v1104_v22 = vpop.f32.mrb[97].mxu1  ;;  %3027 = vmatmul.mubr.bf16.gmra.mrb[92].mxu0 %v1881_v9  ;;  %v1697_v46 = vmax.f32 %v1102_v57, 0.0  ;;  %v1787_v16 = vmax.f32 %v1349_v12, 0.0  ;;  %v1351_v9 = vpop.f32.mrb[55].mxu0 }
 0x22a   : > { %v1106_v45 = vpop.f32.mrb[98].mxu1  ;;  %3146 = vmatpush1.bf16.msra.mxu0 %v4722_v38  ;;  %v1698_v2 = vmax.f32 %v1104_v22, 0.0  ;;  %v1788_v38 = vmax.f32 %v1351_v9, 0.0 }
 0x22b   : > { %v1705_v63 = vmax.f32 %v1106_v45, 0.0  ;;  %v1108_v34 = vpop.f32.mrb[99].mxu1  ;;  %3147 = vmatprep.subr.bf16.mxu0 %v4727_v0  ;;  %v5495_v57 = vpack.c.bf16 %v1787_v16, %v1779_v59 }
 0x22c   : > { %v1706_v3 = vmax.f32 %v1108_v34, 0.0  ;;  %v5497_v45 = vpack.c.bf16 %v1788_v38, %v1780_v36 }
 0x22d   : > { %v1889_v31 = vpack.c.bf16 %v1705_v63, %v1697_v46  ;;  %2794 = vmatmul.mubr.bf16.gmra.mrb[204].mxu1 %v5347_v62  ;;  %v1355_v46 = vpop.f32.mrb[56].mxu0 }
 0x22e   : > { %v1890_v19 = vpack.c.bf16 %v1706_v3, %v1698_v2  ;;  %2803 = vmatprep.mubr.bf16.mxu1 %v5356_v14  ;;  %3148 = vmatpush1.bf16.msra.mxu0 %v4725_v49  ;;  %v1795_v35 = vmax.f32 %v1355_v46, 0.0  ;;  %v1357_v2 = vpop.f32.mrb[57].mxu0 }
 0x22f   : > { %3310 = vmatprep.subr.bf16.mxu0 %v4730_v50  ;;  %v1796_v49 = vmax.f32 %v1357_v2, 0.0  ;;  %v1359_v12 = vpop.f32.mrb[58].mxu0 }
 0x230   : > { %v1112_v0 = vpop.f32.mrb[100].mxu1  ;;  %3036 = vmatprep.mubr.bf16.mxu0 %v1890_v19  ;;  %v1803_v59 = vmax.f32 %v1359_v12, 0.0  ;;  %v1361_v16 = vpop.f32.mrb[59].mxu0 }
 0x231   : > { %v1114_v22 = vpop.f32.mrb[101].mxu1  ;;  %3037 = vmatmul.mubr.bf16.gmra.mrb[96].mxu0 %v1889_v31  ;;  %v1713_v63 = vmax.f32 %v1112_v0, 0.0  ;;  %v1804_v31 = vmax.f32 %v1361_v16, 0.0 }
 0x232   : > { %v1116_v23 = vpop.f32.mrb[102].mxu1  ;;  %v1714_v3 = vmax.f32 %v1114_v22, 0.0  ;;  %v5501_v9 = vpack.c.bf16 %v1803_v59, %v1795_v35 }
 0x233   : > { %v1721_v62 = vmax.f32 %v1116_v23, 0.0  ;;  %v1118_v34 = vpop.f32.mrb[103].mxu1  ;;  %v5503_v38 = vpack.c.bf16 %v1804_v31, %v1796_v49  ;;  %v1365_v23 = vpop.f32.mrb[60].mxu0 }
 0x234   : > { %v1722_v14 = vmax.f32 %v1118_v34, 0.0  ;;  %v1367_v34 = vpop.f32.mrb[61].mxu0 }
 0x235   : > { %v1897_v50 = vpack.c.bf16 %v1721_v62, %v1713_v63  ;;  %2804 = vmatmul.mubr.bf16.gmra.mrb[208].mxu1 %v5353_v13  ;;  %v1811_v13 = vmax.f32 %v1365_v23, 0.0 }
 0x236   : > { %v1898_v36 = vpack.c.bf16 %v1722_v14, %v1714_v3  ;;  %2813 = vmatprep.mubr.bf16.mxu1 %v5362_v29  ;;  %v1812_v14 = vmax.f32 %v1367_v34, 0.0  ;;  %v1369_v29 = vpop.f32.mrb[62].mxu0 }
 0x237   : > { %v1819_v35 = vmax.f32 %v1369_v29, 0.0  ;;  %v1371_v59 = vpop.f32.mrb[63].mxu0 }
 0x238   : > { %v1122_v19 = vpop.f32.mrb[104].mxu1  ;;  %3046 = vmatprep.mubr.bf16.mxu0 %v1898_v36 }
 0x239   : > { %v1124_v0 = vpop.f32.mrb[105].mxu1  ;;  %3047 = vmatmul.mubr.bf16.gmra.mrb[100].mxu0 %v1897_v50  ;;  %v1729_v46 = vmax.f32 %v1122_v19, 0.0  ;;  %v1820_v50 = vmax.f32 %v1371_v59, 0.0  ;;  %v5507_v16 = vpack.c.bf16 %v1819_v35, %v1811_v13 }
 0x23a   : > { %v1126_v22 = vpop.f32.mrb[106].mxu1  ;;  %v1730_v2 = vmax.f32 %v1124_v0, 0.0 }
 0x23b   : > { %v1737_v63 = vmax.f32 %v1126_v22, 0.0  ;;  %v1128_v62 = vpop.f32.mrb[107].mxu1  ;;  %v5509_v31 = vpack.c.bf16 %v1820_v50, %v1812_v14 }
 0x23c   : > { %v1738_v3 = vmax.f32 %v1128_v62, 0.0 }
 0x23d   : > { %v1905_v12 = vpack.c.bf16 %v1737_v63, %v1729_v46  ;;  %2814 = vmatmul.mubr.bf16.gmra.mrb[212].mxu1 %v5359_v28 }
 0x23e   : > { %v1906_v49 = vpack.c.bf16 %v1738_v3, %v1730_v2  ;;  %2823 = vmatprep.mubr.bf16.mxu1 %v5368_v47 }
 0x240   : > { %v1132_v36 = vpop.f32.mrb[108].mxu1  ;;  %3056 = vmatprep.mubr.bf16.mxu0 %v1906_v49 }
 0x241   : > { %v1134_v19 = vpop.f32.mrb[109].mxu1  ;;  %3057 = vmatmul.mubr.bf16.gmra.mrb[104].mxu0 %v1905_v12  ;;  %v1745_v22 = vmax.f32 %v1132_v36, 0.0 }
 0x242   : > { %v1136_v0 = vpop.f32.mrb[110].mxu1  ;;  %v1746_v63 = vmax.f32 %v1134_v19, 0.0 }
 0x243   : > { %v1753_v23 = vmax.f32 %v1136_v0, 0.0  ;;  %v1138_v46 = vpop.f32.mrb[111].mxu1 }
 0x244   : > { %v1754_v28 = vmax.f32 %v1138_v46, 0.0 }
 0x245   : > { %v1913_v62 = vpack.c.bf16 %v1753_v23, %v1745_v22  ;;  %2824 = vmatmul.mubr.bf16.gmra.mrb[216].mxu1 %v5365_v44 }
 0x246   : > { %v1914_v34 = vpack.c.bf16 %v1754_v28, %v1746_v63  ;;  %2833 = vmatprep.mubr.bf16.mxu1 %v5374_v5 }
 0x248   : > { %v1142_v47 = vpop.f32.mrb[112].mxu1  ;;  %3066 = vmatprep.mubr.bf16.mxu0 %v1914_v34 }
 0x249   : > { %v1144_v13 = vpop.f32.mrb[113].mxu1  ;;  %3067 = vmatmul.mubr.bf16.gmra.mrb[108].mxu0 %v1913_v62  ;;  %v1761_v3 = vmax.f32 %v1142_v47, 0.0 }
 0x24a   : > { %v1146_v2 = vpop.f32.mrb[114].mxu1  ;;  %v1762_v12 = vmax.f32 %v1144_v13, 0.0 }
 0x24b   : > { %v1769_v14 = vmax.f32 %v1146_v2, 0.0  ;;  %v1148_v29 = vpop.f32.mrb[115].mxu1 }
 0x24c   : > { %v1770_v35 = vmax.f32 %v1148_v29, 0.0 }
 0x24d   : > { %v1921_v59 = vpack.c.bf16 %v1769_v14, %v1761_v3  ;;  %2834 = vmatmul.mubr.bf16.gmra.mrb[220].mxu1 %v5371_v4 }
 0x24e   : > { %v1922_v49 = vpack.c.bf16 %v1770_v35, %v1762_v12  ;;  %2843 = vmatprep.mubr.bf16.mxu1 %v5380_v26 }
 0x250   : > { %v1152_v44 = vpop.f32.mrb[116].mxu1  ;;  %3076 = vmatprep.mubr.bf16.mxu0 %v1922_v49 }
 0x251   : > { %v1154_v50 = vpop.f32.mrb[117].mxu1  ;;  %3077 = vmatmul.mubr.bf16.gmra.mrb[112].mxu0 %v1921_v59  ;;  %v1777_v36 = vmax.f32 %v1152_v44, 0.0 }
 0x252   : > { %v1156_v5 = vpop.f32.mrb[118].mxu1  ;;  %v1778_v22 = vmax.f32 %v1154_v50, 0.0 }
 0x253   : > { %v1785_v19 = vmax.f32 %v1156_v5, 0.0  ;;  %v1158_v0 = vpop.f32.mrb[119].mxu1 }
 0x254   : > { %v1786_v23 = vmax.f32 %v1158_v0, 0.0 }
 0x255   : > { %v1929_v46 = vpack.c.bf16 %v1785_v19, %v1777_v36  ;;  %2844 = vmatmul.mubr.bf16.gmra.mrb[224].mxu1 %v5377_v25 }
 0x256   : > { %v1930_v63 = vpack.c.bf16 %v1786_v23, %v1778_v22  ;;  %2853 = vmatprep.mubr.bf16.mxu1 %v5386_v48 }
 0x258   : > { %v1162_v4 = vpop.f32.mrb[120].mxu1  ;;  %3086 = vmatprep.mubr.bf16.mxu0 %v1930_v63 }
 0x259   : > { %v1164_v28 = vpop.f32.mrb[121].mxu1  ;;  %3087 = vmatmul.mubr.bf16.gmra.mrb[116].mxu0 %v1929_v46  ;;  %v1793_v62 = vmax.f32 %v1162_v4, 0.0  ;;  %v4733_v4 = vld [vmem:[#allocation7 + $0x314] ss:$8 sps:$4 sm:$0xff]  }
 0x25a   : > { %v1166_v26 = vpop.f32.mrb[122].mxu1  ;;  %v1794_v13 = vmax.f32 %v1164_v28, 0.0 }
 0x25b   : > { %v1801_v34 = vmax.f32 %v1166_v26, 0.0  ;;  %v1168_v47 = vpop.f32.mrb[123].mxu1 }
 0x25c   : > { %v1802_v2 = vmax.f32 %v1168_v47, 0.0 }
 0x25d   : > { %v1937_v3 = vpack.c.bf16 %v1801_v34, %v1793_v62  ;;  %2854 = vmatmul.mubr.bf16.gmra.mrb[228].mxu1 %v5383_v37  ;;  %v4731_v62 = vld [vmem:[#allocation7 + $0x310] ss:$8 sps:$4 sm:$0xff]  }
 0x25e   : > { %v1938_v14 = vpack.c.bf16 %v1802_v2, %v1794_v13  ;;  %2863 = vmatprep.mubr.bf16.mxu1 %v5392_v11 }
 0x260   : > { %v1172_v25 = vpop.f32.mrb[124].mxu1  ;;  %3096 = vmatprep.mubr.bf16.mxu0 %v1938_v14 }
 0x261   : > { %v1174_v29 = vpop.f32.mrb[125].mxu1  ;;  %3097 = vmatmul.mubr.bf16.gmra.mrb[120].mxu0 %v1937_v3  ;;  %v1809_v12 = vmax.f32 %v1172_v25, 0.0 }
 0x262   : > { %v1176_v48 = vpop.f32.mrb[126].mxu1  ;;  %v1810_v49 = vmax.f32 %v1174_v29, 0.0 }
 0x263   : > { %v1817_v35 = vmax.f32 %v1176_v48, 0.0  ;;  %v1178_v59 = vpop.f32.mrb[127].mxu1 }
 0x264   : > { %v1818_v44 = vmax.f32 %v1178_v59, 0.0  ;;  %v4742_v59 = vld [vmem:[#allocation7 + $0x344] ss:$8 sps:$4 sm:$0xff]  }
 0x265   : > { %v1945_v50 = vpack.c.bf16 %v1817_v35, %v1809_v12  ;;  %2864 = vmatmul.mubr.bf16.gmra.mrb[232].mxu1 %v5389_v10  ;;  %v4728_v10 = vld [vmem:[#allocation7 + $0x300] ss:$8 sps:$4 sm:$0xff]   ;;  %v4737_v12 = vld [vmem:[#allocation7 + $0x330] ss:$8 sps:$4 sm:$0xff]  }
 0x266   : > { %v1946_v5 = vpack.c.bf16 %v1818_v44, %v1810_v49  ;;  %2873 = vmatprep.mubr.bf16.mxu1 %v5398_v42 }
 0x268   : > { %3106 = vmatprep.mubr.bf16.mxu0 %v1946_v5  ;;  %v1408_v37 = vpop.f32.mrb[128].mxu1 }
 0x269   : > { %3107 = vmatmul.mubr.bf16.gmra.mrb[124].mxu0 %v1945_v50  ;;  %v1573_v11 = vmax.f32 %v1408_v37, 0.0  ;;  %v1410_v36 = vpop.f32.mrb[129].mxu1 }
 0x26a   : > { %3149 = vmatprep.mubr.bf16.mxu0 %v5403_v56  ;;  %v1574_v19 = vmax.f32 %v1410_v36, 0.0  ;;  %v1412_v0 = vpop.f32.mrb[130].mxu1 }
 0x26b   : > { %v1581_v22 = vmax.f32 %v1412_v0, 0.0  ;;  %v1414_v23 = vpop.f32.mrb[131].mxu1 }
 0x26c   : > { %v1582_v46 = vmax.f32 %v1414_v23, 0.0 }
 0x26d   : > { %2874 = vmatmul.mubr.bf16.gmra.mrb[236].mxu1 %v5395_v33  ;;  %v5523_v63 = vpack.c.bf16 %v1581_v22, %v1573_v11  ;;  %v4736_v33 = vld [vmem:[#allocation7 + $0x324] ss:$8 sps:$4 sm:$0xff]  }
 0x26e   : > { %2883 = vmatprep.mubr.bf16.mxu1 %v5408_v20  ;;  %v5526_v42 = vpack.c.bf16 %v1582_v46, %v1574_v19  ;;  %v4743_v19 = vld [vmem:[#allocation7 + $0x350] ss:$8 sps:$4 sm:$0xff]   ;;  %v4748_v22 = vld [vmem:[#allocation7 + $0x364] ss:$8 sps:$4 sm:$0xff]  }
 0x270   : > { %v1418_v28 = vpop.f32.mrb[132].mxu1 }
 0x271   : > { %3150 = vmatmul.mubr.bf16.vlgmr.msra.gmra.mrb[64].mxu0 %v5401_v52  ;;  %v1589_v26 = vmax.f32 %v1418_v28, 0.0  ;;  %v1420_v56 = vpop.f32.mrb[133].mxu1  ;;  %v4734_v52 = vld [vmem:[#allocation7 + $0x320] ss:$8 sps:$4 sm:$0xff]  }
 0x272   : > { %3159 = vmatprep.mubr.bf16.mxu0 %v5413_v32  ;;  %3311 = vmatpush1.bf16.msra.mxu0 %v4728_v10  ;;  %v1590_v34 = vmax.f32 %v1420_v56, 0.0  ;;  %v1422_v47 = vpop.f32.mrb[134].mxu1  ;;  %v4739_v32 = vld [vmem:[#allocation7 + $0x334] ss:$8 sps:$4 sm:$0xff]  }
 0x273   : > { %3312 = vmatprep.subr.bf16.mxu0 %v4733_v4  ;;  %v1597_v13 = vmax.f32 %v1422_v47, 0.0  ;;  %v1424_v2 = vpop.f32.mrb[135].mxu1  ;;  %v4754_v47 = vld [vmem:[#allocation7 + $0x384] ss:$8 sps:$4 sm:$0xff]  }
 0x274   : > { %v1598_v20 = vmax.f32 %v1424_v2, 0.0 }
 0x275   : > { %2884 = vmatmul.mubr.bf16.gmra.mrb[240].mxu1 %v5405_v15  ;;  %v5531_v3 = vpack.c.bf16 %v1597_v13, %v1589_v26 }
 0x276   : > { %2893 = vmatprep.mubr.bf16.mxu1 %v5418_v60  ;;  %3313 = vmatpush1.bf16.msra.mxu0 %v4731_v62  ;;  %v5534_v14 = vpack.c.bf16 %v1598_v20, %v1590_v34  ;;  %v4749_v62 = vld [vmem:[#allocation7 + $0x370] ss:$8 sps:$4 sm:$0xff]   ;;  %v4752_v20 = vld [vmem:[#allocation7 + $0x380] ss:$8 sps:$4 sm:$0xff]  }
 0x277   : > { %3314 = vmatprep.subr.bf16.mxu0 %v4736_v33 }
 0x278   : > { %v1428_v25 = vpop.f32.mrb[136].mxu1 }
 0x279   : > { %3160 = vmatmul.mubr.bf16.gmra.mrb[68].mxu0 %v5411_v30  ;;  %v1605_v29 = vmax.f32 %v1428_v25, 0.0  ;;  %v1430_v48 = vpop.f32.mrb[137].mxu1  ;;  %v4740_v30 = vld [vmem:[#allocation7 + $0x340] ss:$8 sps:$4 sm:$0xff]  }
 0x27a   : > { %3169 = vmatprep.mubr.bf16.mxu0 %v5423_v58  ;;  %3315 = vmatpush1.bf16.msra.mxu0 %v4734_v52  ;;  %v1606_v15 = vmax.f32 %v1430_v48, 0.0  ;;  %v1432_v35 = vpop.f32.mrb[138].mxu1  ;;  %v4745_v58 = vld [vmem:[#allocation7 + $0x354] ss:$8 sps:$4 sm:$0xff]  }
 0x27b   : > { %3316 = vmatprep.subr.bf16.mxu0 %v4739_v32  ;;  %v1613_v60 = vmax.f32 %v1432_v35, 0.0  ;;  %v1434_v49 = vpop.f32.mrb[139].mxu1  ;;  %v4757_v52 = vld [vmem:[#allocation7 + $0x394] ss:$8 sps:$4 sm:$0xff]   ;;  %v6044_v32 = vld [vmem:[#allocation12_spill] sm:$0xff] }
 0x27c   : > { %v1614_v44 = vmax.f32 %v1434_v49, 0.0  ;;  %v6045_v48 = vld [vmem:[#allocation14_spill] sm:$0xff] }
 0x27d   : > { %2894 = vmatmul.mubr.bf16.gmra.mrb[244].mxu1 %v5415_v53  ;;  %v5539_v50 = vpack.c.bf16 %v1613_v60, %v1605_v29  ;;  %v4760_v60 = vld [vmem:[#allocation7 + $0x3a4] ss:$8 sps:$4 sm:$0xff]  }
 0x27e   : > { %2903 = vmatprep.mubr.bf16.mxu1 %v5428_v39  ;;  %3317 = vmatpush1.bf16.msra.mxu0 %v4737_v12  ;;  %v5542_v5 = vpack.c.bf16 %v1614_v44, %v1606_v15  ;;  %v4755_v12 = vld [vmem:[#allocation7 + $0x390] ss:$8 sps:$4 sm:$0xff]  }
 0x27f   : > { %3318 = vmatprep.subr.bf16.mxu0 %v4742_v59 }
 0x280   : > { %v1438_v37 = vpop.f32.mrb[140].mxu1 }
 0x281   : > { %3170 = vmatmul.mubr.bf16.gmra.mrb[72].mxu0 %v5421_v6  ;;  %v1621_v11 = vmax.f32 %v1438_v37, 0.0  ;;  %v1440_v36 = vpop.f32.mrb[141].mxu1  ;;  %v4746_v6 = vld [vmem:[#allocation7 + $0x360] ss:$8 sps:$4 sm:$0xff]   ;;  %v4763_v37 = vld [vmem:[#allocation7 + $0x3b4] ss:$8 sps:$4 sm:$0xff]  }
 0x282   : > { %3179 = vmatprep.mubr.bf16.mxu0 %v5433_v8  ;;  %3319 = vmatpush1.bf16.msra.mxu0 %v4740_v30  ;;  %v1622_v53 = vmax.f32 %v1440_v36, 0.0  ;;  %v1442_v0 = vpop.f32.mrb[142].mxu1  ;;  %v4751_v8 = vld [vmem:[#allocation7 + $0x374] ss:$8 sps:$4 sm:$0xff]   ;;  %v6046_v36 = vld [vmem:[#allocation13_spill] sm:$0xff] }
 0x283   : > { %3320 = vmatprep.subr.bf16.mxu0 %v4745_v58  ;;  %v1629_v39 = vmax.f32 %v1442_v0, 0.0  ;;  %v1444_v23 = vpop.f32.mrb[143].mxu1  ;;  %v4758_v58 = vld [vmem:[#allocation7 + $0x3a0] ss:$8 sps:$4 sm:$0xff]  }
 0x284   : > { %v1630_v46 = vmax.f32 %v1444_v23, 0.0  ;;  %v6047_v0 = vld [vmem:[#allocation16_spill] sm:$0xff]  ;;  %v4761_v23 = vld [vmem:[#allocation7 + $0x3b0] ss:$8 sps:$4 sm:$0xff]  }
 0x285   : > { %2904 = vmatmul.mubr.bf16.gmra.mrb[248].mxu1 %v5425_v7  ;;  %v5547_v10 = vpack.c.bf16 %v1629_v39, %v1621_v11 }
 0x286   : > { %2913 = vmatprep.mubr.bf16.mxu1 %v5438_v24  ;;  %3321 = vmatpush1.bf16.msra.mxu0 %v4743_v19  ;;  %v5550_v4 = vpack.c.bf16 %v1630_v46, %v1622_v53 }
 0x287   : > { %3322 = vmatprep.subr.bf16.mxu0 %v4748_v22 }
 0x288   : > { %v1448_v28 = vpop.f32.mrb[144].mxu1 }
 0x289   : > { %3180 = vmatmul.mubr.bf16.gmra.mrb[76].mxu0 %v5431_v51  ;;  %v1637_v26 = vmax.f32 %v1448_v28, 0.0  ;;  %v1450_v56 = vpop.f32.mrb[145].mxu1 }
 0x28a   : > { %3189 = vmatprep.mubr.bf16.mxu0 %v5443_v41  ;;  %3323 = vmatpush1.bf16.msra.mxu0 %v4746_v6  ;;  %v1638_v7 = vmax.f32 %v1450_v56, 0.0  ;;  %v1452_v34 = vpop.f32.mrb[146].mxu1 }
 0x28b   : > { %3324 = vmatprep.subr.bf16.mxu0 %v4751_v8  ;;  %v1645_v24 = vmax.f32 %v1452_v34, 0.0  ;;  %v1454_v33 = vpop.f32.mrb[147].mxu1  ;;  %v4766_v8 = vld [vmem:[#allocation7 + $0x3c4] ss:$8 sps:$4 sm:$0xff]  }
 0x28c   : > { %v1646_v13 = vmax.f32 %v1454_v33, 0.0 }
 0x28d   : > { %2914 = vmatmul.mubr.bf16.gmra.mrb[252].mxu1 %v5435_v17  ;;  %v5555_v2 = vpack.c.bf16 %v1645_v24, %v1637_v26 }
 0x28e   : > { %3325 = vmatpush1.bf16.msra.mxu0 %v4749_v62  ;;  %v5557_v51 = vpack.c.bf16 %v1646_v13, %v1638_v7  ;;  %v4764_v62 = vld [vmem:[#allocation7 + $0x3c0] ss:$8 sps:$4 sm:$0xff]   ;;  %v4769_v7 = vld [vmem:[#allocation7 + $0x3d4] ss:$8 sps:$4 sm:$0xff]  }
 0x28f   : > { %3326 = vmatprep.subr.bf16.mxu0 %v4754_v47  ;;  %v6048_v47 = vld [vmem:[#allocation15_spill] sm:$0xff]  ;;  %v6049_v13 = vld [vmem:[#allocation18_spill] sm:$0xff] }
 0x290   : > { %v1458_v41 = vpop.f32.mrb[148].mxu1 }
 0x291   : > { %3190 = vmatmul.mubr.bf16.gmra.mrb[80].mxu0 %v6044_v32  ;;  %v1653_v25 = vmax.f32 %v1458_v41, 0.0  ;;  %v1460_v29 = vpop.f32.mrb[149].mxu1  ;;  %v4767_v41 = vld [vmem:[#allocation7 + $0x3d0] ss:$8 sps:$4 sm:$0xff]  }
 0x292   : > { %3199 = vmatprep.mubr.bf16.mxu0 %v6045_v48  ;;  %3327 = vmatpush1.bf16.msra.mxu0 %v4752_v20  ;;  %v1654_v15 = vmax.f32 %v1460_v29, 0.0  ;;  %v1462_v35 = vpop.f32.mrb[150].mxu1  ;;  %v4772_v29 = vld [vmem:[#allocation7 + $0x3e4] ss:$8 sps:$4 sm:$0xff]  }
 0x293   : > { %3328 = vmatprep.subr.bf16.mxu0 %v4757_v52  ;;  %v1661_v17 = vmax.f32 %v1462_v35, 0.0  ;;  %v1464_v59 = vpop.f32.mrb[151].mxu1  ;;  %v4770_v35 = vld [vmem:[#allocation7 + $0x3e0] ss:$8 sps:$4 sm:$0xff]  }
 0x294   : > { %v1662_v49 = vmax.f32 %v1464_v59, 0.0 }
 0x295   : > { %v5561_v44 = vpack.c.bf16 %v1661_v17, %v1653_v25  ;;  %v4775_v17 = vld [vmem:[#allocation7 + $0x3f4] ss:$8 sps:$4 sm:$0xff]  }
 0x296   : > { %3329 = vmatpush1.bf16.msra.mxu0 %v4755_v12  ;;  %v5563_v30 = vpack.c.bf16 %v1662_v49, %v1654_v15 }
 0x297   : > { %3330 = vmatprep.subr.bf16.mxu0 %v4760_v60  ;;  %v6050_v60 = vld [vmem:[#allocation17_spill] sm:$0xff] }
 0x298   : > { %v1468_v11 = vpop.f32.mrb[152].mxu1 }
 0x299   : > { %3200 = vmatmul.mubr.bf16.gmra.mrb[84].mxu0 %v6046_v36  ;;  %v1669_v19 = vmax.f32 %v1468_v11, 0.0  ;;  %v1470_v53 = vpop.f32.mrb[153].mxu1  ;;  %v4773_v36 = vld [vmem:[#allocation7 + $0x3f0] ss:$8 sps:$4 sm:$0xff]  }
 0x29a   : > { %3209 = vmatprep.mubr.bf16.mxu0 %v6047_v0  ;;  %v1670_v22 = vmax.f32 %v1470_v53, 0.0  ;;  %v1472_v39 = vpop.f32.mrb[154].mxu1  ;;  %3331 = vmatpush1.bf16.msra.mxu0 %v4758_v58 }
 0x29b   : > { %v1677_v46 = vmax.f32 %v1472_v39, 0.0  ;;  %v1474_v6 = vpop.f32.mrb[155].mxu1  ;;  %3332 = vmatprep.subr.bf16.mxu0 %v4763_v37 }
 0x29c   : > { %v1678_v28 = vmax.f32 %v1474_v6, 0.0 }
 0x29d   : > { %v5567_v26 = vpack.c.bf16 %v1677_v46, %v1669_v19  ;;  %v6051_v46 = vld [vmem:[#allocation19_spill] sm:$0xff] }
 0x29e   : > { %v5569_v56 = vpack.c.bf16 %v1678_v28, %v1670_v22  ;;  %3333 = vmatpush1.bf16.msra.mxu0 %v4761_v23 }
 0x29f   : > { %3334 = vmatprep.subr.bf16.mxu0 %v4766_v8 }
 0x2a0   : > { %v1478_v34 = vpop.f32.mrb[156].mxu1 }
 0x2a1   : > { %3210 = vmatmul.mubr.bf16.gmra.mrb[88].mxu0 %v6048_v47  ;;  %v1685_v24 = vmax.f32 %v1478_v34, 0.0  ;;  %v1480_v33 = vpop.f32.mrb[157].mxu1 }
 0x2a2   : > { %3219 = vmatprep.mubr.bf16.mxu0 %v6049_v13  ;;  %v1686_v20 = vmax.f32 %v1480_v33, 0.0  ;;  %v1482_v52 = vpop.f32.mrb[158].mxu1  ;;  %3335 = vmatpush1.bf16.msra.mxu0 %v4764_v62 }
 0x2a3   : > { %v1693_v32 = vmax.f32 %v1482_v52, 0.0  ;;  %v1484_v25 = vpop.f32.mrb[159].mxu1  ;;  %3336 = vmatprep.subr.bf16.mxu0 %v4769_v7 }
 0x2a4   : > { %v1694_v48 = vmax.f32 %v1484_v25, 0.0 }
 0x2a5   : > { %v5573_v12 = vpack.c.bf16 %v1693_v32, %v1685_v24 }
 0x2a6   : > { %v5575_v15 = vpack.c.bf16 %v1694_v48, %v1686_v20  ;;  %3337 = vmatpush1.bf16.msra.mxu0 %v4767_v41 }
 0x2a7   : > { %3338 = vmatprep.subr.bf16.mxu0 %v4772_v29 }
 0x2a8   : > { %v1488_v59 = vpop.f32.mrb[160].mxu1 }
 0x2a9   : > { %3220 = vmatmul.mubr.bf16.gmra.mrb[92].mxu0 %v6050_v60  ;;  %v1701_v49 = vmax.f32 %v1488_v59, 0.0  ;;  %v1490_v58 = vpop.f32.mrb[161].mxu1 }
 0x2aa   : > { %3229 = vmatprep.mubr.bf16.mxu0 %v5467_v55  ;;  %v1702_v37 = vmax.f32 %v1490_v58, 0.0  ;;  %v1492_v11 = vpop.f32.mrb[162].mxu1  ;;  %3339 = vmatpush1.bf16.msra.mxu0 %v4770_v35 }
 0x2ab   : > { %v1709_v19 = vmax.f32 %v1492_v11, 0.0  ;;  %v1494_v53 = vpop.f32.mrb[163].mxu1  ;;  %3340 = vmatprep.subr.bf16.mxu0 %v4775_v17 }
 0x2ac   : > { %v1710_v0 = vmax.f32 %v1494_v53, 0.0 }
 0x2ad   : > { %v5579_v22 = vpack.c.bf16 %v1709_v19, %v1701_v49 }
 0x2ae   : > { %v5581_v39 = vpack.c.bf16 %v1710_v0, %v1702_v37  ;;  %3341 = vmatpush1.bf16.msra.mxu0 %v4773_v36 }
 0x2b0   : > { %v1498_v23 = vpop.f32.mrb[164].mxu1 }
 0x2b1   : > { %3230 = vmatmul.mubr.bf16.gmra.mrb[96].mxu0 %v6051_v46  ;;  %v1717_v6 = vmax.f32 %v1498_v23, 0.0  ;;  %v1500_v8 = vpop.f32.mrb[165].mxu1 }
 0x2b2   : > { %3239 = vmatprep.mubr.bf16.mxu0 %v5473_v1  ;;  %v1718_v55 = vmax.f32 %v1500_v8, 0.0  ;;  %v1502_v28 = vpop.f32.mrb[166].mxu1 }
 0x2b3   : > { %v1725_v62 = vmax.f32 %v1502_v28, 0.0  ;;  %v1504_v7 = vpop.f32.mrb[167].mxu1 }
 0x2b4   : > { %v1726_v34 = vmax.f32 %v1504_v7, 0.0 }
 0x2b5   : > { %v5585_v47 = vpack.c.bf16 %v1725_v62, %v1717_v6 }
 0x2b6   : > { %v5587_v24 = vpack.c.bf16 %v1726_v34, %v1718_v55 }
 0x2b8   : > { %v1508_v33 = vpop.f32.mrb[168].mxu1 }
 0x2b9   : > { %3240 = vmatmul.mubr.bf16.gmra.mrb[100].mxu0 %v5471_v54  ;;  %v1733_v13 = vmax.f32 %v1508_v33, 0.0  ;;  %v1510_v20 = vpop.f32.mrb[169].mxu1 }
 0x2ba   : > { %3249 = vmatprep.mubr.bf16.mxu0 %v5479_v43  ;;  %v1734_v52 = vmax.f32 %v1510_v20, 0.0  ;;  %v1512_v41 = vpop.f32.mrb[170].mxu1 }
 0x2bb   : > { %v1741_v32 = vmax.f32 %v1512_v41, 0.0  ;;  %v1514_v1 = vpop.f32.mrb[171].mxu1 }
 0x2bc   : > { %v1742_v25 = vmax.f32 %v1514_v1, 0.0 }
 0x2bd   : > { %v5591_v29 = vpack.c.bf16 %v1741_v32, %v1733_v13 }
 0x2be   : > { %v5593_v48 = vpack.c.bf16 %v1742_v25, %v1734_v52 }
 0x2c0   : > { %v1518_v35 = vpop.f32.mrb[172].mxu1 }
 0x2c1   : > { %3250 = vmatmul.mubr.bf16.gmra.mrb[104].mxu0 %v5477_v18  ;;  %v1749_v17 = vmax.f32 %v1518_v35, 0.0  ;;  %v1520_v59 = vpop.f32.mrb[173].mxu1 }
 0x2c2   : > { %3259 = vmatprep.mubr.bf16.mxu0 %v5485_v27  ;;  %v1750_v54 = vmax.f32 %v1520_v59, 0.0  ;;  %v1522_v60 = vpop.f32.mrb[174].mxu1 }
 0x2c3   : > { %v1757_v49 = vmax.f32 %v1522_v60, 0.0  ;;  %v1524_v43 = vpop.f32.mrb[175].mxu1 }
 0x2c4   : > { %v1758_v58 = vmax.f32 %v1524_v43, 0.0 }
 0x2c5   : > { %v5597_v37 = vpack.c.bf16 %v1757_v49, %v1749_v17 }
 0x2c6   : > { %v5599_v11 = vpack.c.bf16 %v1758_v58, %v1750_v54 }
 0x2c8   : > { %v1528_v36 = vpop.f32.mrb[176].mxu1 }
 0x2c9   : > { %3260 = vmatmul.mubr.bf16.gmra.mrb[108].mxu0 %v5483_v61  ;;  %v1765_v19 = vmax.f32 %v1528_v36, 0.0  ;;  %v1530_v53 = vpop.f32.mrb[177].mxu1 }
 0x2ca   : > { %3269 = vmatprep.mubr.bf16.mxu0 %v5491_v21  ;;  %v1766_v18 = vmax.f32 %v1530_v53, 0.0  ;;  %v1532_v0 = vpop.f32.mrb[178].mxu1 }
 0x2cb   : > { %v1773_v23 = vmax.f32 %v1532_v0, 0.0  ;;  %v1534_v27 = vpop.f32.mrb[179].mxu1 }
 0x2cc   : > { %v1774_v46 = vmax.f32 %v1534_v27, 0.0 }
 0x2cd   : > { %v5603_v6 = vpack.c.bf16 %v1773_v23, %v1765_v19 }
 0x2ce   : > { %v5605_v8 = vpack.c.bf16 %v1774_v46, %v1766_v18 }
 0x2d0   : > { %v1538_v55 = vpop.f32.mrb[180].mxu1 }
 0x2d1   : > { %3270 = vmatmul.mubr.bf16.gmra.mrb[112].mxu0 %v5489_v40  ;;  %v1781_v28 = vmax.f32 %v1538_v55, 0.0  ;;  %v1540_v62 = vpop.f32.mrb[181].mxu1 }
 0x2d2   : > { %3279 = vmatprep.mubr.bf16.mxu0 %v5497_v45  ;;  %v1782_v61 = vmax.f32 %v1540_v62, 0.0  ;;  %v1542_v7 = vpop.f32.mrb[182].mxu1 }
 0x2d3   : > { %v1789_v34 = vmax.f32 %v1542_v7, 0.0  ;;  %v1544_v21 = vpop.f32.mrb[183].mxu1 }
 0x2d4   : > { %v1790_v33 = vmax.f32 %v1544_v21, 0.0 }
 0x2d5   : > { %v5609_v13 = vpack.c.bf16 %v1789_v34, %v1781_v28 }
 0x2d6   : > { %v5611_v20 = vpack.c.bf16 %v1790_v33, %v1782_v61 }
 0x2d8   : > { %v1548_v52 = vpop.f32.mrb[184].mxu1 }
 0x2d9   : > { %3280 = vmatmul.mubr.bf16.gmra.mrb[116].mxu0 %v5495_v57  ;;  %v1797_v41 = vmax.f32 %v1548_v52, 0.0  ;;  %v1550_v32 = vpop.f32.mrb[185].mxu1 }
 0x2da   : > { %3289 = vmatprep.mubr.bf16.mxu0 %v5503_v38  ;;  %v1798_v40 = vmax.f32 %v1550_v32, 0.0  ;;  %v1552_v1 = vpop.f32.mrb[186].mxu1 }
 0x2db   : > { %v1805_v25 = vmax.f32 %v1552_v1, 0.0  ;;  %v1554_v45 = vpop.f32.mrb[187].mxu1 }
 0x2dc   : > { %v1806_v35 = vmax.f32 %v1554_v45, 0.0 }
 0x2dd   : > { %v5615_v17 = vpack.c.bf16 %v1805_v25, %v1797_v41 }
 0x2de   : > { %v5617_v59 = vpack.c.bf16 %v1806_v35, %v1798_v40 }
 0x2e0   : > { %v1558_v54 = vpop.f32.mrb[188].mxu1 }
 0x2e1   : > { %3290 = vmatmul.mubr.bf16.gmra.mrb[120].mxu0 %v5501_v9  ;;  %v1813_v60 = vmax.f32 %v1558_v54, 0.0  ;;  %v1560_v49 = vpop.f32.mrb[189].mxu1 }
 0x2e2   : > { %3299 = vmatprep.mubr.bf16.mxu0 %v5509_v31  ;;  %v1814_v57 = vmax.f32 %v1560_v49, 0.0  ;;  %v1562_v43 = vpop.f32.mrb[190].mxu1 }
 0x2e3   : > { %v1821_v58 = vmax.f32 %v1562_v43, 0.0  ;;  %v1564_v38 = vpop.f32.mrb[191].mxu1 }
 0x2e4   : > { %v1822_v36 = vmax.f32 %v1564_v38, 0.0 }
 0x2e5   : > { %v5621_v19 = vpack.c.bf16 %v1821_v58, %v1813_v60 }
 0x2e6   : > { %v5623_v53 = vpack.c.bf16 %v1822_v36, %v1814_v57 }
 0x2e8   : > { %v5625_v18 = vpop.f32.mrb[192].mxu1 }
 0x2e9   : > { %v5627_v0 = vpop.f32.mrb[193].mxu1  ;;  %3300 = vmatmul.mubr.bf16.gmra.mrb[124].mxu0 %v5507_v16 }
 0x2ea   : > { %v5630_v9 = vpop.f32.mrb[194].mxu1  ;;  %3342 = vmatprep.mubr.bf16.mxu0 %v5526_v42 }
 0x2eb   : > { %v5633_v31 = vpop.f32.mrb[195].mxu1 }
 0x2f0   : > { %v5635_v23 = vpop.f32.mrb[196].mxu1 }
 0x2f1   : > { %v5637_v27 = vpop.f32.mrb[197].mxu1  ;;  %3343 = vmatmul.mubr.bf16.vlgmr.msra.gmra.mrb[64].mxu0 %v5523_v63 }
 0x2f2   : > { %v5640_v46 = vpop.f32.mrb[198].mxu1  ;;  %3352 = vmatprep.mubr.bf16.mxu0 %v5534_v14 }
 0x2f3   : > { %v5643_v55 = vpop.f32.mrb[199].mxu1 }
 0x2f8   : > { %v5645_v28 = vpop.f32.mrb[200].mxu1 }
 0x2f9   : > { %v5647_v16 = vpop.f32.mrb[201].mxu1  ;;  %3353 = vmatmul.mubr.bf16.gmra.mrb[68].mxu0 %v5531_v3 }
 0x2fa   : > { %v5650_v42 = vpop.f32.mrb[202].mxu1  ;;  %3362 = vmatprep.mubr.bf16.mxu0 %v5542_v5 }
 0x2fb   : > { %v5653_v62 = vpop.f32.mrb[203].mxu1 }
 0x300   : > { %v5655_v61 = vpop.f32.mrb[204].mxu1 }
 0x301   : > { %v5657_v63 = vpop.f32.mrb[205].mxu1  ;;  %3363 = vmatmul.mubr.bf16.gmra.mrb[72].mxu0 %v5539_v50 }
 0x302   : > { %v5660_v14 = vpop.f32.mrb[206].mxu1  ;;  %3372 = vmatprep.mubr.bf16.mxu0 %v5550_v4 }
 0x303   : > { %v5663_v7 = vpop.f32.mrb[207].mxu1 }
 0x308   : > { %v5665_v34 = vpop.f32.mrb[208].mxu1 }
 0x309   : > { %v5667_v3 = vpop.f32.mrb[209].mxu1  ;;  %3373 = vmatmul.mubr.bf16.gmra.mrb[76].mxu0 %v5547_v10 }
 0x30a   : > { %v5670_v5 = vpop.f32.mrb[210].mxu1  ;;  %3382 = vmatprep.mubr.bf16.mxu0 %v5557_v51 }
 0x30b   : > { %v5673_v21 = vpop.f32.mrb[211].mxu1 }
 0x310   : > { %v5675_v33 = vpop.f32.mrb[212].mxu1 }
 0x311   : > { %v5677_v50 = vpop.f32.mrb[213].mxu1  ;;  %3383 = vmatmul.mubr.bf16.gmra.mrb[80].mxu0 %v5555_v2 }
 0x312   : > { %v5680_v4 = vpop.f32.mrb[214].mxu1  ;;  %3392 = vmatprep.mubr.bf16.mxu0 %v5563_v30 }
 0x313   : > { %v5683_v52 = vpop.f32.mrb[215].mxu1 }
 0x318   : > { %v5685_v41 = vpop.f32.mrb[216].mxu1 }
 0x319   : > { %v5687_v10 = vpop.f32.mrb[217].mxu1  ;;  %3393 = vmatmul.mubr.bf16.gmra.mrb[84].mxu0 %v5561_v44 }
 0x31a   : > { %v5690_v51 = vpop.f32.mrb[218].mxu1  ;;  %3402 = vmatprep.mubr.bf16.mxu0 %v5569_v56 }
 0x31b   : > { %v5693_v32 = vpop.f32.mrb[219].mxu1 }
 0x320   : > { %v5695_v40 = vpop.f32.mrb[220].mxu1 }
 0x321   : > { %v5697_v2 = vpop.f32.mrb[221].mxu1  ;;  %3403 = vmatmul.mubr.bf16.gmra.mrb[88].mxu0 %v5567_v26 }
 0x322   : > { %v5700_v30 = vpop.f32.mrb[222].mxu1  ;;  %3412 = vmatprep.mubr.bf16.mxu0 %v5575_v15 }
 0x323   : > { %v5703_v1 = vpop.f32.mrb[223].mxu1 }
 0x328   : > { %v5705_v25 = vpop.f32.mrb[224].mxu1 }
 0x329   : > { %v5707_v44 = vpop.f32.mrb[225].mxu1  ;;  %3413 = vmatmul.mubr.bf16.gmra.mrb[92].mxu0 %v5573_v12 }
 0x32a   : > { %v5710_v56 = vpop.f32.mrb[226].mxu1  ;;  %3422 = vmatprep.mubr.bf16.mxu0 %v5581_v39 }
 0x32b   : > { %v5713_v45 = vpop.f32.mrb[227].mxu1 }
 0x330   : > { %v5715_v35 = vpop.f32.mrb[228].mxu1 }
 0x331   : > { %v5717_v26 = vpop.f32.mrb[229].mxu1  ;;  %3423 = vmatmul.mubr.bf16.gmra.mrb[96].mxu0 %v5579_v22 }
 0x332   : > { %v5720_v15 = vpop.f32.mrb[230].mxu1  ;;  %3432 = vmatprep.mubr.bf16.mxu0 %v5587_v24 }
 0x333   : > { %v5723_v54 = vpop.f32.mrb[231].mxu1 }
 0x338   : > { %v5725_v60 = vpop.f32.mrb[232].mxu1 }
 0x339   : > { %v5727_v12 = vpop.f32.mrb[233].mxu1  ;;  %3433 = vmatmul.mubr.bf16.gmra.mrb[100].mxu0 %v5585_v47 }
 0x33a   : > { %v5730_v39 = vpop.f32.mrb[234].mxu1  ;;  %3442 = vmatprep.mubr.bf16.mxu0 %v5593_v48 }
 0x33b   : > { %v5733_v49 = vpop.f32.mrb[235].mxu1 }
 0x340   : > { %v5735_v57 = vpop.f32.mrb[236].mxu1 }
 0x341   : > { %v5737_v22 = vpop.f32.mrb[237].mxu1  ;;  %3443 = vmatmul.mubr.bf16.gmra.mrb[104].mxu0 %v5591_v29 }
 0x342   : > { %v5740_v24 = vpop.f32.mrb[238].mxu1  ;;  %3452 = vmatprep.mubr.bf16.mxu0 %v5599_v11 }
 0x343   : > { %6052 = vst [vmem:[#allocation12_spill] sm:$0xff] %v5740_v24  ;;  %v5743_v43 = vpop.f32.mrb[239].mxu1 }
 0x344   : > { %6053 = vst [vmem:[#allocation14_spill] sm:$0xff] %v5743_v43 }
 0x348   : > { %v5745_v58 = vpop.f32.mrb[240].mxu1 }
 0x349   : > { %6054 = vst [vmem:[#allocation13_spill] sm:$0xff] %v5745_v58  ;;  %v5747_v47 = vpop.f32.mrb[241].mxu1  ;;  %3453 = vmatmul.mubr.bf16.gmra.mrb[108].mxu0 %v5597_v37 }
 0x34a   : > { %6055 = vst [vmem:[#allocation16_spill] sm:$0xff] %v5747_v47  ;;  %v5750_v48 = vpop.f32.mrb[242].mxu1  ;;  %3462 = vmatprep.mubr.bf16.mxu0 %v5605_v8 }
 0x34b   : > { %6056 = vst [vmem:[#allocation15_spill] sm:$0xff] %v5750_v48  ;;  %v5753_v38 = vpop.f32.mrb[243].mxu1 }
 0x34c   : > { %6057 = vst [vmem:[#allocation18_spill] sm:$0xff] %v5753_v38 }
 0x350   : > { %v5755_v36 = vpop.f32.mrb[244].mxu1 }
 0x351   : > { %6058 = vst [vmem:[#allocation17_spill] sm:$0xff] %v5755_v36  ;;  %v5757_v29 = vpop.f32.mrb[245].mxu1  ;;  %3463 = vmatmul.mubr.bf16.gmra.mrb[112].mxu0 %v5603_v6 }
 0x352   : > { %6059 = vst [vmem:[#allocation19_spill] sm:$0xff] %v5757_v29  ;;  %v5760_v11 = vpop.f32.mrb[246].mxu1  ;;  %3472 = vmatprep.mubr.bf16.mxu0 %v5611_v20 }
 0x353   : > { %6060 = vst [vmem:[#allocation20_spill] sm:$0xff] %v5760_v11  ;;  %v5763_v47 = vpop.f32.mrb[247].mxu1 }
 0x354   : > { %6061 = vst [vmem:[#allocation21_spill] sm:$0xff] %v5763_v47 }
 0x358   : > { %v5765_v37 = vpop.f32.mrb[248].mxu1 }
 0x359   : > { %6062 = vst [vmem:[#allocation22_spill] sm:$0xff] %v5765_v37  ;;  %v5767_v48 = vpop.f32.mrb[249].mxu1  ;;  %3473 = vmatmul.mubr.bf16.gmra.mrb[116].mxu0 %v5609_v13  ;;  %v2081_v13 = vlaneseq }
 0x35a   : > { %6063 = vst [vmem:[#allocation23_spill] sm:$0xff] %v5767_v48  ;;  %v5770_v8 = vpop.f32.mrb[250].mxu1  ;;  %3482 = vmatprep.mubr.bf16.mxu0 %v5617_v59 }
 0x35b   : > { %6064 = vst [vmem:[#allocation24_spill] sm:$0xff] %v5770_v8  ;;  %v5773_v29 = vpop.f32.mrb[251].mxu1  ;;  %v2082_v59 = vshrl.u32 %v2081_v13, 7 }
 0x35c   : > { %6065 = vst [vmem:[#allocation25_spill] sm:$0xff] %v5773_v29 }
 0x360   : > { %v5775_v6 = vpop.f32.mrb[252].mxu1 }
 0x361   : > { %6066 = vst [vmem:[#allocation26_spill] sm:$0xff] %v5775_v6  ;;  %v5777_v11 = vpop.f32.mrb[253].mxu1  ;;  %3483 = vmatmul.mubr.bf16.gmra.mrb[120].mxu0 %v5615_v17  ;;  %v2079_v17 = vld [vmem:[%s280_s14] sm:$0x3]  ;;  %v2087_v6 = vsub.s32 1, %v2082_v59 }
 0x362   : > { %6067 = vst [vmem:[#allocation27_spill] sm:$0xff] %v5777_v11  ;;  %v5780_v20 = vpop.f32.mrb[254].mxu1  ;;  %3492 = vmatprep.mubr.bf16.mxu0 %v5623_v53  ;;  %v2083_v11 = vsub.s32 0, %v2082_v59 }
 0x363   : > { %6068 = vst [vmem:[#allocation28_spill] sm:$0xff] %v5780_v20  ;;  %v5783_v37 = vpop.f32.mrb[255].mxu1  ;;  %v5793_v53 = vrot.slane %v2079_v17, %v2087_v6 }
 0x364   : > { %6069 = vst [vmem:[#allocation29_spill] sm:$0xff] %v5783_v37  ;;  %v5791_v20 = vrot.slane %v2079_v17, %v2083_v11 }
 0x365   : > { %v2768_v37 = vadd.f32 %v5627_v0, %v5793_v53  ;;  %v2772_v47 = vadd.f32 %v5633_v31, %v5793_v53 }
 0x366   : > { %v2770_v13 = vadd.f32 %v5630_v9, %v5791_v20  ;;  %v2776_v24 = vadd.f32 %v5635_v23, %v5791_v20  ;;  %v2778_v9 = vadd.f32 %v5637_v27, %v5793_v53 }
 0x369   : > { %3493 = vmatmul.mubr.bf16.gmra.mrb[124].mxu0 %v5621_v19  ;;  %v2766_v19 = vadd.f32 %v5625_v18, %v5791_v20 }
 0x3c4   : > { %v3344_v29 = vpop.f32.mrb[64].mxu0 }
 0x3c5   : > { %v4221_v8 = vadd.f32 %v3344_v29, %v2766_v19  ;;  %v3346_v48 = vpop.f32.mrb[65].mxu0  ;;  %v2780_v29 = vadd.f32 %v5640_v46, %v5791_v20  ;;  %v2786_v46 = vadd.f32 %v5645_v28, %v5791_v20 }
 0x3c6   : > { %v4223_v11 = vadd.f32 %v3346_v48, %v2768_v37  ;;  %v3348_v59 = vpop.f32.mrb[66].mxu0 }
 0x3c7   : > { %v3503_v6 = vmax.f32 %v4221_v8, 0.0  ;;  %v4225_v17 = vadd.f32 %v3348_v59, %v2770_v13  ;;  %v3350_v36 = vpop.f32.mrb[67].mxu0 }
 0x3c8   : > { %v3504_v38 = vmax.f32 %v4223_v11, 0.0  ;;  %v4227_v18 = vadd.f32 %v3350_v36, %v2772_v47  ;;  %v2782_v36 = vadd.f32 %v5643_v55, %v5793_v53 }
 0x3c9   : > { %v3505_v58 = vmax.f32 %v4225_v17, 0.0  ;;  %v2790_v17 = vadd.f32 %v5650_v42, %v5791_v20  ;;  %v2796_v42 = vadd.f32 %v5655_v61, %v5791_v20 }
 0x3ca   : > { %v4187_v43 = vpack.c.bf16 %v3504_v38, %v3503_v6  ;;  %v3506_v0 = vmax.f32 %v4227_v18, 0.0 }
 0x3cc   : > { %3759 = vst [vmem:[%s5808_s22] sm:$0xff] %v4187_v43  ;;  %v4188_v31 = vpack.c.bf16 %v3506_v0, %v3505_v58  ;;  %v3354_v48 = vpop.f32.mrb[68].mxu0 }
 0x3cd   : > { %v4229_v47 = vadd.f32 %v3354_v48, %v2776_v24  ;;  %v3356_v38 = vpop.f32.mrb[69].mxu0  ;;  %v2788_v24 = vadd.f32 %v5647_v16, %v5793_v53 }
 0x3ce   : > { %3760 = vst [vmem:[%s5808_s22 + $0x8] sm:$0xff] %v4188_v31  ;;  %v4231_v23 = vadd.f32 %v3356_v38, %v2778_v9  ;;  %v3358_v37 = vpop.f32.mrb[70].mxu0  ;;  %v2792_v9 = vadd.f32 %v5653_v62, %v5793_v53 }
 0x3cf   : > { %v3507_v27 = vmax.f32 %v4229_v47, 0.0  ;;  %v4233_v8 = vadd.f32 %v3358_v37, %v2780_v29  ;;  %v3360_v19 = vpop.f32.mrb[71].mxu0 }
 0x3d0   : > { %v3508_v13 = vmax.f32 %v4231_v23, 0.0  ;;  %v4235_v43 = vadd.f32 %v3360_v19, %v2782_v36  ;;  %v2800_v19 = vadd.f32 %v5660_v14, %v5791_v20  ;;  %v2806_v14 = vadd.f32 %v5665_v34, %v5791_v20 }
 0x3d1   : > { %v3509_v58 = vmax.f32 %v4233_v8, 0.0 }
 0x3d2   : > { %v4189_v11 = vpack.c.bf16 %v3508_v13, %v3507_v27  ;;  %v3510_v59 = vmax.f32 %v4235_v43, 0.0  ;;  %v2798_v27 = vadd.f32 %v5657_v63, %v5793_v53 }
 0x3d4   : > { %3761 = vst [vmem:[%s5808_s22 + $0x10] sm:$0xff] %v4189_v11  ;;  %v4190_v55 = vpack.c.bf16 %v3510_v59, %v3509_v58  ;;  %v3364_v6 = vpop.f32.mrb[72].mxu0  ;;  %v2802_v58 = vadd.f32 %v5663_v7, %v5793_v53 }
 0x3d5   : > { %v4237_v18 = vadd.f32 %v3364_v6, %v2786_v46  ;;  %v3366_v0 = vpop.f32.mrb[73].mxu0 }
 0x3d6   : > { %3762 = vst [vmem:[%s5808_s22 + $0x18] sm:$0xff] %v4190_v55  ;;  %v4239_v31 = vadd.f32 %v3366_v0, %v2788_v24  ;;  %v3368_v48 = vpop.f32.mrb[74].mxu0  ;;  %v2808_v0 = vadd.f32 %v5667_v3, %v5793_v53 }
 0x3d7   : > { %v3511_v29 = vmax.f32 %v4237_v18, 0.0  ;;  %v4241_v28 = vadd.f32 %v3368_v48, %v2790_v17  ;;  %v3370_v47 = vpop.f32.mrb[75].mxu0 }
 0x3d8   : > { %v3512_v16 = vmax.f32 %v4239_v31, 0.0  ;;  %v4243_v38 = vadd.f32 %v3370_v47, %v2792_v9  ;;  %v2810_v31 = vadd.f32 %v5670_v5, %v5791_v20  ;;  %v2816_v5 = vadd.f32 %v5675_v33, %v5791_v20 }
 0x3d9   : > { %v3513_v36 = vmax.f32 %v4241_v28, 0.0  ;;  %v2812_v28 = vadd.f32 %v5673_v21, %v5793_v53 }
 0x3da   : > { %v4191_v23 = vpack.c.bf16 %v3512_v16, %v3511_v29  ;;  %v3514_v37 = vmax.f32 %v4243_v38, 0.0 }
 0x3dc   : > { %3763 = vst [vmem:[%s5808_s22 + $0x20] sm:$0xff] %v4191_v23  ;;  %v4192_v62 = vpack.c.bf16 %v3514_v37, %v3513_v36  ;;  %v3374_v8 = vpop.f32.mrb[76].mxu0 }
 0x3dd   : > { %v4245_v13 = vadd.f32 %v3374_v8, %v2796_v42  ;;  %v3376_v43 = vpop.f32.mrb[77].mxu0 }
 0x3de   : > { %3764 = vst [vmem:[%s5808_s22 + $0x28] sm:$0xff] %v4192_v62  ;;  %v4247_v11 = vadd.f32 %v3376_v43, %v2798_v27  ;;  %v3378_v59 = vpop.f32.mrb[78].mxu0  ;;  %v2818_v62 = vadd.f32 %v5677_v50, %v5793_v53 }
 0x3df   : > { %v3515_v46 = vmax.f32 %v4245_v13, 0.0  ;;  %v4249_v61 = vadd.f32 %v3378_v59, %v2800_v19  ;;  %v3380_v24 = vpop.f32.mrb[79].mxu0  ;;  %v2820_v19 = vadd.f32 %v5680_v4, %v5791_v20  ;;  %v2826_v4 = vadd.f32 %v5685_v41, %v5791_v20 }
 0x3e0   : > { %v3516_v63 = vmax.f32 %v4247_v11, 0.0  ;;  %v4251_v55 = vadd.f32 %v3380_v24, %v2802_v58  ;;  %v2822_v58 = vadd.f32 %v5683_v52, %v5793_v53 }
 0x3e1   : > { %v3517_v6 = vmax.f32 %v4249_v61, 0.0 }
 0x3e2   : > { %v4193_v17 = vpack.c.bf16 %v3516_v63, %v3515_v46  ;;  %v3518_v18 = vmax.f32 %v4251_v55, 0.0 }
 0x3e4   : > { %3765 = vst [vmem:[%s5808_s22 + $0x30] sm:$0xff] %v4193_v17  ;;  %v4194_v7 = vpack.c.bf16 %v3518_v18, %v3517_v6  ;;  %v3384_v9 = vpop.f32.mrb[80].mxu0  ;;  %v2828_v17 = vadd.f32 %v5687_v10, %v5793_v53 }
 0x3e5   : > { %v4253_v48 = vadd.f32 %v3384_v9, %v2806_v14  ;;  %v3386_v29 = vpop.f32.mrb[81].mxu0  ;;  %v2830_v14 = vadd.f32 %v5690_v51, %v5791_v20  ;;  %v2832_v9 = vadd.f32 %v5693_v32, %v5793_v53  ;;  %v2836_v51 = vadd.f32 %v5695_v40, %v5791_v20 }
 0x3e6   : > { %3766 = vst [vmem:[%s5808_s22 + $0x38] sm:$0xff] %v4194_v7  ;;  %v4255_v47 = vadd.f32 %v3386_v29, %v2808_v0  ;;  %v3388_v16 = vpop.f32.mrb[82].mxu0 }
 0x3e7   : > { %v3519_v38 = vmax.f32 %v4253_v48, 0.0  ;;  %v4257_v34 = vadd.f32 %v3388_v16, %v2810_v31  ;;  %v3390_v36 = vpop.f32.mrb[83].mxu0 }
 0x3e8   : > { %v3520_v3 = vmax.f32 %v4255_v47, 0.0  ;;  %v4259_v23 = vadd.f32 %v3390_v36, %v2812_v28  ;;  %v2838_v36 = vadd.f32 %v5697_v2, %v5793_v53 }
 0x3e9   : > { %v3521_v37 = vmax.f32 %v4257_v34, 0.0 }
 0x3ea   : > { %v4195_v42 = vpack.c.bf16 %v3520_v3, %v3519_v38  ;;  %v3522_v27 = vmax.f32 %v4259_v23, 0.0  ;;  %v2840_v23 = vadd.f32 %v5700_v30, %v5791_v20  ;;  %v2846_v30 = vadd.f32 %v5705_v25, %v5791_v20 }
 0x3ec   : > { %3767 = vst [vmem:[%s5808_s22 + $0x40] sm:$0xff] %v4195_v42  ;;  %v4196_v21 = vpack.c.bf16 %v3522_v27, %v3521_v37  ;;  %v3394_v8 = vpop.f32.mrb[84].mxu0  ;;  %v2842_v27 = vadd.f32 %v5703_v1, %v5793_v53 }
 0x3ed   : > { %v4261_v13 = vadd.f32 %v3394_v8, %v2816_v5  ;;  %v3396_v43 = vpop.f32.mrb[85].mxu0 }
 0x3ee   : > { %3768 = vst [vmem:[%s5808_s22 + $0x48] sm:$0xff] %v4196_v21  ;;  %v4263_v11 = vadd.f32 %v3396_v43, %v2818_v62  ;;  %v3398_v59 = vpop.f32.mrb[86].mxu0 }
 0x3ef   : > { %v3523_v46 = vmax.f32 %v4261_v13, 0.0  ;;  %v4265_v33 = vadd.f32 %v3398_v59, %v2820_v19  ;;  %v3400_v61 = vpop.f32.mrb[87].mxu0 }
 0x3f0   : > { %v3524_v50 = vmax.f32 %v4263_v11, 0.0  ;;  %v4267_v24 = vadd.f32 %v3400_v61, %v2822_v58  ;;  %v2848_v11 = vadd.f32 %v5707_v44, %v5793_v53 }
 0x3f1   : > { %v3525_v63 = vmax.f32 %v4265_v33, 0.0 }
 0x3f2   : > { %v4197_v55 = vpack.c.bf16 %v3524_v50, %v3523_v46  ;;  %v3526_v6 = vmax.f32 %v4267_v24, 0.0  ;;  %v2850_v46 = vadd.f32 %v5710_v56, %v5791_v20  ;;  %v2852_v50 = vadd.f32 %v5713_v45, %v5793_v53 }
 0x3f3   : > { %v2856_v56 = vadd.f32 %v5715_v35, %v5791_v20 }
 0x3f4   : > { %3769 = vst [vmem:[%s5808_s22 + $0x50] sm:$0xff] %v4197_v55  ;;  %v4198_v52 = vpack.c.bf16 %v3526_v6, %v3525_v63  ;;  %v3404_v18 = vpop.f32.mrb[88].mxu0 }
 0x3f5   : > { %v4269_v0 = vadd.f32 %v3404_v18, %v2826_v4  ;;  %v3406_v7 = vpop.f32.mrb[89].mxu0 }
 0x3f6   : > { %3770 = vst [vmem:[%s5808_s22 + $0x58] sm:$0xff] %v4198_v52  ;;  %v4271_v31 = vadd.f32 %v3406_v7, %v2828_v17  ;;  %v3408_v48 = vpop.f32.mrb[90].mxu0  ;;  %v2860_v7 = vadd.f32 %v5720_v15, %v5791_v20  ;;  %v2866_v15 = vadd.f32 %v5725_v60, %v5791_v20 }
 0x3f7   : > { %v3527_v29 = vmax.f32 %v4269_v0, 0.0  ;;  %v4273_v41 = vadd.f32 %v3408_v48, %v2830_v14  ;;  %v3410_v28 = vpop.f32.mrb[91].mxu0  ;;  %v2858_v14 = vadd.f32 %v5717_v26, %v5793_v53  ;;  %v2862_v48 = vadd.f32 %v5723_v54, %v5793_v53 }
 0x3f8   : > { %v3528_v10 = vmax.f32 %v4271_v31, 0.0  ;;  %v4275_v47 = vadd.f32 %v3410_v28, %v2832_v9 }
 0x3f9   : > { %v3529_v16 = vmax.f32 %v4273_v41, 0.0 }
 0x3fa   : > { %v4199_v38 = vpack.c.bf16 %v3528_v10, %v3527_v29  ;;  %v3530_v34 = vmax.f32 %v4275_v47, 0.0 }
 0x3fc   : > { %3771 = vst [vmem:[%s5808_s22 + $0x60] sm:$0xff] %v4199_v38  ;;  %v4200_v32 = vpack.c.bf16 %v3530_v34, %v3529_v16  ;;  %v3414_v3 = vpop.f32.mrb[92].mxu0 }
 0x3fd   : > { %v4277_v37 = vadd.f32 %v3414_v3, %v2836_v51  ;;  %v3416_v42 = vpop.f32.mrb[93].mxu0  ;;  %v2868_v51 = vadd.f32 %v5727_v12, %v5793_v53 }
 0x3fe   : > { %3772 = vst [vmem:[%s5808_s22 + $0x68] sm:$0xff] %v4200_v32  ;;  %v4279_v5 = vadd.f32 %v3416_v42, %v2838_v36  ;;  %v3418_v62 = vpop.f32.mrb[94].mxu0  ;;  %v2870_v32 = vadd.f32 %v5730_v39, %v5791_v20  ;;  %v2876_v39 = vadd.f32 %v5735_v57, %v5791_v20 }
 0x3ff   : > { %v3531_v21 = vmax.f32 %v4277_v37, 0.0  ;;  %v4281_v40 = vadd.f32 %v3418_v62, %v2840_v23  ;;  %v3420_v8 = vpop.f32.mrb[95].mxu0  ;;  %v2872_v37 = vadd.f32 %v5733_v49, %v5793_v53 }
 0x400   : > { %v3532_v2 = vmax.f32 %v4279_v5, 0.0  ;;  %v4283_v19 = vadd.f32 %v3420_v8, %v2842_v27 }
 0x401   : > { %v3533_v13 = vmax.f32 %v4281_v40, 0.0 }
 0x402   : > { %v4201_v43 = vpack.c.bf16 %v3532_v2, %v3531_v21  ;;  %v3534_v58 = vmax.f32 %v4283_v19, 0.0  ;;  %v2878_v19 = vadd.f32 %v5737_v22, %v5793_v53 }
 0x404   : > { %3773 = vst [vmem:[%s5808_s22 + $0x70] sm:$0xff] %v4201_v43  ;;  %v4202_v1 = vpack.c.bf16 %v3534_v58, %v3533_v13  ;;  %v3424_v59 = vpop.f32.mrb[96].mxu0  ;;  %v6070_v43 = vld [vmem:[#allocation12_spill] sm:$0xff] }
 0x405   : > { %v4285_v33 = vadd.f32 %v3424_v59, %v2846_v30  ;;  %v3426_v61 = vpop.f32.mrb[97].mxu0  ;;  %v2880_v58 = vadd.f32 %v6070_v43, %v5791_v20  ;;  %v6081_v43 = vld [vmem:[#allocation23_spill] sm:$0xff] }
 0x406   : > { %3774 = vst [vmem:[%s5808_s22 + $0x78] sm:$0xff] %v4202_v1  ;;  %v4287_v24 = vadd.f32 %v3426_v61, %v2848_v11  ;;  %v3428_v63 = vpop.f32.mrb[98].mxu0  ;;  %v6071_v1 = vld [vmem:[#allocation14_spill] sm:$0xff] }
 0x407   : > { %v3535_v55 = vmax.f32 %v4285_v33, 0.0  ;;  %v4289_v25 = vadd.f32 %v3428_v63, %v2850_v46  ;;  %v3430_v6 = vpop.f32.mrb[99].mxu0  ;;  %v2882_v59 = vadd.f32 %v6071_v1, %v5793_v53  ;;  %v6082_v1 = vld [vmem:[#allocation24_spill] sm:$0xff] }
 0x408   : > { %v3536_v44 = vmax.f32 %v4287_v24, 0.0  ;;  %v4291_v4 = vadd.f32 %v3430_v6, %v2852_v50  ;;  %v6072_v6 = vld [vmem:[#allocation13_spill] sm:$0xff] }
 0x409   : > { %v3537_v17 = vmax.f32 %v4289_v25, 0.0 }
 0x40a   : > { %v4203_v52 = vpack.c.bf16 %v3536_v44, %v3535_v55  ;;  %v3538_v18 = vmax.f32 %v4291_v4, 0.0  ;;  %v2886_v44 = vadd.f32 %v6072_v6, %v5791_v20  ;;  %v6073_v4 = vld [vmem:[#allocation16_spill] sm:$0xff] }
 0x40c   : > { %3775 = vst [vmem:[%s5808_s22 + $0x80] sm:$0xff] %v4203_v52  ;;  %v4204_v45 = vpack.c.bf16 %v3538_v18, %v3537_v17  ;;  %v3434_v0 = vpop.f32.mrb[100].mxu0  ;;  %v2888_v17 = vadd.f32 %v6073_v4, %v5793_v53 }
 0x40d   : > { %v4293_v9 = vadd.f32 %v3434_v0, %v2856_v56  ;;  %v3436_v31 = vpop.f32.mrb[101].mxu0  ;;  %v6074_v56 = vld [vmem:[#allocation15_spill] sm:$0xff] }
 0x40e   : > { %3776 = vst [vmem:[%s5808_s22 + $0x88] sm:$0xff] %v4204_v45  ;;  %v4295_v29 = vadd.f32 %v3436_v31, %v2858_v14  ;;  %v3438_v41 = vpop.f32.mrb[102].mxu0  ;;  %v2890_v14 = vadd.f32 %v6074_v56, %v5791_v20  ;;  %v6085_v56 = vld [vmem:[#allocation27_spill] sm:$0xff] }
 0x40f   : > { %v3539_v28 = vmax.f32 %v4293_v9, 0.0  ;;  %v4297_v35 = vadd.f32 %v3438_v41, %v2860_v7  ;;  %v3440_v10 = vpop.f32.mrb[103].mxu0  ;;  %v6075_v7 = vld [vmem:[#allocation18_spill] sm:$0xff] }
 0x410   : > { %v3540_v26 = vmax.f32 %v4295_v29, 0.0  ;;  %v4299_v47 = vadd.f32 %v3440_v10, %v2862_v48  ;;  %v2892_v9 = vadd.f32 %v6075_v7, %v5793_v53  ;;  %v6086_v7 = vld [vmem:[#allocation28_spill] sm:$0xff] }
 0x411   : > { %v3541_v16 = vmax.f32 %v4297_v35, 0.0 }
 0x412   : > { %v4205_v38 = vpack.c.bf16 %v3540_v26, %v3539_v28  ;;  %v3542_v34 = vmax.f32 %v4299_v47, 0.0 }
 0x414   : > { %3777 = vst [vmem:[%s5808_s22 + $0x90] sm:$0xff] %v4205_v38  ;;  %v4206_v54 = vpack.c.bf16 %v3542_v34, %v3541_v16  ;;  %v3444_v36 = vpop.f32.mrb[104].mxu0  ;;  %v6076_v38 = vld [vmem:[#allocation17_spill] sm:$0xff] }
 0x415   : > { %v4301_v3 = vadd.f32 %v3444_v36, %v2866_v15  ;;  %v3446_v23 = vpop.f32.mrb[105].mxu0  ;;  %v2896_v34 = vadd.f32 %v6076_v38, %v5791_v20  ;;  %v6077_v15 = vld [vmem:[#allocation19_spill] sm:$0xff] }
 0x416   : > { %3778 = vst [vmem:[%s5808_s22 + $0x98] sm:$0xff] %v4206_v54  ;;  %v4303_v42 = vadd.f32 %v3446_v23, %v2868_v51  ;;  %v3448_v27 = vpop.f32.mrb[106].mxu0  ;;  %v2898_v51 = vadd.f32 %v6077_v15, %v5793_v53 }
 0x417   : > { %v3543_v5 = vmax.f32 %v4301_v3, 0.0  ;;  %v4305_v60 = vadd.f32 %v3448_v27, %v2870_v32  ;;  %v3450_v62 = vpop.f32.mrb[107].mxu0  ;;  %v6078_v32 = vld [vmem:[#allocation20_spill] sm:$0xff] }
 0x418   : > { %v3544_v12 = vmax.f32 %v4303_v42, 0.0  ;;  %v4307_v21 = vadd.f32 %v3450_v62, %v2872_v37  ;;  %v2900_v3 = vadd.f32 %v6078_v32, %v5791_v20  ;;  %v6079_v42 = vld [vmem:[#allocation21_spill] sm:$0xff] }
 0x419   : > { %v3545_v40 = vmax.f32 %v4305_v60, 0.0  ;;  %v2902_v27 = vadd.f32 %v6079_v42, %v5793_v53 }
 0x41a   : > { %v4207_v8 = vpack.c.bf16 %v3544_v12, %v3543_v5  ;;  %v3546_v2 = vmax.f32 %v4307_v21, 0.0 }
 0x41c   : > { %3779 = vst [vmem:[%s5808_s22 + $0xa0] sm:$0xff] %v4207_v8  ;;  %v4208_v49 = vpack.c.bf16 %v3546_v2, %v3545_v40  ;;  %v3454_v13 = vpop.f32.mrb[108].mxu0 }
 0x41d   : > { %v4309_v30 = vadd.f32 %v3454_v13, %v2876_v39  ;;  %v3456_v11 = vpop.f32.mrb[109].mxu0 }
 0x41e   : > { %3780 = vst [vmem:[%s5808_s22 + $0xa8] sm:$0xff] %v4208_v49  ;;  %v4311_v46 = vadd.f32 %v3456_v11, %v2878_v19  ;;  %v3458_v33 = vpop.f32.mrb[110].mxu0  ;;  %v6080_v49 = vld [vmem:[#allocation22_spill] sm:$0xff] }
 0x41f   : > { %v3547_v61 = vmax.f32 %v4309_v30, 0.0  ;;  %v4313_v57 = vadd.f32 %v3458_v33, %v2880_v58  ;;  %v3460_v50 = vpop.f32.mrb[111].mxu0  ;;  %v2906_v13 = vadd.f32 %v6080_v49, %v5791_v20  ;;  %v2908_v58 = vadd.f32 %v6081_v43, %v5793_v53 }
 0x420   : > { %v3548_v22 = vmax.f32 %v4311_v46, 0.0  ;;  %v4315_v24 = vadd.f32 %v3460_v50, %v2882_v59  ;;  %v2910_v59 = vadd.f32 %v6082_v1, %v5791_v20 }
 0x421   : > { %v3549_v63 = vmax.f32 %v4313_v57, 0.0 }
 0x422   : > { %v4209_v55 = vpack.c.bf16 %v3548_v22, %v3547_v61  ;;  %v3550_v25 = vmax.f32 %v4315_v24, 0.0  ;;  %v6083_v61 = vld [vmem:[#allocation25_spill] sm:$0xff] }
 0x423   : > { %v2912_v57 = vadd.f32 %v6083_v61, %v5793_v53 }
 0x424   : > { %3781 = vst [vmem:[%s5808_s22 + $0xb0] sm:$0xff] %v4209_v55  ;;  %v4210_v52 = vpack.c.bf16 %v3550_v25, %v3549_v63  ;;  %v3464_v18 = vpop.f32.mrb[112].mxu0 }
 0x425   : > { %v4317_v45 = vadd.f32 %v3464_v18, %v2886_v44  ;;  %v3466_v0 = vpop.f32.mrb[113].mxu0 }
 0x426   : > { %3782 = vst [vmem:[%s5808_s22 + $0xb8] sm:$0xff] %v4210_v52  ;;  %v4319_v31 = vadd.f32 %v3466_v0, %v2888_v17  ;;  %v3468_v48 = vpop.f32.mrb[114].mxu0  ;;  %v6084_v52 = vld [vmem:[#allocation26_spill] sm:$0xff] }
 0x427   : > { %v3551_v29 = vmax.f32 %v4317_v45, 0.0  ;;  %v4321_v41 = vadd.f32 %v3468_v48, %v2890_v14  ;;  %v3470_v28 = vpop.f32.mrb[115].mxu0  ;;  %v2916_v18 = vadd.f32 %v6084_v52, %v5791_v20  ;;  %v2918_v14 = vadd.f32 %v6085_v56, %v5793_v53 }
 0x428   : > { %v3552_v35 = vmax.f32 %v4319_v31, 0.0  ;;  %v4323_v10 = vadd.f32 %v3470_v28, %v2892_v9  ;;  %v2920_v9 = vadd.f32 %v6086_v7, %v5791_v20 }
 0x429   : > { %v3553_v26 = vmax.f32 %v4321_v41, 0.0 }
 0x42a   : > { %v4211_v47 = vpack.c.bf16 %v3552_v35, %v3551_v29  ;;  %v3554_v16 = vmax.f32 %v4323_v10, 0.0  ;;  %v6087_v29 = vld [vmem:[#allocation29_spill] sm:$0xff] }
 0x42b   : > { %v2922_v41 = vadd.f32 %v6087_v29, %v5793_v53 }
 0x42c   : > { %3783 = vst [vmem:[%s5808_s22 + $0xc0] sm:$0xff] %v4211_v47  ;;  %v4212_v54 = vpack.c.bf16 %v3554_v16, %v3553_v26  ;;  %v3474_v36 = vpop.f32.mrb[116].mxu0 }
 0x42d   : > { %v4325_v23 = vadd.f32 %v3474_v36, %v2896_v34  ;;  %v3476_v37 = vpop.f32.mrb[117].mxu0 }
 0x42e   : > { %3784 = vst [vmem:[%s5808_s22 + $0xc8] sm:$0xff] %v4212_v54  ;;  %v4327_v5 = vadd.f32 %v3476_v37, %v2898_v51  ;;  %v3478_v60 = vpop.f32.mrb[118].mxu0 }
 0x42f   : > { %v3555_v62 = vmax.f32 %v4325_v23, 0.0  ;;  %v4329_v12 = vadd.f32 %v3478_v60, %v2900_v3  ;;  %v3480_v21 = vpop.f32.mrb[119].mxu0 }
 0x430   : > { %v3556_v40 = vmax.f32 %v4327_v5, 0.0  ;;  %v4331_v8 = vadd.f32 %v3480_v21, %v2902_v27 }
 0x431   : > { %v3557_v2 = vmax.f32 %v4329_v12, 0.0 }
 0x432   : > { %v4213_v39 = vpack.c.bf16 %v3556_v40, %v3555_v62  ;;  %v3558_v19 = vmax.f32 %v4331_v8, 0.0 }
 0x434   : > { %3785 = vst [vmem:[%s5808_s22 + $0xd0] sm:$0xff] %v4213_v39  ;;  %v4214_v30 = vpack.c.bf16 %v3558_v19, %v3557_v2  ;;  %v3484_v11 = vpop.f32.mrb[120].mxu0 }
 0x435   : > { %v4333_v46 = vadd.f32 %v3484_v11, %v2906_v13  ;;  %v3486_v33 = vpop.f32.mrb[121].mxu0 }
 0x436   : > { %3786 = vst [vmem:[%s5808_s22 + $0xd8] sm:$0xff] %v4214_v30  ;;  %v4335_v50 = vadd.f32 %v3486_v33, %v2908_v58  ;;  %v3488_v22 = vpop.f32.mrb[122].mxu0 }
 0x437   : > { %v3559_v24 = vmax.f32 %v4333_v46, 0.0  ;;  %v4337_v63 = vadd.f32 %v3488_v22, %v2910_v59  ;;  %v3490_v55 = vpop.f32.mrb[123].mxu0 }
 0x438   : > { %v3560_v25 = vmax.f32 %v4335_v50, 0.0  ;;  %v4339_v6 = vadd.f32 %v3490_v55, %v2912_v57 }
 0x439   : > { %v3561_v44 = vmax.f32 %v4337_v63, 0.0 }
 0x43a   : > { %v4215_v4 = vpack.c.bf16 %v3560_v25, %v3559_v24  ;;  %v3562_v17 = vmax.f32 %v4339_v6, 0.0 }
 0x43c   : > { %3787 = vst [vmem:[%s5808_s22 + $0xe0] sm:$0xff] %v4215_v4  ;;  %v4216_v45 = vpack.c.bf16 %v3562_v17, %v3561_v44  ;;  %v3494_v0 = vpop.f32.mrb[124].mxu0 }
 0x43d   : > { %v4341_v31 = vadd.f32 %v3494_v0, %v2916_v18  ;;  %v3496_v48 = vpop.f32.mrb[125].mxu0 }
 0x43e   : > { %3788 = vst [vmem:[%s5808_s22 + $0xe8] sm:$0xff] %v4216_v45  ;;  %v4343_v28 = vadd.f32 %v3496_v48, %v2918_v14  ;;  %v3498_v35 = vpop.f32.mrb[126].mxu0 }
 0x43f   : > { %v3563_v10 = vmax.f32 %v4341_v31, 0.0  ;;  %v4345_v26 = vadd.f32 %v3498_v35, %v2920_v9  ;;  %v3500_v47 = vpop.f32.mrb[127].mxu0 }
 0x440   : > { %v3564_v16 = vmax.f32 %v4343_v28, 0.0  ;;  %v4347_v38 = vadd.f32 %v3500_v47, %v2922_v41 }
 0x441   : > { %v3565_v20 = vmax.f32 %v4345_v26, 0.0 }
 0x442   : > { %v4217_v34 = vpack.c.bf16 %v3564_v16, %v3563_v10  ;;  %v3566_v15 = vmax.f32 %v4347_v38, 0.0 }
 0x444   : > { %3789 = vst [vmem:[%s5808_s22 + $0xf0] sm:$0xff] %v4217_v34  ;;  %v4218_v53 = vpack.c.bf16 %v3566_v15, %v3565_v20 }
 0x446   : > { %3790 = vst [vmem:[%s5808_s22 + $0xf8] sm:$0xff] %v4218_v53 }
 0x447   : > { %4879 = shalt.err (!%p4876_p0)
}
 0x448   : > { %s4880_s25 = scalar_lea.hbm %s5961_s30, 4096  ;;  %s4884_s14 = scalar_lea.hbm %s6018_s4, 8192 }
 0x449   : > { %p4881_p4 = scmp.ne.s32.totalorder %s5961_s30, %s4880_s25  ;;  %p4885_p7 = scmp.lt.u32.totalorder %s5961_s30, %s6018_s4 }
 0x44a   : > { %p4886_p2 = scmp.lt.u32.totalorder %s4884_s14, %s4880_s25  ;;  %p4888_p12 = scmp.lt.u32.totalorder %s4880_s25, %s5961_s30 }
 0x44b   : > { %p4882_p13 = pnand %p4881_p4, %p6088_p1 }
 0x44c   : > { %p4887_p8 = por %p4886_p2, %p4885_p7 }
 0x44d   : > { %p4883_p6 = pneg %p4882_p13 }
 0x44e   : > { %p4889_p10 = por %p4888_p12, %p4887_p8 }
 0x450   : > { %p4890_p3 = pnand %p4889_p10, %p4883_p6 }
 0x452   : > { %4893 = shalt.err (!%p4890_p3)
}
 0x453   : > { %s4965_s13 = smov 128   ;;  %s4966_s7 = smov 8  }
 0x454   : > { %4486 = dma.vmem_to_hbm [thread:$0]  (%p6088_p1), %s5963_s24, 4096, %s5961_s30, %s3792_s10, %s4965_s13, %s4965_s13, %s4966_s7  }
 0x455 PF: > { %s3823_s28 = sand.u32 1, %s4932_s15   ;;  %p6089_p5 = scmp.ne.s32.totalorder %s6028_s26, 0 }
 0x456   : > { %p6090_p9 = scmp.ge.s32.totalorder %s4952_s20, 2  ;;  %s3824_s12 = scalar_lea.sflag [#allocation4], %s3823_s28 }
 0x458   : > { %p4500_p11 = pnand %p6090_p9, %p6089_p5 }
 0x45a   : > { %4927 = dma.done.wait (!%p4500_p11), %s3824_s12, 4096  }
 0x45b   : > { %4929 = vsyncadd (!%p4500_p11), %s3824_s12, 4294963200  ;;  %s21_s20 = sadd.s32 1, %s4952_s20   ;;  %s6091_s15 = smov %s4936_s16 }
 0x45c   : > { %p18_p0 = scmp.ge.s32.totalorder %s21_s20, 4   ;;  %s6092_s16 = smov %s4940_s17 }
 0x45d   : > { %s6093_s17 = smov %s5134_s11  ;;  %s6094_s18 = smov %s4948_s19 }
 0x45e   : > { %s6095_s19 = smov %s6097_s5  ;;  %20 = sbr.rel (!%p18_p0) target bundleno = 7 (0x7), region = 92 }
 0x465   :  { %3829 = vsyncpa [#allocation3], 1 }
 0x466   :  { %3831 = vsyncpa [#allocation3 + $0x1], 1 }
 0x467   :  { %3832 = vsyncpa [#allocation6], 1 }
 0x468   :  { %3833 = vsyncpa [#allocation4], 1 }
 0x469   :  { %3835 = vsyncpa [#allocation4 + $0x1], 1 }

</bundles_post_ra>
